<compile_context>
chip_gen: v7x
topology: tpu7x:2x2x1
jax: 0.10.0
libtpu: 0.0.40
codegen_flags: <defaults>
</compile_context>

<pallas_src>
import math
from functools import partial

import jax
import jax.numpy as jnp
from jax import lax
from jax.experimental import pallas as pl
from jax.experimental.pallas import tpu as pltpu

EPS = 1e-5
K_DIRS = 4

# Flip to jnp.bfloat16 for production (~2-4x MXU throughput, half the weight VMEM).
_DOT_DTYPE = jnp.float32


def _vmem_capacity_bytes():
    try:
        return int(pltpu.get_tpu_info().vmem_capacity_bytes)
    except Exception:
        return 64 * 1024 * 1024          # conservative default (v7x-sized)


_VMEM_CAP = _vmem_capacity_bytes()
# ~75% of physical, capped at 100 MiB: ~96 MiB on v5e/v6e (128 MiB), ~48 MiB on v7x (64 MiB).
_VMEM_LIMIT = min(100 * 1024 * 1024, (_VMEM_CAP * 3) // 4)
_DEF_TILE_ROWS = 1024 if _VMEM_LIMIT >= 64 * 1024 * 1024 else 512


def _softplus(x):
    # Numerically stable softplus using only exp/log/abs/max (Mosaic-safe).
    return jnp.maximum(x, 0.0) + jnp.log(1.0 + jnp.exp(-jnp.abs(x)))


def _largest_divisor(n, candidates):
    for c in candidates:
        if c <= n and n % c == 0:
            return c
    return 1


def _pick_scan_block(length, target=512):
    c = (min(length, target) // 8) * 8
    while c >= 8:
        if length % c == 0:
            return c
        c -= 8
    return length


# ---------------------------------------------------------------------------
# Kernel 1: fused LayerNorm + matmul   (ln_1 + in_proj)
# ---------------------------------------------------------------------------
def _ln_matmul_kernel(x_ref, g_ref, b_ref, w_ref, o_ref, *, eps):
    x = x_ref[...].astype(jnp.float32)
    mean = jnp.mean(x, axis=-1, keepdims=True)
    var = jnp.mean(jnp.square(x - mean), axis=-1, keepdims=True)
    xn = (x - mean) * lax.rsqrt(var + eps)
    xn = xn * g_ref[...] + b_ref[...]
    o_ref[...] = jnp.dot(xn.astype(_DOT_DTYPE), w_ref[...].astype(_DOT_DTYPE),
                         preferred_element_type=jnp.float32).astype(o_ref.dtype)


def ln_matmul(x, gamma, beta, w_t, *, eps=EPS, tile_rows=None):
    n, f_in = x.shape
    f_out = w_t.shape[1]
    tile_rows = min(_DEF_TILE_ROWS if tile_rows is None else tile_rows, n)
    return pl.pallas_call(
        partial(_ln_matmul_kernel, eps=eps),
        out_shape=jax.ShapeDtypeStruct((n, f_out), jnp.float32),
        grid_spec=pltpu.PrefetchScalarGridSpec(
            num_scalar_prefetch=0,
            grid=(pl.cdiv(n, tile_rows),),
            in_specs=[
                pl.BlockSpec((tile_rows, f_in), lambda i: (i, 0)),
                pl.BlockSpec((1, f_in), lambda i: (0, 0)),
                pl.BlockSpec((1, f_in), lambda i: (0, 0)),
                pl.BlockSpec((f_in, f_out), lambda i: (0, 0)),
            ],
            out_specs=pl.BlockSpec((tile_rows, f_out), lambda i: (i, 0)),
        ),
        compiler_params=pltpu.CompilerParams(
            dimension_semantics=("parallel",),
            vmem_limit_bytes=_VMEM_LIMIT,
        ),
    )(x, gamma, beta, w_t)


# ---------------------------------------------------------------------------
# Kernel 2: fused x_proj / dt_proj / softplus + selective-scan recurrence.
#
# grid = (B, K, L // block_len); the (N, D) state lives in a VMEM scratch and is
# carried across the "arbitrary" L axis.  Per grid step:
#   proj = xs_block @ [W_dt_composed | W_B | W_C]      (one MXU pass, stays in VMEM)
#   then the recurrence is processed `chunk` (=8) timesteps at a time with a
#   statically unrolled body, slab loads of delta/u/B/C and per-direction A^T / D
#   resident in VMEM.
# ---------------------------------------------------------------------------
def _ss2d_scan_kernel(xs_ref, w_ref, bias_ref, at_ref, dskip_ref, o_ref,
                      proj_ref, state_ref, *, block_len, chunk, d_inner, d_state):
    @pl.when(pl.program_id(2) == 0)
    def _init():
        state_ref[...] = jnp.zeros_like(state_ref)

    at = at_ref[...]                                   # (N, D)
    dskip = dskip_ref[...]                             # (1, D)
    bias = bias_ref[...]                               # (1, D)

    xs_blk = xs_ref[...].astype(_DOT_DTYPE)            # (block_len, D)
    proj_ref[...] = jnp.dot(xs_blk, w_ref[...].astype(_DOT_DTYPE),
                            preferred_element_type=jnp.float32)

    n_chunks = block_len // chunk

    def chunk_body(ic, state):
        t0 = pl.multiple_of(ic * chunk, chunk)
        dt_raw = proj_ref[pl.ds(t0, chunk), 0:d_inner]                       # (T, D)
        delta = _softplus(dt_raw + bias)                                     # (T, D)
        u = xs_ref[pl.ds(t0, chunk), :].astype(jnp.float32)                  # (T, D)
        b_c = proj_ref[pl.ds(t0, chunk), d_inner:d_inner + d_state]          # (T, N)
        c_c = proj_ref[pl.ds(t0, chunk),
                       d_inner + d_state:d_inner + 2 * d_state]              # (T, N)
        bT = b_c.T                                                           # (N, T)
        cT = c_c.T                                                           # (N, T)
        du = delta * u                                                       # (T, D)

        st = state
        for t in range(chunk):                           # static 8-step unroll
            dA_t = jnp.exp(delta[t:t + 1, :] * at)                           # (N, D)
            st = dA_t * st + du[t:t + 1, :] * bT[:, t:t + 1]                 # (N, D)
            y_t = (jnp.sum(st * cT[:, t:t + 1], axis=0, keepdims=True)
                   + u[t:t + 1, :] * dskip)                                  # (1, D)
            # VMEM row store; the HBM writeback is the pipelined full-block DMA.
            o_ref[pl.ds(t0 + t, 1), :] = y_t.astype(o_ref.dtype)
        return st

    state_ref[...] = lax.fori_loop(0, n_chunks, chunk_body, state_ref[...])


def ss2d_scan(xs, w_core, dt_bias, a_t, d_skip):
    b, k, seq_len, d = xs.shape
    n = a_t.shape[1]
    proj_cols = w_core.shape[2]
    block_len = _pick_scan_block(seq_len)
    chunk = _largest_divisor(block_len, (8, 4, 2, 1))
    return pl.pallas_call(
        partial(_ss2d_scan_kernel, block_len=block_len, chunk=chunk,
                d_inner=d, d_state=n),
        out_shape=jax.ShapeDtypeStruct((b, k, seq_len, d), jnp.float32),
        grid_spec=pltpu.PrefetchScalarGridSpec(
            num_scalar_prefetch=0,
            grid=(b, k, seq_len // block_len),
            in_specs=[
                pl.BlockSpec((None, None, block_len, d), lambda i, j, l: (i, j, l, 0)),
                pl.BlockSpec((None, d, proj_cols), lambda i, j, l: (j, 0, 0)),
                pl.BlockSpec((None, 1, d), lambda i, j, l: (j, 0, 0)),
                pl.BlockSpec((None, n, d), lambda i, j, l: (j, 0, 0)),
                pl.BlockSpec((None, 1, d), lambda i, j, l: (j, 0, 0)),
            ],
            out_specs=pl.BlockSpec((None, None, block_len, d),
                                   lambda i, j, l: (i, j, l, 0)),
            scratch_shapes=[
                pltpu.VMEM((block_len, proj_cols), jnp.float32),   # proj (dt|B|C)
                pltpu.VMEM((n, d), jnp.float32),                   # carried state
            ],
        ),
        compiler_params=pltpu.CompilerParams(
            dimension_semantics=("parallel", "parallel", "arbitrary"),
            vmem_limit_bytes=_VMEM_LIMIT,
        ),
    )(xs, w_core, dt_bias, a_t, d_skip)


# ---------------------------------------------------------------------------
# Kernel 3: fused out_norm LN + y*silu(z) + out_proj + residual add
# ---------------------------------------------------------------------------
def _out_fuse_kernel(y_ref, z_ref, xin_ref, g_ref, b_ref, w_ref, o_ref, *, eps):
    y = y_ref[...].astype(jnp.float32)
    mean = jnp.mean(y, axis=-1, keepdims=True)
    var = jnp.mean(jnp.square(y - mean), axis=-1, keepdims=True)
    yn = (y - mean) * lax.rsqrt(var + eps)
    yn = yn * g_ref[...] + b_ref[...]
    z = z_ref[...].astype(jnp.float32)
    h = yn * (z * jax.nn.sigmoid(z))                                   # y * silu(z)
    o_ref[...] = (xin_ref[...].astype(jnp.float32)
                  + jnp.dot(h.astype(_DOT_DTYPE), w_ref[...].astype(_DOT_DTYPE),
                            preferred_element_type=jnp.float32)).astype(o_ref.dtype)


def out_fuse(y, z, x_in, gamma, beta, w_t, *, eps=EPS, tile_rows=None):
    n, d_inner = y.shape
    c = w_t.shape[1]
    tile_rows = min(_DEF_TILE_ROWS if tile_rows is None else tile_rows, n)
    return pl.pallas_call(
        partial(_out_fuse_kernel, eps=eps),
        out_shape=jax.ShapeDtypeStruct((n, c), jnp.float32),
        grid_spec=pltpu.PrefetchScalarGridSpec(
            num_scalar_prefetch=0,
            grid=(pl.cdiv(n, tile_rows),),
            in_specs=[
                pl.BlockSpec((tile_rows, d_inner), lambda i: (i, 0)),
                pl.BlockSpec((tile_rows, d_inner), lambda i: (i, 0)),
                pl.BlockSpec((tile_rows, c), lambda i: (i, 0)),
                pl.BlockSpec((1, d_inner), lambda i: (0, 0)),
                pl.BlockSpec((1, d_inner), lambda i: (0, 0)),
                pl.BlockSpec((d_inner, c), lambda i: (0, 0)),
            ],
            out_specs=pl.BlockSpec((tile_rows, c), lambda i: (i, 0)),
        ),
        compiler_params=pltpu.CompilerParams(
            dimension_semantics=("parallel",),
            vmem_limit_bytes=_VMEM_LIMIT,
        ),
    )(y, z, x_in, gamma, beta, w_t)


# ---------------------------------------------------------------------------
# JAX glue
# ---------------------------------------------------------------------------
def depthwise_conv_silu(x, w_hwio, bias):
    # TODO(synk): the 3x3 depthwise conv is delegated to XLA (lax.conv_general_dilated),
    # not hand-written as a Pallas kernel.
    y = lax.conv_general_dilated(
        x, w_hwio, window_strides=(1, 1), padding="SAME",
        dimension_numbers=("NHWC", "HWIO", "NHWC"),
        feature_group_count=x.shape[-1])
    y = y + bias[None, None, None, :]
    return y * jax.nn.sigmoid(y)


def vss_block_forward(x, p):
    b, h, w, c = x.shape
    d_inner = p["w_out_t"].shape[0]
    seq = h * w
    npix = b * seq

    x_flat = x.reshape(npix, c)
    xz = ln_matmul(x_flat, p["ln1_g"], p["ln1_b"], p["w_in_t"])      # (npix, 2*D)
    x_part = xz[:, :d_inner].reshape(b, h, w, d_inner)
    z = xz[:, d_inner:]

    xconv = depthwise_conv_silu(x_part, p["conv_w"], p["conv_b"])

    # 4 scan directions: row-major, col-major, and their reverses (pure indexing).
    # TODO(synk): the reversed directions / wh transpose are XLA copies; they could be
    # folded into the scan kernel's index_maps (reverse index) to save 4 HBM passes.
    hw = xconv.reshape(b, seq, d_inner)
    wh = jnp.transpose(xconv, (0, 2, 1, 3)).reshape(b, seq, d_inner)
    xs = jnp.stack([hw, wh, hw[:, ::-1, :], wh[:, ::-1, :]], axis=1)  # (B, 4, L, D)

    # Fused projection (dt|B|C) + softplus + selective scan; delta/B/C never hit HBM.
    out_y = ss2d_scan(xs, p["w_core"], p["dt_bias"], p["a_t"], p["d_skip"])

    # Undo the direction permutations / flips and sum the 4 outputs.
    # TODO(synk): this un-permute + sum could be fused into out_fuse via index_maps.
    y0 = out_y[:, 0]
    y2 = out_y[:, 2, ::-1, :]
    y1 = jnp.transpose(out_y[:, 1].reshape(b, w, h, d_inner),
                       (0, 2, 1, 3)).reshape(b, seq, d_inner)
    y3 = jnp.transpose(out_y[:, 3, ::-1, :].reshape(b, w, h, d_inner),
                       (0, 2, 1, 3)).reshape(b, seq, d_inner)
    y = (y0 + y2 + y1 + y3).reshape(npix, d_inner)

    out = out_fuse(y, z, x_flat, p["on_g"], p["on_b"], p["w_out_t"])
    return out.reshape(b, h, w, c)


def vss_layer_forward(x, params):
    for p in params:
        x = vss_block_forward(x, p)
    return x


# ---------------------------------------------------------------------------
# Parameter construction (PyTorch layouts + pre-transposed / pre-fused Pallas layouts)
# ---------------------------------------------------------------------------
def init_block_params(key, dim, d_state=16, expand=2):
    d_inner = expand * dim
    dt_rank = math.ceil(dim / 16)
    k = K_DIRS
    ks = jax.random.split(key, 12)

    ln1_g = 1.0 + 0.1 * jax.random.normal(ks[0], (dim,), jnp.float32)
    ln1_b = 0.05 * jax.random.normal(ks[1], (dim,), jnp.float32)
    w_in = jax.random.normal(ks[2], (2 * d_inner, dim), jnp.float32) / math.sqrt(dim)
    conv_w_oihw = jax.random.normal(ks[3], (d_inner, 1, 3, 3), jnp.float32) / 3.0
    conv_b = 0.1 * jax.random.normal(ks[4], (d_inner,), jnp.float32)
    x_proj_weight = (jax.random.normal(ks[5], (k, dt_rank + 2 * d_state, d_inner),
                                       jnp.float32) / math.sqrt(d_inner))
    dt_projs_weight = (jax.random.uniform(ks[6], (k, d_inner, dt_rank), jnp.float32,
                                          minval=-1.0, maxval=1.0) * dt_rank ** -0.5)
    dt = jnp.exp(jax.random.uniform(ks[7], (k, d_inner), jnp.float32)
                 * (math.log(0.1) - math.log(1e-3)) + math.log(1e-3))
    dt = jnp.maximum(dt, 1e-4)
    dt_projs_bias = dt + jnp.log(-jnp.expm1(-dt))             # inverse-softplus init
    a_logs = jnp.log(jnp.tile(jnp.arange(1, d_state + 1, dtype=jnp.float32)[None, :],
                              (k * d_inner, 1)))              # (K*D, N)
    ds = jnp.ones((k * d_inner,), jnp.float32)
    on_g = 1.0 + 0.1 * jax.random.normal(ks[8], (d_inner,), jnp.float32)
    on_b = 0.05 * jax.random.normal(ks[9], (d_inner,), jnp.float32)
    w_out = jax.random.normal(ks[10], (dim, d_inner), jnp.float32) / math.sqrt(d_inner)

    a_neg = -jnp.exp(a_logs)                                  # (K*D, N)

    # Pallas-layout weights, prepared ONCE at setup:
    w_xdt_t = jnp.transpose(x_proj_weight[:, :dt_rank, :], (0, 2, 1))           # (K, D, R)
    w_xb_t = jnp.transpose(x_proj_weight[:, dt_rank:dt_rank + d_state, :], (0, 2, 1))
    w_xc_t = jnp.transpose(x_proj_weight[:, dt_rank + d_state:, :], (0, 2, 1))
    w_dtp_t = jnp.transpose(dt_projs_weight, (0, 2, 1))                         # (K, R, D)
    # Pre-compose the low-rank dt path and merge the three x-projections: (K, D, D+2N).
    w_dt_comp = jnp.einsum("kdr,kre->kde", w_xdt_t, w_dtp_t)
    w_core = jnp.concatenate([w_dt_comp, w_xb_t, w_xc_t], axis=2)

    return dict(
        # canonical (PyTorch-layout) parameters used by the JAX reference
        x_proj_weight=x_proj_weight,
        dt_projs_weight=dt_projs_weight,
        dt_projs_bias_flat=dt_projs_bias.reshape(-1),
        a_logs=a_logs,
        ds=ds,
        # shared
        conv_w=jnp.transpose(conv_w_oihw, (2, 3, 1, 0)),      # HWIO (3,3,1,D)
        conv_b=conv_b,
        # Pallas-layout
        ln1_g=ln1_g.reshape(1, dim),
        ln1_b=ln1_b.reshape(1, dim),
        w_in_t=jnp.transpose(w_in),                                               # (dim, 2D)
        w_core=w_core,                                                            # (K, D, D+2N)
        dt_bias=dt_projs_bias.reshape(k, 1, d_inner),
        a_t=jnp.transpose(a_neg.reshape(k, d_inner, d_state), (0, 2, 1)),         # (K, N, D)
        d_skip=ds.reshape(k, 1, d_inner),
        on_g=on_g.reshape(1, d_inner),
        on_b=on_b.reshape(1, d_inner),
        w_out_t=jnp.transpose(w_out),                                             # (D, dim)
    )


# ---------------------------------------------------------------------------
# Pure-JAX reference (mirrors the PyTorch forward path)
# ---------------------------------------------------------------------------
def _ref_selective_scan(u, delta, a, bs, cs, d, delta_bias):
    bsz, kd, seq = u.shape
    n = a.shape[1]
    dper = kd // bs.shape[1]
    delta = _softplus(delta + delta_bias[None, :, None])
    bx = jnp.repeat(bs, dper, axis=1)                         # (B, KD, N, L)
    cx = jnp.repeat(cs, dper, axis=1)

    def step(state, inp):
        d_l, u_l, b_l, c_l = inp
        da = jnp.exp(d_l[..., None] * a[None])
        state = da * state + (d_l * u_l)[..., None] * b_l
        return state, jnp.sum(state * c_l, axis=-1)

    inps = (jnp.moveaxis(delta, -1, 0), jnp.moveaxis(u, -1, 0),
            jnp.moveaxis(bx, -1, 0), jnp.moveaxis(cx, -1, 0))
    _, ys = lax.scan(step, jnp.zeros((bsz, kd, n), jnp.float32), inps)
    y = jnp.moveaxis(ys, 0, -1)
    return y + u * d[None, :, None]


def _ref_ss2d(x, p):
    b, h, w, c = x.shape
    d_inner = p["w_out_t"].shape[0]
    d_state = p["a_logs"].shape[1]
    dt_rank = p["dt_projs_weight"].shape[2]
    seq = h * w

    xz = x.reshape(-1, c) @ p["w_in_t"]
    xz = xz.reshape(b, h, w, 2 * d_inner)
    xp, z = xz[..., :d_inner], xz[..., d_inner:]
    xc = depthwise_conv_silu(xp, p["conv_w"], p["conv_b"])

    xchw = jnp.transpose(xc, (0, 3, 1, 2))
    x_hw = xchw.reshape(b, d_inner, seq)
    x_wh = jnp.transpose(xchw, (0, 1, 3, 2)).reshape(b, d_inner, seq)
    x_hwwh = jnp.stack([x_hw, x_wh], axis=1)
    xs = jnp.concatenate([x_hwwh, x_hwwh[..., ::-1]], axis=1)          # (B, 4, D, L)

    x_dbl = jnp.einsum("bkdl,kcd->bkcl", xs, p["x_proj_weight"])
    dts = x_dbl[:, :, :dt_rank]
    bs = x_dbl[:, :, dt_rank:dt_rank + d_state]
    cs = x_dbl[:, :, dt_rank + d_state:]
    dts = jnp.einsum("bkrl,kdr->bkdl", dts, p["dt_projs_weight"])

    u = xs.reshape(b, K_DIRS * d_inner, seq)
    delta = dts.reshape(b, K_DIRS * d_inner, seq)
    a = -jnp.exp(p["a_logs"])
    out_y = _ref_selective_scan(u, delta, a, bs, cs, p["ds"],
                                p["dt_projs_bias_flat"]).reshape(b, K_DIRS, d_inner, seq)

    inv_y = out_y[:, 2:4, :, ::-1]
    wh_y = jnp.transpose(out_y[:, 1].reshape(b, d_inner, w, h),
                         (0, 1, 3, 2)).reshape(b, d_inner, seq)
    invwh_y = jnp.transpose(inv_y[:, 1].reshape(b, d_inner, w, h),
                            (0, 1, 3, 2)).reshape(b, d_inner, seq)
    y = out_y[:, 0] + inv_y[:, 0] + wh_y + invwh_y
    y = jnp.transpose(y, (0, 2, 1)).reshape(b, h, w, d_inner)

    mean = jnp.mean(y, axis=-1, keepdims=True)
    var = jnp.mean(jnp.square(y - mean), axis=-1, keepdims=True)
    yn = (y - mean) * lax.rsqrt(var + EPS) * p["on_g"].reshape(-1) + p["on_b"].reshape(-1)
    zr = z.reshape(b, h, w, d_inner)
    yn = yn * (zr * jax.nn.sigmoid(zr))
    out = yn.reshape(-1, d_inner) @ p["w_out_t"]
    return out.reshape(b, h, w, c)


def _ref_vss_block(x, p):
    mean = jnp.mean(x, axis=-1, keepdims=True)
    var = jnp.mean(jnp.square(x - mean), axis=-1, keepdims=True)
    xn = (x - mean) * lax.rsqrt(var + EPS) * p["ln1_g"].reshape(-1) + p["ln1_b"].reshape(-1)
    return x + _ref_ss2d(xn, p)


def _ref_vss_layer(x, params):
    for p in params:
        x = _ref_vss_block(x, p)
    return x


# ---------------------------------------------------------------------------
if __name__ == "__main__":
    key = jax.random.PRNGKey(0)
    k_in, k_p1, k_p2 = jax.random.split(key, 3)

    B, H, W, DIM = 2, 8, 8, 32     # dim=32 -> d_inner=64, dt_rank=2, d_state=16, L=64
    D_STATE = 16

    x = jax.random.normal(k_in, (B, H, W, DIM), jnp.float32)
    params = (init_block_params(k_p1, DIM, d_state=D_STATE),
              init_block_params(k_p2, DIM, d_state=D_STATE))

    out = jax.jit(vss_layer_forward)(x, params)
    out = jax.block_until_ready(out)

    ref = jax.jit(_ref_vss_layer)(x, params)
    ref = jax.block_until_ready(ref)

    assert out.shape == (B, H, W, DIM), out.shape
    assert bool(jnp.all(jnp.isfinite(out)))
    assert jnp.allclose(out, ref, atol=1e-2, rtol=1e-2), \
        float(jnp.max(jnp.abs(out - ref)))

    print("KERNEL_OK")
</pallas_src>

<mosaic_0001>
module attributes {stable_mosaic.version = 11 : i64} {
  func.func @_ln_matmul_kernel(%arg0: i32, %arg1: memref<128x32xf32, #tpu.memory_space<vmem>>, %arg2: memref<1x32xf32, #tpu.memory_space<vmem>>, %arg3: memref<1x32xf32, #tpu.memory_space<vmem>>, %arg4: memref<32x128xf32, #tpu.memory_space<vmem>>, %arg5: memref<128x128xf32, #tpu.memory_space<vmem>>) attributes {dimension_semantics = [#tpu.dimension_semantics<parallel>], iteration_bounds = array<i64: 1>, scalar_prefetch = 0 : i64, scratch_operands = 0 : i64, tpu.core_type = #tpu.core_type<tc>, window_params = [{transform_indices = @transform_0, window_bounds = array<i64: 128, 32>}, {pipeline_mode = #tpu.pipeline_mode<synchronous>, transform_indices = @transform_1, window_bounds = array<i64: 1, 32>}, {pipeline_mode = #tpu.pipeline_mode<synchronous>, transform_indices = @transform_2, window_bounds = array<i64: 1, 32>}, {pipeline_mode = #tpu.pipeline_mode<synchronous>, transform_indices = @transform_3, window_bounds = array<i64: 32, 128>}, {transform_indices = @transform_4, window_bounds = array<i64: 128, 128>}]} {
    %c0 = arith.constant 0 : index
    %c0_0 = arith.constant 0 : index
    %0 = vector.load %arg1[%c0, %c0_0] : memref<128x32xf32, #tpu.memory_space<vmem>>, vector<128x32xf32>
    %cst = arith.constant dense<0.000000e+00> : vector<128xf32>
    %1 = vector.multi_reduction <add>, %0, %cst [1] : vector<128x32xf32> to vector<128xf32>
    %2 = vector.shape_cast %1 : vector<128xf32> to vector<128x1xf32>
    %cst_1 = arith.constant 3.200000e+01 : f32
    %3 = vector.broadcast %cst_1 : f32 to vector<128x1xf32>
    %4 = arith.divf %2, %3 : vector<128x1xf32>
    %5 = vector.broadcast %4 : vector<128x1xf32> to vector<128x32xf32>
    %6 = arith.subf %0, %5 : vector<128x32xf32>
    %7 = arith.mulf %6, %6 : vector<128x32xf32>
    %cst_2 = arith.constant dense<0.000000e+00> : vector<128xf32>
    %8 = vector.multi_reduction <add>, %7, %cst_2 [1] : vector<128x32xf32> to vector<128xf32>
    %9 = vector.shape_cast %8 : vector<128xf32> to vector<128x1xf32>
    %cst_3 = arith.constant 3.200000e+01 : f32
    %10 = vector.broadcast %cst_3 : f32 to vector<128x1xf32>
    %11 = arith.divf %9, %10 : vector<128x1xf32>
    %12 = vector.broadcast %4 : vector<128x1xf32> to vector<128x32xf32>
    %13 = arith.subf %0, %12 : vector<128x32xf32>
    %cst_4 = arith.constant 9.99999974E-6 : f32
    %14 = vector.broadcast %cst_4 : f32 to vector<128x1xf32>
    %15 = arith.addf %11, %14 : vector<128x1xf32>
    %16 = math.rsqrt %15 : vector<128x1xf32>
    %17 = vector.broadcast %16 : vector<128x1xf32> to vector<128x32xf32>
    %18 = arith.mulf %13, %17 : vector<128x32xf32>
    %c0_5 = arith.constant 0 : index
    %c0_6 = arith.constant 0 : index
    %19 = vector.load %arg2[%c0_5, %c0_6] : memref<1x32xf32, #tpu.memory_space<vmem>>, vector<1x32xf32>
    %20 = vector.broadcast %19 : vector<1x32xf32> to vector<128x32xf32>
    %21 = arith.mulf %18, %20 : vector<128x32xf32>
    %c0_7 = arith.constant 0 : index
    %c0_8 = arith.constant 0 : index
    %22 = vector.load %arg3[%c0_7, %c0_8] : memref<1x32xf32, #tpu.memory_space<vmem>>, vector<1x32xf32>
    %23 = vector.broadcast %22 : vector<1x32xf32> to vector<128x32xf32>
    %24 = arith.addf %21, %23 : vector<128x32xf32>
    %c0_9 = arith.constant 0 : index
    %c0_10 = arith.constant 0 : index
    %25 = vector.load %arg4[%c0_9, %c0_10] : memref<32x128xf32, #tpu.memory_space<vmem>>, vector<32x128xf32>
    %cst_11 = arith.constant dense<0.000000e+00> : vector<128x128xf32>
    %26 = tpu.matmul %24, %25, %cst_11 {dimension_numbers = #tpu.dot_dimension_numbers<[1], [0], [0], [1], [0, 0, 1, 1], [], []>} : vector<128x32xf32>, vector<32x128xf32>, vector<128x128xf32> -> vector<128x128xf32>
    %c0_12 = arith.constant 0 : index
    %c0_13 = arith.constant 0 : index
    %27 = vector.load %arg5[%c0_12, %c0_13] : memref<128x128xf32, #tpu.memory_space<vmem>>, vector<128x128xf32>
    tpu.vector_store %arg5[%c0_12, %c0_13], %26 {strides = array<i32>} : memref<128x128xf32, #tpu.memory_space<vmem>>, vector<128x128xf32>,
    return
  }
  func.func @transform_0(%arg0: i32) -> (i32, i32) {
    %c0_i32 = arith.constant 0 : i32
    %c0_i32_0 = arith.constant 0 : i32
    return %arg0, %c0_i32 : i32, i32
  }
  func.func @transform_1(%arg0: i32) -> (i32, i32) {
    %c0_i32 = arith.constant 0 : i32
    %c0_i32_0 = arith.constant 0 : i32
    %c0_i32_1 = arith.constant 0 : i32
    return %c0_i32, %c0_i32_0 : i32, i32
  }
  func.func @transform_2(%arg0: i32) -> (i32, i32) {
    %c0_i32 = arith.constant 0 : i32
    %c0_i32_0 = arith.constant 0 : i32
    %c0_i32_1 = arith.constant 0 : i32
    return %c0_i32, %c0_i32_0 : i32, i32
  }
  func.func @transform_3(%arg0: i32) -> (i32, i32) {
    %c0_i32 = arith.constant 0 : i32
    %c0_i32_0 = arith.constant 0 : i32
    %c0_i32_1 = arith.constant 0 : i32
    return %c0_i32, %c0_i32_0 : i32, i32
  }
  func.func @transform_4(%arg0: i32) -> (i32, i32) {
    %c0_i32 = arith.constant 0 : i32
    %c0_i32_0 = arith.constant 0 : i32
    return %arg0, %c0_i32 : i32, i32
  }
}

module attributes {stable_mosaic.version = 11 : i64} {
  func.func @_ss2d_scan_kernel(%arg0: i32, %arg1: i32, %arg2: i32, %arg3: memref<1x1x64x64xf32, #tpu.memory_space<vmem>>, %arg4: memref<1x64x96xf32, #tpu.memory_space<vmem>>, %arg5: memref<1x1x64xf32, #tpu.memory_space<vmem>>, %arg6: memref<1x16x64xf32, #tpu.memory_space<vmem>>, %arg7: memref<1x1x64xf32, #tpu.memory_space<vmem>>, %arg8: memref<1x1x64x64xf32, #tpu.memory_space<vmem>>, %arg9: memref<64x96xf32, #tpu.memory_space<vmem>>, %arg10: memref<16x64xf32, #tpu.memory_space<vmem>>) attributes {dimension_semantics = [#tpu.dimension_semantics<parallel>, #tpu.dimension_semantics<parallel>, #tpu.dimension_semantics<arbitrary>], iteration_bounds = array<i64: 2, 4, 1>, scalar_prefetch = 0 : i64, scratch_operands = 2 : i64, tpu.core_type = #tpu.core_type<tc>, window_params = [{transform_indices = @transform_0, window_bounds = array<i64: 1, 1, 64, 64>}, {transform_indices = @transform_1, window_bounds = array<i64: 1, 64, 96>}, {transform_indices = @transform_2, window_bounds = array<i64: 1, 1, 64>}, {transform_indices = @transform_3, window_bounds = array<i64: 1, 16, 64>}, {transform_indices = @transform_4, window_bounds = array<i64: 1, 1, 64>}, {transform_indices = @transform_5, window_bounds = array<i64: 1, 1, 64, 64>}]} {
    %c0_i32 = arith.constant 0 : i32
    %0 = arith.cmpi eq, %arg2, %c0_i32 : i32
    %1 = arith.extui %0 : i1 to i32
    %c0_i32_0 = arith.constant 0 : i32
    %2 = arith.cmpi ne, %1, %c0_i32_0 : i32
    scf.if %2 {
      %cst_24 = arith.constant 0.000000e+00 : f32
      %19 = vector.broadcast %cst_24 : f32 to vector<16x64xf32>
      %c0_25 = arith.constant 0 : index
      %c0_26 = arith.constant 0 : index
      %20 = vector.load %arg10[%c0_25, %c0_26] : memref<16x64xf32, #tpu.memory_space<vmem>>, vector<16x64xf32>
      tpu.vector_store %arg10[%c0_25, %c0_26], %19 {strides = array<i32>} : memref<16x64xf32, #tpu.memory_space<vmem>>, vector<16x64xf32>,
    } else {
    }
    %c0 = arith.constant 0 : index
    %c0_1 = arith.constant 0 : index
    %c0_2 = arith.constant 0 : index
    %3 = vector.load %arg6[%c0, %c0_1, %c0_2] : memref<1x16x64xf32, #tpu.memory_space<vmem>>, vector<1x16x64xf32>
    %4 = vector.shape_cast %3 : vector<1x16x64xf32> to vector<16x64xf32>
    %c0_3 = arith.constant 0 : index
    %c0_4 = arith.constant 0 : index
    %c0_5 = arith.constant 0 : index
    %5 = vector.load %arg7[%c0_3, %c0_4, %c0_5] : memref<1x1x64xf32, #tpu.memory_space<vmem>>, vector<1x1x64xf32>
    %6 = vector.shape_cast %5 : vector<1x1x64xf32> to vector<1x64xf32>
    %c0_6 = arith.constant 0 : index
    %c0_7 = arith.constant 0 : index
    %c0_8 = arith.constant 0 : index
    %7 = vector.load %arg5[%c0_6, %c0_7, %c0_8] : memref<1x1x64xf32, #tpu.memory_space<vmem>>, vector<1x1x64xf32>
    %8 = vector.shape_cast %7 : vector<1x1x64xf32> to vector<1x64xf32>
    %c0_9 = arith.constant 0 : index
    %c0_10 = arith.constant 0 : index
    %c0_11 = arith.constant 0 : index
    %c0_12 = arith.constant 0 : index
    %9 = vector.load %arg3[%c0_9, %c0_10, %c0_11, %c0_12] : memref<1x1x64x64xf32, #tpu.memory_space<vmem>>, vector<1x1x64x64xf32>
    %10 = vector.shape_cast %9 : vector<1x1x64x64xf32> to vector<64x64xf32>
    %c0_13 = arith.constant 0 : index
    %c0_14 = arith.constant 0 : index
    %c0_15 = arith.constant 0 : index
    %11 = vector.load %arg4[%c0_13, %c0_14, %c0_15] : memref<1x64x96xf32, #tpu.memory_space<vmem>>, vector<1x64x96xf32>
    %12 = vector.shape_cast %11 : vector<1x64x96xf32> to vector<64x96xf32>
    %cst = arith.constant dense<0.000000e+00> : vector<64x96xf32>
    %13 = tpu.matmul %10, %12, %cst {dimension_numbers = #tpu.dot_dimension_numbers<[1], [0], [0], [1], [0, 0, 1, 1], [], []>} : vector<64x64xf32>, vector<64x96xf32>, vector<64x96xf32> -> vector<64x96xf32>
    %c0_16 = arith.constant 0 : index
    %c0_17 = arith.constant 0 : index
    %14 = vector.load %arg9[%c0_16, %c0_17] : memref<64x96xf32, #tpu.memory_space<vmem>>, vector<64x96xf32>
    tpu.vector_store %arg9[%c0_16, %c0_17], %13 {strides = array<i32>} : memref<64x96xf32, #tpu.memory_space<vmem>>, vector<64x96xf32>,
    %c0_18 = arith.constant 0 : index
    %c0_19 = arith.constant 0 : index
    %15 = vector.load %arg10[%c0_18, %c0_19] : memref<16x64xf32, #tpu.memory_space<vmem>>, vector<16x64xf32>
    %c0_i32_20 = arith.constant 0 : i32
    %c8_i32 = arith.constant 8 : i32
    %16 = arith.addi %c0_i32_20, %c8_i32 : i32
    %c1_i32 = arith.constant 1 : i32
    %17 = scf.for %arg11 = %c0_i32_20 to %16 step %c1_i32 iter_args(%arg12 = %15) -> (vector<16x64xf32>)  : i32 {
      %c8_i32_24 = arith.constant 8 : i32
      %19 = arith.muli %arg11, %c8_i32_24 : i32
      %20 = tpu.assume_multiple %19, 8 : i32
      %21 = arith.index_cast %20 : i32 to index
      %c0_25 = arith.constant 0 : index
      %22 = vector.load %arg9[%21, %c0_25] : memref<64x96xf32, #tpu.memory_space<vmem>>, vector<8x64xf32>
      %23 = vector.broadcast %8 : vector<1x64xf32> to vector<8x64xf32>
      %24 = arith.addf %22, %23 : vector<8x64xf32>
      %cst_26 = arith.constant 0.000000e+00 : f32
      %25 = vector.broadcast %cst_26 : f32 to vector<8x64xf32>
      %26 = arith.maximumf %24, %25 : vector<8x64xf32>
      %27 = math.absf %24 : vector<8x64xf32>
      %cst_27 = arith.constant 0.000000e+00 : f32
      %28 = vector.broadcast %cst_27 : f32 to vector<8x64xf32>
      %29 = arith.subf %28, %27 : vector<8x64xf32>
      %30 = math.exp %29 : vector<8x64xf32>
      %cst_28 = arith.constant 1.000000e+00 : f32
      %31 = vector.broadcast %cst_28 : f32 to vector<8x64xf32>
      %32 = arith.addf %31, %30 : vector<8x64xf32>
      %33 = math.log %32 : vector<8x64xf32>
      %34 = arith.addf %26, %33 : vector<8x64xf32>
      %c0_29 = arith.constant 0 : index
      %c0_30 = arith.constant 0 : index
      %35 = arith.index_cast %20 : i32 to index
      %c0_31 = arith.constant 0 : index
      %36 = vector.load %arg3[%c0_29, %c0_30, %35, %c0_31] : memref<1x1x64x64xf32, #tpu.memory_space<vmem>>, vector<1x1x8x64xf32>
      %37 = vector.shape_cast %36 : vector<1x1x8x64xf32> to vector<8x64xf32>
      %38 = arith.index_cast %20 : i32 to index
      %c64 = arith.constant 64 : index
      %39 = vector.load %arg9[%38, %c64] : memref<64x96xf32, #tpu.memory_space<vmem>>, vector<8x16xf32>
      %40 = arith.index_cast %20 : i32 to index
      %c80 = arith.constant 80 : index
      %41 = vector.load %arg9[%40, %c80] : memref<64x96xf32, #tpu.memory_space<vmem>>, vector<8x16xf32>
      %42 = tpu.transpose %39, [1, 0] : vector<8x16xf32> -> vector<16x8xf32>
      %43 = tpu.transpose %41, [1, 0] : vector<8x16xf32> -> vector<16x8xf32>
      %44 = arith.mulf %34, %37 : vector<8x64xf32>
      %45 = vector.extract_strided_slice %34 {offsets = [0, 0], sizes = [1, 64], strides = [1, 1]} : vector<8x64xf32> to vector<1x64xf32>
      %46 = vector.broadcast %45 : vector<1x64xf32> to vector<16x64xf32>
      %47 = arith.mulf %46, %4 : vector<16x64xf32>
      %48 = math.exp %47 : vector<16x64xf32>
      %49 = arith.mulf %48, %arg12 : vector<16x64xf32>
      %50 = vector.extract_strided_slice %44 {offsets = [0, 0], sizes = [1, 64], strides = [1, 1]} : vector<8x64xf32> to vector<1x64xf32>
      %51 = vector.extract_strided_slice %42 {offsets = [0, 0], sizes = [16, 1], strides = [1, 1]} : vector<16x8xf32> to vector<16x1xf32>
      %52 = vector.broadcast %50 : vector<1x64xf32> to vector<16x64xf32>
      %53 = vector.broadcast %51 : vector<16x1xf32> to vector<16x64xf32>
      %54 = arith.mulf %52, %53 : vector<16x64xf32>
      %55 = arith.addf %49, %54 : vector<16x64xf32>
      %56 = vector.extract_strided_slice %43 {offsets = [0, 0], sizes = [16, 1], strides = [1, 1]} : vector<16x8xf32> to vector<16x1xf32>
      %57 = vector.broadcast %56 : vector<16x1xf32> to vector<16x64xf32>
      %58 = arith.mulf %55, %57 : vector<16x64xf32>
      %cst_32 = arith.constant dense<0.000000e+00> : vector<64xf32>
      %59 = vector.multi_reduction <add>, %58, %cst_32 [0] : vector<16x64xf32> to vector<64xf32>
      %60 = vector.shape_cast %59 : vector<64xf32> to vector<1x64xf32>
      %61 = vector.extract_strided_slice %37 {offsets = [0, 0], sizes = [1, 64], strides = [1, 1]} : vector<8x64xf32> to vector<1x64xf32>
      %62 = arith.mulf %61, %6 : vector<1x64xf32>
      %63 = arith.addf %60, %62 : vector<1x64xf32>
      %c0_i32_33 = arith.constant 0 : i32
      %64 = arith.addi %20, %c0_i32_33 : i32
      %c0_34 = arith.constant 0 : index
      %c0_35 = arith.constant 0 : index
      %65 = arith.index_cast %64 : i32 to index
      %c0_36 = arith.constant 0 : index
      %66 = vector.load %arg8[%c0_34, %c0_35, %65, %c0_36] : memref<1x1x64x64xf32, #tpu.memory_space<vmem>>, vector<1x1x1x64xf32>
      %67 = vector.shape_cast %66 : vector<1x1x1x64xf32> to vector<1x64xf32>
      %68 = vector.shape_cast %63 : vector<1x64xf32> to vector<1x1x1x64xf32>
      tpu.vector_store %arg8[%c0_34, %c0_35, %65, %c0_36], %68 {strides = array<i32>} : memref<1x1x64x64xf32, #tpu.memory_space<vmem>>, vector<1x1x1x64xf32>,
      %69 = vector.extract_strided_slice %34 {offsets = [1, 0], sizes = [1, 64], strides = [1, 1]} : vector<8x64xf32> to vector<1x64xf32>
      %70 = vector.broadcast %69 : vector<1x64xf32> to vector<16x64xf32>
      %71 = arith.mulf %70, %4 : vector<16x64xf32>
      %72 = math.exp %71 : vector<16x64xf32>
      %73 = arith.mulf %72, %55 : vector<16x64xf32>
      %74 = vector.extract_strided_slice %44 {offsets = [1, 0], sizes = [1, 64], strides = [1, 1]} : vector<8x64xf32> to vector<1x64xf32>
      %75 = vector.extract_strided_slice %42 {offsets = [0, 1], sizes = [16, 1], strides = [1, 1]} : vector<16x8xf32> to vector<16x1xf32>
      %76 = vector.broadcast %74 : vector<1x64xf32> to vector<16x64xf32>
      %77 = vector.broadcast %75 : vector<16x1xf32> to vector<16x64xf32>
      %78 = arith.mulf %76, %77 : vector<16x64xf32>
      %79 = arith.addf %73, %78 : vector<16x64xf32>
      %80 = vector.extract_strided_slice %43 {offsets = [0, 1], sizes = [16, 1], strides = [1, 1]} : vector<16x8xf32> to vector<16x1xf32>
      %81 = vector.broadcast %80 : vector<16x1xf32> to vector<16x64xf32>
      %82 = arith.mulf %79, %81 : vector<16x64xf32>
      %cst_37 = arith.constant dense<0.000000e+00> : vector<64xf32>
      %83 = vector.multi_reduction <add>, %82, %cst_37 [0] : vector<16x64xf32> to vector<64xf32>
      %84 = vector.shape_cast %83 : vector<64xf32> to vector<1x64xf32>
      %85 = vector.extract_strided_slice %37 {offsets = [1, 0], sizes = [1, 64], strides = [1, 1]} : vector<8x64xf32> to vector<1x64xf32>
      %86 = arith.mulf %85, %6 : vector<1x64xf32>
      %87 = arith.addf %84, %86 : vector<1x64xf32>
      %c1_i32_38 = arith.constant 1 : i32
      %88 = arith.addi %20, %c1_i32_38 : i32
      %c0_39 = arith.constant 0 : index
      %c0_40 = arith.constant 0 : index
      %89 = arith.index_cast %88 : i32 to index
      %c0_41 = arith.constant 0 : index
      %90 = vector.load %arg8[%c0_39, %c0_40, %89, %c0_41] : memref<1x1x64x64xf32, #tpu.memory_space<vmem>>, vector<1x1x1x64xf32>
      %91 = vector.shape_cast %90 : vector<1x1x1x64xf32> to vector<1x64xf32>
      %92 = vector.shape_cast %87 : vector<1x64xf32> to vector<1x1x1x64xf32>
      tpu.vector_store %arg8[%c0_39, %c0_40, %89, %c0_41], %92 {strides = array<i32>} : memref<1x1x64x64xf32, #tpu.memory_space<vmem>>, vector<1x1x1x64xf32>,
      %93 = vector.extract_strided_slice %34 {offsets = [2, 0], sizes = [1, 64], strides = [1, 1]} : vector<8x64xf32> to vector<1x64xf32>
      %94 = vector.broadcast %93 : vector<1x64xf32> to vector<16x64xf32>
      %95 = arith.mulf %94, %4 : vector<16x64xf32>
      %96 = math.exp %95 : vector<16x64xf32>
      %97 = arith.mulf %96, %79 : vector<16x64xf32>
      %98 = vector.extract_strided_slice %44 {offsets = [2, 0], sizes = [1, 64], strides = [1, 1]} : vector<8x64xf32> to vector<1x64xf32>
      %99 = vector.extract_strided_slice %42 {offsets = [0, 2], sizes = [16, 1], strides = [1, 1]} : vector<16x8xf32> to vector<16x1xf32>
      %100 = vector.broadcast %98 : vector<1x64xf32> to vector<16x64xf32>
      %101 = vector.broadcast %99 : vector<16x1xf32> to vector<16x64xf32>
      %102 = arith.mulf %100, %101 : vector<16x64xf32>
      %103 = arith.addf %97, %102 : vector<16x64xf32>
      %104 = vector.extract_strided_slice %43 {offsets = [0, 2], sizes = [16, 1], strides = [1, 1]} : vector<16x8xf32> to vector<16x1xf32>
      %105 = vector.broadcast %104 : vector<16x1xf32> to vector<16x64xf32>
      %106 = arith.mulf %103, %105 : vector<16x64xf32>
      %cst_42 = arith.constant dense<0.000000e+00> : vector<64xf32>
      %107 = vector.multi_reduction <add>, %106, %cst_42 [0] : vector<16x64xf32> to vector<64xf32>
      %108 = vector.shape_cast %107 : vector<64xf32> to vector<1x64xf32>
      %109 = vector.extract_strided_slice %37 {offsets = [2, 0], sizes = [1, 64], strides = [1, 1]} : vector<8x64xf32> to vector<1x64xf32>
      %110 = arith.mulf %109, %6 : vector<1x64xf32>
      %111 = arith.addf %108, %110 : vector<1x64xf32>
      %c2_i32 = arith.constant 2 : i32
      %112 = arith.addi %20, %c2_i32 : i32
      %c0_43 = arith.constant 0 : index
      %c0_44 = arith.constant 0 : index
      %113 = arith.index_cast %112 : i32 to index
      %c0_45 = arith.constant 0 : index
      %114 = vector.load %arg8[%c0_43, %c0_44, %113, %c0_45] : memref<1x1x64x64xf32, #tpu.memory_space<vmem>>, vector<1x1x1x64xf32>
      %115 = vector.shape_cast %114 : vector<1x1x1x64xf32> to vector<1x64xf32>
      %116 = vector.shape_cast %111 : vector<1x64xf32> to vector<1x1x1x64xf32>
      tpu.vector_store %arg8[%c0_43, %c0_44, %113, %c0_45], %116 {strides = array<i32>} : memref<1x1x64x64xf32, #tpu.memory_space<vmem>>, vector<1x1x1x64xf32>,
      %117 = vector.extract_strided_slice %34 {offsets = [3, 0], sizes = [1, 64], strides = [1, 1]} : vector<8x64xf32> to vector<1x64xf32>
      %118 = vector.broadcast %117 : vector<1x64xf32> to vector<16x64xf32>
      %119 = arith.mulf %118, %4 : vector<16x64xf32>
      %120 = math.exp %119 : vector<16x64xf32>
      %121 = arith.mulf %120, %103 : vector<16x64xf32>
      %122 = vector.extract_strided_slice %44 {offsets = [3, 0], sizes = [1, 64], strides = [1, 1]} : vector<8x64xf32> to vector<1x64xf32>
      %123 = vector.extract_strided_slice %42 {offsets = [0, 3], sizes = [16, 1], strides = [1, 1]} : vector<16x8xf32> to vector<16x1xf32>
      %124 = vector.broadcast %122 : vector<1x64xf32> to vector<16x64xf32>
      %125 = vector.broadcast %123 : vector<16x1xf32> to vector<16x64xf32>
      %126 = arith.mulf %124, %125 : vector<16x64xf32>
      %127 = arith.addf %121, %126 : vector<16x64xf32>
      %128 = vector.extract_strided_slice %43 {offsets = [0, 3], sizes = [16, 1], strides = [1, 1]} : vector<16x8xf32> to vector<16x1xf32>
      %129 = vector.broadcast %128 : vector<16x1xf32> to vector<16x64xf32>
      %130 = arith.mulf %127, %129 : vector<16x64xf32>
      %cst_46 = arith.constant dense<0.000000e+00> : vector<64xf32>
      %131 = vector.multi_reduction <add>, %130, %cst_46 [0] : vector<16x64xf32> to vector<64xf32>
      %132 = vector.shape_cast %131 : vector<64xf32> to vector<1x64xf32>
      %133 = vector.extract_strided_slice %37 {offsets = [3, 0], sizes = [1, 64], strides = [1, 1]} : vector<8x64xf32> to vector<1x64xf32>
      %134 = arith.mulf %133, %6 : vector<1x64xf32>
      %135 = arith.addf %132, %134 : vector<1x64xf32>
      %c3_i32 = arith.constant 3 : i32
      %136 = arith.addi %20, %c3_i32 : i32
      %c0_47 = arith.constant 0 : index
      %c0_48 = arith.constant 0 : index
      %137 = arith.index_cast %136 : i32 to index
      %c0_49 = arith.constant 0 : index
      %138 = vector.load %arg8[%c0_47, %c0_48, %137, %c0_49] : memref<1x1x64x64xf32, #tpu.memory_space<vmem>>, vector<1x1x1x64xf32>
      %139 = vector.shape_cast %138 : vector<1x1x1x64xf32> to vector<1x64xf32>
      %140 = vector.shape_cast %135 : vector<1x64xf32> to vector<1x1x1x64xf32>
      tpu.vector_store %arg8[%c0_47, %c0_48, %137, %c0_49], %140 {strides = array<i32>} : memref<1x1x64x64xf32, #tpu.memory_space<vmem>>, vector<1x1x1x64xf32>,
      %141 = vector.extract_strided_slice %34 {offsets = [4, 0], sizes = [1, 64], strides = [1, 1]} : vector<8x64xf32> to vector<1x64xf32>
      %142 = vector.broadcast %141 : vector<1x64xf32> to vector<16x64xf32>
      %143 = arith.mulf %142, %4 : vector<16x64xf32>
      %144 = math.exp %143 : vector<16x64xf32>
      %145 = arith.mulf %144, %127 : vector<16x64xf32>
      %146 = vector.extract_strided_slice %44 {offsets = [4, 0], sizes = [1, 64], strides = [1, 1]} : vector<8x64xf32> to vector<1x64xf32>
      %147 = vector.extract_strided_slice %42 {offsets = [0, 4], sizes = [16, 1], strides = [1, 1]} : vector<16x8xf32> to vector<16x1xf32>
      %148 = vector.broadcast %146 : vector<1x64xf32> to vector<16x64xf32>
      %149 = vector.broadcast %147 : vector<16x1xf32> to vector<16x64xf32>
      %150 = arith.mulf %148, %149 : vector<16x64xf32>
      %151 = arith.addf %145, %150 : vector<16x64xf32>
      %152 = vector.extract_strided_slice %43 {offsets = [0, 4], sizes = [16, 1], strides = [1, 1]} : vector<16x8xf32> to vector<16x1xf32>
      %153 = vector.broadcast %152 : vector<16x1xf32> to vector<16x64xf32>
      %154 = arith.mulf %151, %153 : vector<16x64xf32>
      %cst_50 = arith.constant dense<0.000000e+00> : vector<64xf32>
      %155 = vector.multi_reduction <add>, %154, %cst_50 [0] : vector<16x64xf32> to vector<64xf32>
      %156 = vector.shape_cast %155 : vector<64xf32> to vector<1x64xf32>
      %157 = vector.extract_strided_slice %37 {offsets = [4, 0], sizes = [1, 64], strides = [1, 1]} : vector<8x64xf32> to vector<1x64xf32>
      %158 = arith.mulf %157, %6 : vector<1x64xf32>
      %159 = arith.addf %156, %158 : vector<1x64xf32>
      %c4_i32 = arith.constant 4 : i32
      %160 = arith.addi %20, %c4_i32 : i32
      %c0_51 = arith.constant 0 : index
      %c0_52 = arith.constant 0 : index
      %161 = arith.index_cast %160 : i32 to index
      %c0_53 = arith.constant 0 : index
      %162 = vector.load %arg8[%c0_51, %c0_52, %161, %c0_53] : memref<1x1x64x64xf32, #tpu.memory_space<vmem>>, vector<1x1x1x64xf32>
      %163 = vector.shape_cast %162 : vector<1x1x1x64xf32> to vector<1x64xf32>
      %164 = vector.shape_cast %159 : vector<1x64xf32> to vector<1x1x1x64xf32>
      tpu.vector_store %arg8[%c0_51, %c0_52, %161, %c0_53], %164 {strides = array<i32>} : memref<1x1x64x64xf32, #tpu.memory_space<vmem>>, vector<1x1x1x64xf32>,
      %165 = vector.extract_strided_slice %34 {offsets = [5, 0], sizes = [1, 64], strides = [1, 1]} : vector<8x64xf32> to vector<1x64xf32>
      %166 = vector.broadcast %165 : vector<1x64xf32> to vector<16x64xf32>
      %167 = arith.mulf %166, %4 : vector<16x64xf32>
      %168 = math.exp %167 : vector<16x64xf32>
      %169 = arith.mulf %168, %151 : vector<16x64xf32>
      %170 = vector.extract_strided_slice %44 {offsets = [5, 0], sizes = [1, 64], strides = [1, 1]} : vector<8x64xf32> to vector<1x64xf32>
      %171 = vector.extract_strided_slice %42 {offsets = [0, 5], sizes = [16, 1], strides = [1, 1]} : vector<16x8xf32> to vector<16x1xf32>
      %172 = vector.broadcast %170 : vector<1x64xf32> to vector<16x64xf32>
      %173 = vector.broadcast %171 : vector<16x1xf32> to vector<16x64xf32>
      %174 = arith.mulf %172, %173 : vector<16x64xf32>
      %175 = arith.addf %169, %174 : vector<16x64xf32>
      %176 = vector.extract_strided_slice %43 {offsets = [0, 5], sizes = [16, 1], strides = [1, 1]} : vector<16x8xf32> to vector<16x1xf32>
      %177 = vector.broadcast %176 : vector<16x1xf32> to vector<16x64xf32>
      %178 = arith.mulf %175, %177 : vector<16x64xf32>
      %cst_54 = arith.constant dense<0.000000e+00> : vector<64xf32>
      %179 = vector.multi_reduction <add>, %178, %cst_54 [0] : vector<16x64xf32> to vector<64xf32>
      %180 = vector.shape_cast %179 : vector<64xf32> to vector<1x64xf32>
      %181 = vector.extract_strided_slice %37 {offsets = [5, 0], sizes = [1, 64], strides = [1, 1]} : vector<8x64xf32> to vector<1x64xf32>
      %182 = arith.mulf %181, %6 : vector<1x64xf32>
      %183 = arith.addf %180, %182 : vector<1x64xf32>
      %c5_i32 = arith.constant 5 : i32
      %184 = arith.addi %20, %c5_i32 : i32
      %c0_55 = arith.constant 0 : index
      %c0_56 = arith.constant 0 : index
      %185 = arith.index_cast %184 : i32 to index
      %c0_57 = arith.constant 0 : index
      %186 = vector.load %arg8[%c0_55, %c0_56, %185, %c0_57] : memref<1x1x64x64xf32, #tpu.memory_space<vmem>>, vector<1x1x1x64xf32>
      %187 = vector.shape_cast %186 : vector<1x1x1x64xf32> to vector<1x64xf32>
      %188 = vector.shape_cast %183 : vector<1x64xf32> to vector<1x1x1x64xf32>
      tpu.vector_store %arg8[%c0_55, %c0_56, %185, %c0_57], %188 {strides = array<i32>} : memref<1x1x64x64xf32, #tpu.memory_space<vmem>>, vector<1x1x1x64xf32>,
      %189 = vector.extract_strided_slice %34 {offsets = [6, 0], sizes = [1, 64], strides = [1, 1]} : vector<8x64xf32> to vector<1x64xf32>
      %190 = vector.broadcast %189 : vector<1x64xf32> to vector<16x64xf32>
      %191 = arith.mulf %190, %4 : vector<16x64xf32>
      %192 = math.exp %191 : vector<16x64xf32>
      %193 = arith.mulf %192, %175 : vector<16x64xf32>
      %194 = vector.extract_strided_slice %44 {offsets = [6, 0], sizes = [1, 64], strides = [1, 1]} : vector<8x64xf32> to vector<1x64xf32>
      %195 = vector.extract_strided_slice %42 {offsets = [0, 6], sizes = [16, 1], strides = [1, 1]} : vector<16x8xf32> to vector<16x1xf32>
      %196 = vector.broadcast %194 : vector<1x64xf32> to vector<16x64xf32>
      %197 = vector.broadcast %195 : vector<16x1xf32> to vector<16x64xf32>
      %198 = arith.mulf %196, %197 : vector<16x64xf32>
      %199 = arith.addf %193, %198 : vector<16x64xf32>
      %200 = vector.extract_strided_slice %43 {offsets = [0, 6], sizes = [16, 1], strides = [1, 1]} : vector<16x8xf32> to vector<16x1xf32>
      %201 = vector.broadcast %200 : vector<16x1xf32> to vector<16x64xf32>
      %202 = arith.mulf %199, %201 : vector<16x64xf32>
      %cst_58 = arith.constant dense<0.000000e+00> : vector<64xf32>
      %203 = vector.multi_reduction <add>, %202, %cst_58 [0] : vector<16x64xf32> to vector<64xf32>
      %204 = vector.shape_cast %203 : vector<64xf32> to vector<1x64xf32>
      %205 = vector.extract_strided_slice %37 {offsets = [6, 0], sizes = [1, 64], strides = [1, 1]} : vector<8x64xf32> to vector<1x64xf32>
      %206 = arith.mulf %205, %6 : vector<1x64xf32>
      %207 = arith.addf %204, %206 : vector<1x64xf32>
      %c6_i32 = arith.constant 6 : i32
      %208 = arith.addi %20, %c6_i32 : i32
      %c0_59 = arith.constant 0 : index
      %c0_60 = arith.constant 0 : index
      %209 = arith.index_cast %208 : i32 to index
      %c0_61 = arith.constant 0 : index
      %210 = vector.load %arg8[%c0_59, %c0_60, %209, %c0_61] : memref<1x1x64x64xf32, #tpu.memory_space<vmem>>, vector<1x1x1x64xf32>
      %211 = vector.shape_cast %210 : vector<1x1x1x64xf32> to vector<1x64xf32>
      %212 = vector.shape_cast %207 : vector<1x64xf32> to vector<1x1x1x64xf32>
      tpu.vector_store %arg8[%c0_59, %c0_60, %209, %c0_61], %212 {strides = array<i32>} : memref<1x1x64x64xf32, #tpu.memory_space<vmem>>, vector<1x1x1x64xf32>,
      %213 = vector.extract_strided_slice %34 {offsets = [7, 0], sizes = [1, 64], strides = [1, 1]} : vector<8x64xf32> to vector<1x64xf32>
      %214 = vector.broadcast %213 : vector<1x64xf32> to vector<16x64xf32>
      %215 = arith.mulf %214, %4 : vector<16x64xf32>
      %216 = math.exp %215 : vector<16x64xf32>
      %217 = arith.mulf %216, %199 : vector<16x64xf32>
      %218 = vector.extract_strided_slice %44 {offsets = [7, 0], sizes = [1, 64], strides = [1, 1]} : vector<8x64xf32> to vector<1x64xf32>
      %219 = vector.extract_strided_slice %42 {offsets = [0, 7], sizes = [16, 1], strides = [1, 1]} : vector<16x8xf32> to vector<16x1xf32>
      %220 = vector.broadcast %218 : vector<1x64xf32> to vector<16x64xf32>
      %221 = vector.broadcast %219 : vector<16x1xf32> to vector<16x64xf32>
      %222 = arith.mulf %220, %221 : vector<16x64xf32>
      %223 = arith.addf %217, %222 : vector<16x64xf32>
      %224 = vector.extract_strided_slice %43 {offsets = [0, 7], sizes = [16, 1], strides = [1, 1]} : vector<16x8xf32> to vector<16x1xf32>
      %225 = vector.broadcast %224 : vector<16x1xf32> to vector<16x64xf32>
      %226 = arith.mulf %223, %225 : vector<16x64xf32>
      %cst_62 = arith.constant dense<0.000000e+00> : vector<64xf32>
      %227 = vector.multi_reduction <add>, %226, %cst_62 [0] : vector<16x64xf32> to vector<64xf32>
      %228 = vector.shape_cast %227 : vector<64xf32> to vector<1x64xf32>
      %229 = vector.extract_strided_slice %37 {offsets = [7, 0], sizes = [1, 64], strides = [1, 1]} : vector<8x64xf32> to vector<1x64xf32>
      %230 = arith.mulf %229, %6 : vector<1x64xf32>
      %231 = arith.addf %228, %230 : vector<1x64xf32>
      %c7_i32 = arith.constant 7 : i32
      %232 = arith.addi %20, %c7_i32 : i32
      %c0_63 = arith.constant 0 : index
      %c0_64 = arith.constant 0 : index
      %233 = arith.index_cast %232 : i32 to index
      %c0_65 = arith.constant 0 : index
      %234 = vector.load %arg8[%c0_63, %c0_64, %233, %c0_65] : memref<1x1x64x64xf32, #tpu.memory_space<vmem>>, vector<1x1x1x64xf32>
      %235 = vector.shape_cast %234 : vector<1x1x1x64xf32> to vector<1x64xf32>
      %236 = vector.shape_cast %231 : vector<1x64xf32> to vector<1x1x1x64xf32>
      tpu.vector_store %arg8[%c0_63, %c0_64, %233, %c0_65], %236 {strides = array<i32>} : memref<1x1x64x64xf32, #tpu.memory_space<vmem>>, vector<1x1x1x64xf32>,
      scf.yield %223 : vector<16x64xf32>
    }
    %c8_i32_21 = arith.constant 8 : i32
    %c0_22 = arith.constant 0 : index
    %c0_23 = arith.constant 0 : index
    %18 = vector.load %arg10[%c0_22, %c0_23] : memref<16x64xf32, #tpu.memory_space<vmem>>, vector<16x64xf32>
    tpu.vector_store %arg10[%c0_22, %c0_23], %17 {strides = array<i32>} : memref<16x64xf32, #tpu.memory_space<vmem>>, vector<16x64xf32>,
    return
  }
  func.func @transform_0(%arg0: i32, %arg1: i32, %arg2: i32) -> (i32, i32, i32, i32) {
    %c0_i32 = arith.constant 0 : i32
    %c0_i32_0 = arith.constant 0 : i32
    return %arg0, %arg1, %arg2, %c0_i32 : i32, i32, i32, i32
  }
  func.func @transform_1(%arg0: i32, %arg1: i32, %arg2: i32) -> (i32, i32, i32) {
    %c0_i32 = arith.constant 0 : i32
    %c0_i32_0 = arith.constant 0 : i32
    %c0_i32_1 = arith.constant 0 : i32
    return %arg1, %c0_i32, %c0_i32_0 : i32, i32, i32
  }
  func.func @transform_2(%arg0: i32, %arg1: i32, %arg2: i32) -> (i32, i32, i32) {
    %c0_i32 = arith.constant 0 : i32
    %c0_i32_0 = arith.constant 0 : i32
    %c0_i32_1 = arith.constant 0 : i32
    return %arg1, %c0_i32, %c0_i32_0 : i32, i32, i32
  }
  func.func @transform_3(%arg0: i32, %arg1: i32, %arg2: i32) -> (i32, i32, i32) {
    %c0_i32 = arith.constant 0 : i32
    %c0_i32_0 = arith.constant 0 : i32
    %c0_i32_1 = arith.constant 0 : i32
    return %arg1, %c0_i32, %c0_i32_0 : i32, i32, i32
  }
  func.func @transform_4(%arg0: i32, %arg1: i32, %arg2: i32) -> (i32, i32, i32) {
    %c0_i32 = arith.constant 0 : i32
    %c0_i32_0 = arith.constant 0 : i32
    %c0_i32_1 = arith.constant 0 : i32
    return %arg1, %c0_i32, %c0_i32_0 : i32, i32, i32
  }
  func.func @transform_5(%arg0: i32, %arg1: i32, %arg2: i32) -> (i32, i32, i32, i32) {
    %c0_i32 = arith.constant 0 : i32
    %c0_i32_0 = arith.constant 0 : i32
    return %arg0, %arg1, %arg2, %c0_i32 : i32, i32, i32, i32
  }
}

module attributes {stable_mosaic.version = 11 : i64} {
  func.func @_out_fuse_kernel(%arg0: i32, %arg1: memref<128x64xf32, #tpu.memory_space<vmem>>, %arg2: memref<128x64xf32, #tpu.memory_space<vmem>>, %arg3: memref<128x32xf32, #tpu.memory_space<vmem>>, %arg4: memref<1x64xf32, #tpu.memory_space<vmem>>, %arg5: memref<1x64xf32, #tpu.memory_space<vmem>>, %arg6: memref<64x32xf32, #tpu.memory_space<vmem>>, %arg7: memref<128x32xf32, #tpu.memory_space<vmem>>) attributes {dimension_semantics = [#tpu.dimension_semantics<parallel>], iteration_bounds = array<i64: 1>, scalar_prefetch = 0 : i64, scratch_operands = 0 : i64, tpu.core_type = #tpu.core_type<tc>, window_params = [{transform_indices = @transform_0, window_bounds = array<i64: 128, 64>}, {transform_indices = @transform_1, window_bounds = array<i64: 128, 64>}, {transform_indices = @transform_2, window_bounds = array<i64: 128, 32>}, {pipeline_mode = #tpu.pipeline_mode<synchronous>, transform_indices = @transform_3, window_bounds = array<i64: 1, 64>}, {pipeline_mode = #tpu.pipeline_mode<synchronous>, transform_indices = @transform_4, window_bounds = array<i64: 1, 64>}, {pipeline_mode = #tpu.pipeline_mode<synchronous>, transform_indices = @transform_5, window_bounds = array<i64: 64, 32>}, {transform_indices = @transform_6, window_bounds = array<i64: 128, 32>}]} {
    %c0 = arith.constant 0 : index
    %c0_0 = arith.constant 0 : index
    %0 = vector.load %arg1[%c0, %c0_0] : memref<128x64xf32, #tpu.memory_space<vmem>>, vector<128x64xf32>
    %cst = arith.constant dense<0.000000e+00> : vector<128xf32>
    %1 = vector.multi_reduction <add>, %0, %cst [1] : vector<128x64xf32> to vector<128xf32>
    %2 = vector.shape_cast %1 : vector<128xf32> to vector<128x1xf32>
    %cst_1 = arith.constant 6.400000e+01 : f32
    %3 = vector.broadcast %cst_1 : f32 to vector<128x1xf32>
    %4 = arith.divf %2, %3 : vector<128x1xf32>
    %5 = vector.broadcast %4 : vector<128x1xf32> to vector<128x64xf32>
    %6 = arith.subf %0, %5 : vector<128x64xf32>
    %7 = arith.mulf %6, %6 : vector<128x64xf32>
    %cst_2 = arith.constant dense<0.000000e+00> : vector<128xf32>
    %8 = vector.multi_reduction <add>, %7, %cst_2 [1] : vector<128x64xf32> to vector<128xf32>
    %9 = vector.shape_cast %8 : vector<128xf32> to vector<128x1xf32>
    %cst_3 = arith.constant 6.400000e+01 : f32
    %10 = vector.broadcast %cst_3 : f32 to vector<128x1xf32>
    %11 = arith.divf %9, %10 : vector<128x1xf32>
    %12 = vector.broadcast %4 : vector<128x1xf32> to vector<128x64xf32>
    %13 = arith.subf %0, %12 : vector<128x64xf32>
    %cst_4 = arith.constant 9.99999974E-6 : f32
    %14 = vector.broadcast %cst_4 : f32 to vector<128x1xf32>
    %15 = arith.addf %11, %14 : vector<128x1xf32>
    %16 = math.rsqrt %15 : vector<128x1xf32>
    %17 = vector.broadcast %16 : vector<128x1xf32> to vector<128x64xf32>
    %18 = arith.mulf %13, %17 : vector<128x64xf32>
    %c0_5 = arith.constant 0 : index
    %c0_6 = arith.constant 0 : index
    %19 = vector.load %arg4[%c0_5, %c0_6] : memref<1x64xf32, #tpu.memory_space<vmem>>, vector<1x64xf32>
    %20 = vector.broadcast %19 : vector<1x64xf32> to vector<128x64xf32>
    %21 = arith.mulf %18, %20 : vector<128x64xf32>
    %c0_7 = arith.constant 0 : index
    %c0_8 = arith.constant 0 : index
    %22 = vector.load %arg5[%c0_7, %c0_8] : memref<1x64xf32, #tpu.memory_space<vmem>>, vector<1x64xf32>
    %23 = vector.broadcast %22 : vector<1x64xf32> to vector<128x64xf32>
    %24 = arith.addf %21, %23 : vector<128x64xf32>
    %c0_9 = arith.constant 0 : index
    %c0_10 = arith.constant 0 : index
    %25 = vector.load %arg2[%c0_9, %c0_10] : memref<128x64xf32, #tpu.memory_space<vmem>>, vector<128x64xf32>
    %26 = arith.negf %25 : vector<128x64xf32>
    %27 = math.exp %26 : vector<128x64xf32>
    %cst_11 = arith.constant 1.000000e+00 : f32
    %28 = vector.broadcast %cst_11 : f32 to vector<128x64xf32>
    %29 = arith.addf %28, %27 : vector<128x64xf32>
    %30 = arith.divf %28, %29 : vector<128x64xf32>
    %31 = arith.mulf %25, %30 : vector<128x64xf32>
    %32 = arith.mulf %24, %31 : vector<128x64xf32>
    %c0_12 = arith.constant 0 : index
    %c0_13 = arith.constant 0 : index
    %33 = vector.load %arg3[%c0_12, %c0_13] : memref<128x32xf32, #tpu.memory_space<vmem>>, vector<128x32xf32>
    %c0_14 = arith.constant 0 : index
    %c0_15 = arith.constant 0 : index
    %34 = vector.load %arg6[%c0_14, %c0_15] : memref<64x32xf32, #tpu.memory_space<vmem>>, vector<64x32xf32>
    %cst_16 = arith.constant dense<0.000000e+00> : vector<128x32xf32>
    %35 = tpu.matmul %32, %34, %cst_16 {dimension_numbers = #tpu.dot_dimension_numbers<[1], [0], [0], [1], [0, 0, 1, 1], [], []>} : vector<128x64xf32>, vector<64x32xf32>, vector<128x32xf32> -> vector<128x32xf32>
    %36 = arith.addf %33, %35 : vector<128x32xf32>
    %c0_17 = arith.constant 0 : index
    %c0_18 = arith.constant 0 : index
    %37 = vector.load %arg7[%c0_17, %c0_18] : memref<128x32xf32, #tpu.memory_space<vmem>>, vector<128x32xf32>
    tpu.vector_store %arg7[%c0_17, %c0_18], %36 {strides = array<i32>} : memref<128x32xf32, #tpu.memory_space<vmem>>, vector<128x32xf32>,
    return
  }
  func.func @transform_0(%arg0: i32) -> (i32, i32) {
    %c0_i32 = arith.constant 0 : i32
    %c0_i32_0 = arith.constant 0 : i32
    return %arg0, %c0_i32 : i32, i32
  }
  func.func @transform_1(%arg0: i32) -> (i32, i32) {
    %c0_i32 = arith.constant 0 : i32
    %c0_i32_0 = arith.constant 0 : i32
    return %arg0, %c0_i32 : i32, i32
  }
  func.func @transform_2(%arg0: i32) -> (i32, i32) {
    %c0_i32 = arith.constant 0 : i32
    %c0_i32_0 = arith.constant 0 : i32
    return %arg0, %c0_i32 : i32, i32
  }
  func.func @transform_3(%arg0: i32) -> (i32, i32) {
    %c0_i32 = arith.constant 0 : i32
    %c0_i32_0 = arith.constant 0 : i32
    %c0_i32_1 = arith.constant 0 : i32
    return %c0_i32, %c0_i32_0 : i32, i32
  }
  func.func @transform_4(%arg0: i32) -> (i32, i32) {
    %c0_i32 = arith.constant 0 : i32
    %c0_i32_0 = arith.constant 0 : i32
    %c0_i32_1 = arith.constant 0 : i32
    return %c0_i32, %c0_i32_0 : i32, i32
  }
  func.func @transform_5(%arg0: i32) -> (i32, i32) {
    %c0_i32 = arith.constant 0 : i32
    %c0_i32_0 = arith.constant 0 : i32
    %c0_i32_1 = arith.constant 0 : i32
    return %c0_i32, %c0_i32_0 : i32, i32
  }
  func.func @transform_6(%arg0: i32) -> (i32, i32) {
    %c0_i32 = arith.constant 0 : i32
    %c0_i32_0 = arith.constant 0 : i32
    return %arg0, %c0_i32 : i32, i32
  }
}

module attributes {stable_mosaic.version = 11 : i64} {
  func.func @_ln_matmul_kernel(%arg0: i32, %arg1: memref<128x32xf32, #tpu.memory_space<vmem>>, %arg2: memref<1x32xf32, #tpu.memory_space<vmem>>, %arg3: memref<1x32xf32, #tpu.memory_space<vmem>>, %arg4: memref<32x128xf32, #tpu.memory_space<vmem>>, %arg5: memref<128x128xf32, #tpu.memory_space<vmem>>) attributes {dimension_semantics = [#tpu.dimension_semantics<parallel>], iteration_bounds = array<i64: 1>, scalar_prefetch = 0 : i64, scratch_operands = 0 : i64, tpu.core_type = #tpu.core_type<tc>, window_params = [{transform_indices = @transform_0, window_bounds = array<i64: 128, 32>}, {pipeline_mode = #tpu.pipeline_mode<synchronous>, transform_indices = @transform_1, window_bounds = array<i64: 1, 32>}, {pipeline_mode = #tpu.pipeline_mode<synchronous>, transform_indices = @transform_2, window_bounds = array<i64: 1, 32>}, {pipeline_mode = #tpu.pipeline_mode<synchronous>, transform_indices = @transform_3, window_bounds = array<i64: 32, 128>}, {transform_indices = @transform_4, window_bounds = array<i64: 128, 128>}]} {
    %c0 = arith.constant 0 : index
    %c0_0 = arith.constant 0 : index
    %0 = vector.load %arg1[%c0, %c0_0] : memref<128x32xf32, #tpu.memory_space<vmem>>, vector<128x32xf32>
    %cst = arith.constant dense<0.000000e+00> : vector<128xf32>
    %1 = vector.multi_reduction <add>, %0, %cst [1] : vector<128x32xf32> to vector<128xf32>
    %2 = vector.shape_cast %1 : vector<128xf32> to vector<128x1xf32>
    %cst_1 = arith.constant 3.200000e+01 : f32
    %3 = vector.broadcast %cst_1 : f32 to vector<128x1xf32>
    %4 = arith.divf %2, %3 : vector<128x1xf32>
    %5 = vector.broadcast %4 : vector<128x1xf32> to vector<128x32xf32>
    %6 = arith.subf %0, %5 : vector<128x32xf32>
    %7 = arith.mulf %6, %6 : vector<128x32xf32>
    %cst_2 = arith.constant dense<0.000000e+00> : vector<128xf32>
    %8 = vector.multi_reduction <add>, %7, %cst_2 [1] : vector<128x32xf32> to vector<128xf32>
    %9 = vector.shape_cast %8 : vector<128xf32> to vector<128x1xf32>
    %cst_3 = arith.constant 3.200000e+01 : f32
    %10 = vector.broadcast %cst_3 : f32 to vector<128x1xf32>
    %11 = arith.divf %9, %10 : vector<128x1xf32>
    %12 = vector.broadcast %4 : vector<128x1xf32> to vector<128x32xf32>
    %13 = arith.subf %0, %12 : vector<128x32xf32>
    %cst_4 = arith.constant 9.99999974E-6 : f32
    %14 = vector.broadcast %cst_4 : f32 to vector<128x1xf32>
    %15 = arith.addf %11, %14 : vector<128x1xf32>
    %16 = math.rsqrt %15 : vector<128x1xf32>
    %17 = vector.broadcast %16 : vector<128x1xf32> to vector<128x32xf32>
    %18 = arith.mulf %13, %17 : vector<128x32xf32>
    %c0_5 = arith.constant 0 : index
    %c0_6 = arith.constant 0 : index
    %19 = vector.load %arg2[%c0_5, %c0_6] : memref<1x32xf32, #tpu.memory_space<vmem>>, vector<1x32xf32>
    %20 = vector.broadcast %19 : vector<1x32xf32> to vector<128x32xf32>
    %21 = arith.mulf %18, %20 : vector<128x32xf32>
    %c0_7 = arith.constant 0 : index
    %c0_8 = arith.constant 0 : index
    %22 = vector.load %arg3[%c0_7, %c0_8] : memref<1x32xf32, #tpu.memory_space<vmem>>, vector<1x32xf32>
    %23 = vector.broadcast %22 : vector<1x32xf32> to vector<128x32xf32>
    %24 = arith.addf %21, %23 : vector<128x32xf32>
    %c0_9 = arith.constant 0 : index
    %c0_10 = arith.constant 0 : index
    %25 = vector.load %arg4[%c0_9, %c0_10] : memref<32x128xf32, #tpu.memory_space<vmem>>, vector<32x128xf32>
    %cst_11 = arith.constant dense<0.000000e+00> : vector<128x128xf32>
    %26 = tpu.matmul %24, %25, %cst_11 {dimension_numbers = #tpu.dot_dimension_numbers<[1], [0], [0], [1], [0, 0, 1, 1], [], []>} : vector<128x32xf32>, vector<32x128xf32>, vector<128x128xf32> -> vector<128x128xf32>
    %c0_12 = arith.constant 0 : index
    %c0_13 = arith.constant 0 : index
    %27 = vector.load %arg5[%c0_12, %c0_13] : memref<128x128xf32, #tpu.memory_space<vmem>>, vector<128x128xf32>
    tpu.vector_store %arg5[%c0_12, %c0_13], %26 {strides = array<i32>} : memref<128x128xf32, #tpu.memory_space<vmem>>, vector<128x128xf32>,
    return
  }
  func.func @transform_0(%arg0: i32) -> (i32, i32) {
    %c0_i32 = arith.constant 0 : i32
    %c0_i32_0 = arith.constant 0 : i32
    return %arg0, %c0_i32 : i32, i32
  }
  func.func @transform_1(%arg0: i32) -> (i32, i32) {
    %c0_i32 = arith.constant 0 : i32
    %c0_i32_0 = arith.constant 0 : i32
    %c0_i32_1 = arith.constant 0 : i32
    return %c0_i32, %c0_i32_0 : i32, i32
  }
  func.func @transform_2(%arg0: i32) -> (i32, i32) {
    %c0_i32 = arith.constant 0 : i32
    %c0_i32_0 = arith.constant 0 : i32
    %c0_i32_1 = arith.constant 0 : i32
    return %c0_i32, %c0_i32_0 : i32, i32
  }
  func.func @transform_3(%arg0: i32) -> (i32, i32) {
    %c0_i32 = arith.constant 0 : i32
    %c0_i32_0 = arith.constant 0 : i32
    %c0_i32_1 = arith.constant 0 : i32
    return %c0_i32, %c0_i32_0 : i32, i32
  }
  func.func @transform_4(%arg0: i32) -> (i32, i32) {
    %c0_i32 = arith.constant 0 : i32
    %c0_i32_0 = arith.constant 0 : i32
    return %arg0, %c0_i32 : i32, i32
  }
}

module attributes {stable_mosaic.version = 11 : i64} {
  func.func @_out_fuse_kernel(%arg0: i32, %arg1: memref<128x64xf32, #tpu.memory_space<vmem>>, %arg2: memref<128x64xf32, #tpu.memory_space<vmem>>, %arg3: memref<128x32xf32, #tpu.memory_space<vmem>>, %arg4: memref<1x64xf32, #tpu.memory_space<vmem>>, %arg5: memref<1x64xf32, #tpu.memory_space<vmem>>, %arg6: memref<64x32xf32, #tpu.memory_space<vmem>>, %arg7: memref<128x32xf32, #tpu.memory_space<vmem>>) attributes {dimension_semantics = [#tpu.dimension_semantics<parallel>], iteration_bounds = array<i64: 1>, scalar_prefetch = 0 : i64, scratch_operands = 0 : i64, tpu.core_type = #tpu.core_type<tc>, window_params = [{transform_indices = @transform_0, window_bounds = array<i64: 128, 64>}, {transform_indices = @transform_1, window_bounds = array<i64: 128, 64>}, {transform_indices = @transform_2, window_bounds = array<i64: 128, 32>}, {pipeline_mode = #tpu.pipeline_mode<synchronous>, transform_indices = @transform_3, window_bounds = array<i64: 1, 64>}, {pipeline_mode = #tpu.pipeline_mode<synchronous>, transform_indices = @transform_4, window_bounds = array<i64: 1, 64>}, {pipeline_mode = #tpu.pipeline_mode<synchronous>, transform_indices = @transform_5, window_bounds = array<i64: 64, 32>}, {transform_indices = @transform_6, window_bounds = array<i64: 128, 32>}]} {
    %c0 = arith.constant 0 : index
    %c0_0 = arith.constant 0 : index
    %0 = vector.load %arg1[%c0, %c0_0] : memref<128x64xf32, #tpu.memory_space<vmem>>, vector<128x64xf32>
    %cst = arith.constant dense<0.000000e+00> : vector<128xf32>
    %1 = vector.multi_reduction <add>, %0, %cst [1] : vector<128x64xf32> to vector<128xf32>
    %2 = vector.shape_cast %1 : vector<128xf32> to vector<128x1xf32>
    %cst_1 = arith.constant 6.400000e+01 : f32
    %3 = vector.broadcast %cst_1 : f32 to vector<128x1xf32>
    %4 = arith.divf %2, %3 : vector<128x1xf32>
    %5 = vector.broadcast %4 : vector<128x1xf32> to vector<128x64xf32>
    %6 = arith.subf %0, %5 : vector<128x64xf32>
    %7 = arith.mulf %6, %6 : vector<128x64xf32>
    %cst_2 = arith.constant dense<0.000000e+00> : vector<128xf32>
    %8 = vector.multi_reduction <add>, %7, %cst_2 [1] : vector<128x64xf32> to vector<128xf32>
    %9 = vector.shape_cast %8 : vector<128xf32> to vector<128x1xf32>
    %cst_3 = arith.constant 6.400000e+01 : f32
    %10 = vector.broadcast %cst_3 : f32 to vector<128x1xf32>
    %11 = arith.divf %9, %10 : vector<128x1xf32>
    %12 = vector.broadcast %4 : vector<128x1xf32> to vector<128x64xf32>
    %13 = arith.subf %0, %12 : vector<128x64xf32>
    %cst_4 = arith.constant 9.99999974E-6 : f32
    %14 = vector.broadcast %cst_4 : f32 to vector<128x1xf32>
    %15 = arith.addf %11, %14 : vector<128x1xf32>
    %16 = math.rsqrt %15 : vector<128x1xf32>
    %17 = vector.broadcast %16 : vector<128x1xf32> to vector<128x64xf32>
    %18 = arith.mulf %13, %17 : vector<128x64xf32>
    %c0_5 = arith.constant 0 : index
    %c0_6 = arith.constant 0 : index
    %19 = vector.load %arg4[%c0_5, %c0_6] : memref<1x64xf32, #tpu.memory_space<vmem>>, vector<1x64xf32>
    %20 = vector.broadcast %19 : vector<1x64xf32> to vector<128x64xf32>
    %21 = arith.mulf %18, %20 : vector<128x64xf32>
    %c0_7 = arith.constant 0 : index
    %c0_8 = arith.constant 0 : index
    %22 = vector.load %arg5[%c0_7, %c0_8] : memref<1x64xf32, #tpu.memory_space<vmem>>, vector<1x64xf32>
    %23 = vector.broadcast %22 : vector<1x64xf32> to vector<128x64xf32>
    %24 = arith.addf %21, %23 : vector<128x64xf32>
    %c0_9 = arith.constant 0 : index
    %c0_10 = arith.constant 0 : index
    %25 = vector.load %arg2[%c0_9, %c0_10] : memref<128x64xf32, #tpu.memory_space<vmem>>, vector<128x64xf32>
    %26 = arith.negf %25 : vector<128x64xf32>
    %27 = math.exp %26 : vector<128x64xf32>
    %cst_11 = arith.constant 1.000000e+00 : f32
    %28 = vector.broadcast %cst_11 : f32 to vector<128x64xf32>
    %29 = arith.addf %28, %27 : vector<128x64xf32>
    %30 = arith.divf %28, %29 : vector<128x64xf32>
    %31 = arith.mulf %25, %30 : vector<128x64xf32>
    %32 = arith.mulf %24, %31 : vector<128x64xf32>
    %c0_12 = arith.constant 0 : index
    %c0_13 = arith.constant 0 : index
    %33 = vector.load %arg3[%c0_12, %c0_13] : memref<128x32xf32, #tpu.memory_space<vmem>>, vector<128x32xf32>
    %c0_14 = arith.constant 0 : index
    %c0_15 = arith.constant 0 : index
    %34 = vector.load %arg6[%c0_14, %c0_15] : memref<64x32xf32, #tpu.memory_space<vmem>>, vector<64x32xf32>
    %cst_16 = arith.constant dense<0.000000e+00> : vector<128x32xf32>
    %35 = tpu.matmul %32, %34, %cst_16 {dimension_numbers = #tpu.dot_dimension_numbers<[1], [0], [0], [1], [0, 0, 1, 1], [], []>} : vector<128x64xf32>, vector<64x32xf32>, vector<128x32xf32> -> vector<128x32xf32>
    %36 = arith.addf %33, %35 : vector<128x32xf32>
    %c0_17 = arith.constant 0 : index
    %c0_18 = arith.constant 0 : index
    %37 = vector.load %arg7[%c0_17, %c0_18] : memref<128x32xf32, #tpu.memory_space<vmem>>, vector<128x32xf32>
    tpu.vector_store %arg7[%c0_17, %c0_18], %36 {strides = array<i32>} : memref<128x32xf32, #tpu.memory_space<vmem>>, vector<128x32xf32>,
    return
  }
  func.func @transform_0(%arg0: i32) -> (i32, i32) {
    %c0_i32 = arith.constant 0 : i32
    %c0_i32_0 = arith.constant 0 : i32
    return %arg0, %c0_i32 : i32, i32
  }
  func.func @transform_1(%arg0: i32) -> (i32, i32) {
    %c0_i32 = arith.constant 0 : i32
    %c0_i32_0 = arith.constant 0 : i32
    return %arg0, %c0_i32 : i32, i32
  }
  func.func @transform_2(%arg0: i32) -> (i32, i32) {
    %c0_i32 = arith.constant 0 : i32
    %c0_i32_0 = arith.constant 0 : i32
    return %arg0, %c0_i32 : i32, i32
  }
  func.func @transform_3(%arg0: i32) -> (i32, i32) {
    %c0_i32 = arith.constant 0 : i32
    %c0_i32_0 = arith.constant 0 : i32
    %c0_i32_1 = arith.constant 0 : i32
    return %c0_i32, %c0_i32_0 : i32, i32
  }
  func.func @transform_4(%arg0: i32) -> (i32, i32) {
    %c0_i32 = arith.constant 0 : i32
    %c0_i32_0 = arith.constant 0 : i32
    %c0_i32_1 = arith.constant 0 : i32
    return %c0_i32, %c0_i32_0 : i32, i32
  }
  func.func @transform_5(%arg0: i32) -> (i32, i32) {
    %c0_i32 = arith.constant 0 : i32
    %c0_i32_0 = arith.constant 0 : i32
    %c0_i32_1 = arith.constant 0 : i32
    return %c0_i32, %c0_i32_0 : i32, i32
  }
  func.func @transform_6(%arg0: i32) -> (i32, i32) {
    %c0_i32 = arith.constant 0 : i32
    %c0_i32_0 = arith.constant 0 : i32
    return %arg0, %c0_i32 : i32, i32
  }
}

</mosaic_0001>

<bundles_post_ra>
// kernel: vss_layer_forward.6
= control target key start
LH: loop header
LB: loop body
LE: loop exit
PB: predicated region body
PF: predicated region fallthrough
CT: control target
= control target key end

     0   :  { %9 = vsyncpa [#allocation3], 0  ;;  %s662_s15 = smov [#allocation2]   ;;  %s972_s0 = inlined_call_operand.hbm [shape: f32[128,32], index: 0, kind: input, shape index: {}]   ;;  %s973_s1 = inlined_call_operand.vmem [shape: f32[1,32], index: 1, kind: input, shape index: {}]   ;;  %s974_s2 = inlined_call_operand.vmem [shape: f32[1,32], index: 2, kind: input, shape index: {}]   ;;  %s975_s3 = inlined_call_operand.vmem [shape: f32[32,128], index: 3, kind: input, shape index: {}]   ;;  %s976_s4 = inlined_call_operand.vmem [shape: f32[128,128], index: 4, kind: output, shape index: {}]  }
   0x1   :  { %s15_s16 = sshll.u32 %s662_s15, 4  ;;  %s638_s19 = scalar_lea.hbm %s972_s0, 2048  ;;  %s16_s16 = int_to_ptr.vmem [resolvable:$true] %s15_s16 }
   0x2   :  { %p639_p0 = scmp.ne.s32.totalorder %s972_s0, %s638_s19  ;;  %p642_p1 = scmp.lt.u32.totalorder %s638_s19, %s972_s0 }
   0x4   :  { %p644_p2 = pnand %p642_p1, %p639_p0 }
   0x6   :  { %647 = shalt.err (!%p644_p2)
}
   0x7   :  { %s648_s24 = scalar_lea.vmem %s16_s16, 2048  ;;  %p653_p4 = scmp.lt.s32.totalorder %s16_s16, %s16_s16 }
   0x8   :  { %p649_p3 = scmp.ne.s32.totalorder %s16_s16, %s648_s24  ;;  %p654_p5 = scmp.lt.s32.totalorder %s648_s24, %s648_s24 }
   0xa   :  { %p655_p6 = por %p654_p5, %p653_p4 }
   0xc   :  { %p656_p7 = pnand %p655_p6, %p649_p3 }
   0xe   :  { %659 = shalt.err (!%p656_p7)
}
   0xf   :  { %s663_s25 = smov 128   ;;  %s664_s26 = smov 8  }
  0x10   :  { %21 = dma.hbm_to_vmem [thread:$0]  %s972_s0, 2048, %s16_s16, [#allocation3], %s663_s25, %s663_s25, %s664_s26  }
  0x11   :  { %660 = dma.done.wait [#allocation3], 2048  }
  0x12   :  { %661 = vsyncadd [#allocation3], 4294965248  ;;  %vm47_vm0 = vcmask 261120   ;;  %v31_v0 = vld [vmem:[#allocation2] sm:$0xff]  ;;  %v32_v1 = vld [vmem:[#allocation2 + $0x8] sm:$0xff] }
  0x13   :  { %v39_v2 = vld [vmem:[#allocation2 + $0x40] sm:$0xff]  ;;  %v48_v3 = vsel %vm47_vm0, %v31_v0, 0.0  ;;  %v51_v4 = vsel %vm47_vm0, %v32_v1, 0.0  ;;  %v40_v5 = vld [vmem:[#allocation2 + $0x48] sm:$0xff]  ;;  %v33_v8 = vld [vmem:[#allocation2 + $0x10] sm:$0xff] }
  0x14   :  { %49 = vadd.xlane.f32.xlu0 %v48_v3  ;;  %52 = vadd.xlane.f32.xlu1 %v51_v4  ;;  %v72_v6 = vsel %vm47_vm0, %v39_v2, 0.0  ;;  %v75_v7 = vsel %vm47_vm0, %v40_v5, 0.0  ;;  %v41_v9 = vld [vmem:[#allocation2 + $0x50] sm:$0xff]  ;;  %v54_v10 = vsel %vm47_vm0, %v33_v8, 0.0  ;;  %v708_v12 = vld [vmem:[#allocation2 + $0x18] sm:$0xff]  ;;  %v716_v16 = vld [vmem:[#allocation2 + $0x20] sm:$0xff] }
  0x15   :  { %v78_v11 = vsel %vm47_vm0, %v41_v9, 0.0  ;;  %v710_v13 = vld [vmem:[#allocation2 + $0x58] sm:$0xff]  ;;  %v57_v14 = vsel %vm47_vm0, %v708_v12, 0.0  ;;  %v718_v17 = vld [vmem:[#allocation2 + $0x60] sm:$0xff]  ;;  %v60_v18 = vsel %vm47_vm0, %v716_v16, 0.0  ;;  %v724_v20 = vld [vmem:[#allocation2 + $0x28] sm:$0xff] }
  0x16   :  { %v81_v15 = vsel %vm47_vm0, %v710_v13, 0.0  ;;  %v84_v19 = vsel %vm47_vm0, %v718_v17, 0.0  ;;  %v726_v21 = vld [vmem:[#allocation2 + $0x68] sm:$0xff]  ;;  %v63_v22 = vsel %vm47_vm0, %v724_v20, 0.0  ;;  %v732_v24 = vld [vmem:[#allocation2 + $0x30] sm:$0xff]  ;;  %v740_v28 = vld [vmem:[#allocation2 + $0x38] sm:$0xff] }
  0x17   :  { %v87_v23 = vsel %vm47_vm0, %v726_v21, 0.0  ;;  %v734_v25 = vld [vmem:[#allocation2 + $0x70] sm:$0xff]  ;;  %v66_v26 = vsel %vm47_vm0, %v732_v24, 0.0  ;;  %v742_v29 = vld [vmem:[#allocation2 + $0x78] sm:$0xff]  ;;  %v69_v30 = vsel %vm47_vm0, %v740_v28, 0.0 }
  0x18   :  { %73 = vadd.xlane.f32.xlu0 %v72_v6  ;;  %76 = vadd.xlane.f32.xlu1 %v75_v7  ;;  %v90_v27 = vsel %vm47_vm0, %v734_v25, 0.0  ;;  %v93_v31 = vsel %vm47_vm0, %v742_v29, 0.0 }
  0x1c   :  { %55 = vadd.xlane.f32.xlu0 %v54_v10  ;;  %79 = vadd.xlane.f32.xlu1 %v78_v11 }
  0x20   :  { %58 = vadd.xlane.f32.xlu0 %v57_v14  ;;  %82 = vadd.xlane.f32.xlu1 %v81_v15 }
  0x24   :  { %61 = vadd.xlane.f32.xlu0 %v60_v18  ;;  %85 = vadd.xlane.f32.xlu1 %v84_v19 }
  0x28   :  { %64 = vadd.xlane.f32.xlu0 %v63_v22  ;;  %88 = vadd.xlane.f32.xlu1 %v87_v23 }
  0x2c   :  { %67 = vadd.xlane.f32.xlu0 %v66_v26  ;;  %91 = vadd.xlane.f32.xlu1 %v90_v27 }
  0x30   :  { %70 = vadd.xlane.f32.xlu0 %v69_v30  ;;  %94 = vadd.xlane.f32.xlu1 %v93_v31 }
  0xa1   :  { %v50_v32 = vpop.xlane.xlu0 %49  ;;  %v53_v33 = vpop.xlane.xlu1 %52 }
  0xa2   :  { %v97_v34 = vmul.f32 0.03125, %v50_v32  ;;  %v98_v35 = vmul.f32 0.03125, %v53_v33 }
  0xa4   :  { %v748_v36 = vsub.f32 %v31_v0, %v97_v34  ;;  %v750_v37 = vsub.f32 %v32_v1, %v98_v35 }
  0xa5   :  { %v74_v38 = vpop.xlane.xlu0 %73  ;;  %v77_v39 = vpop.xlane.xlu1 %76 }
  0xa6   :  { %v105_v40 = vmul.f32 0.03125, %v74_v38  ;;  %v106_v41 = vmul.f32 0.03125, %v77_v39  ;;  %v129_v42 = vmul.f32 %v748_v36, %v748_v36  ;;  %v130_v43 = vmul.f32 %v750_v37, %v750_v37 }
  0xa8   :  { %v756_v44 = vsub.f32 %v39_v2, %v105_v40  ;;  %v758_v45 = vsub.f32 %v40_v5, %v106_v41  ;;  %v145_v46 = vsel %vm47_vm0, %v129_v42, 0.0  ;;  %v148_v49 = vsel %vm47_vm0, %v130_v43, 0.0 }
  0xa9   :  { %146 = vadd.xlane.f32.xlu0 %v145_v46  ;;  %v56_v47 = vpop.xlane.xlu0 %55  ;;  %v80_v48 = vpop.xlane.xlu1 %79 }
  0xaa   :  { %v99_v50 = vmul.f32 0.03125, %v56_v47  ;;  %v107_v51 = vmul.f32 0.03125, %v80_v48  ;;  %v137_v52 = vmul.f32 %v756_v44, %v756_v44  ;;  %v138_v53 = vmul.f32 %v758_v45, %v758_v45 }
  0xac   :  { %v766_v54 = vsub.f32 %v33_v8, %v99_v50  ;;  %v768_v55 = vsub.f32 %v41_v9, %v107_v51  ;;  %v169_v56 = vsel %vm47_vm0, %v137_v52, 0.0  ;;  %v172_v59 = vsel %vm47_vm0, %v138_v53, 0.0  ;;  %v304_v53 = vld [vmem:[%s975_s3 + $0x8] sm:$0xff] }
  0xad   :  { %149 = vadd.xlane.f32.xlu0 %v148_v49  ;;  %170 = vadd.xlane.f32.xlu1 %v169_v56  ;;  %v59_v57 = vpop.xlane.xlu0 %58  ;;  %v83_v58 = vpop.xlane.xlu1 %82 }
  0xae   :  { %v100_v60 = vmul.f32 0.03125, %v59_v57  ;;  %v108_v61 = vmul.f32 0.03125, %v83_v58  ;;  %v131_v62 = vmul.f32 %v766_v54, %v766_v54  ;;  %v139_v63 = vmul.f32 %v768_v55, %v768_v55  ;;  %v305_v57 = vld [vmem:[%s975_s3 + $0x10] sm:$0xff]  ;;  %v306_v58 = vld [vmem:[%s975_s3 + $0x18] sm:$0xff] }
  0xb0   :  { %v777_v0 = vsub.f32 %v708_v12, %v100_v60  ;;  %v780_v1 = vsub.f32 %v710_v13, %v108_v61  ;;  %v151_v2 = vsel %vm47_vm0, %v131_v62, 0.0  ;;  %v175_v5 = vsel %vm47_vm0, %v139_v63, 0.0 }
  0xb1   :  { %173 = vadd.xlane.f32.xlu1 %v172_v59  ;;  %152 = vadd.xlane.f32.xlu0 %v151_v2  ;;  %v62_v3 = vpop.xlane.xlu0 %61  ;;  %v86_v4 = vpop.xlane.xlu1 %85  ;;  %v595_v59 = vpack.c.bf16 %v306_v58, %v305_v57 }
  0xb2   :  { %v101_v6 = vmul.f32 0.03125, %v62_v3  ;;  %v109_v7 = vmul.f32 0.03125, %v86_v4  ;;  %v132_v8 = vmul.f32 %v777_v0, %v777_v0  ;;  %v140_v9 = vmul.f32 %v780_v1, %v780_v1 }
  0xb4   :  { %v789_v10 = vsub.f32 %v716_v16, %v101_v6  ;;  %v792_v11 = vsub.f32 %v718_v17, %v109_v7  ;;  %v154_v12 = vsel %vm47_vm0, %v132_v8, 0.0  ;;  %v178_v15 = vsel %vm47_vm0, %v140_v9, 0.0 }
  0xb5   :  { %176 = vadd.xlane.f32.xlu1 %v175_v5  ;;  %155 = vadd.xlane.f32.xlu0 %v154_v12  ;;  %v65_v13 = vpop.xlane.xlu0 %64  ;;  %v89_v14 = vpop.xlane.xlu1 %88 }
  0xb6   :  { %v102_v18 = vmul.f32 0.03125, %v65_v13  ;;  %v110_v19 = vmul.f32 0.03125, %v89_v14  ;;  %v133_v22 = vmul.f32 %v789_v10, %v789_v10  ;;  %v141_v16 = vmul.f32 %v792_v11, %v792_v11 }
  0xb8   :  { %v801_v23 = vsub.f32 %v724_v20, %v102_v18  ;;  %v804_v17 = vsub.f32 %v726_v21, %v110_v19  ;;  %v157_v26 = vsel %vm47_vm0, %v133_v22, 0.0  ;;  %v181_v31 = vsel %vm47_vm0, %v141_v16, 0.0 }
  0xb9   :  { %179 = vadd.xlane.f32.xlu1 %v178_v15  ;;  %158 = vadd.xlane.f32.xlu0 %v157_v26  ;;  %v68_v27 = vpop.xlane.xlu0 %67  ;;  %v92_v30 = vpop.xlane.xlu1 %91 }
  0xba   :  { %v103_v32 = vmul.f32 0.03125, %v68_v27  ;;  %v111_v33 = vmul.f32 0.03125, %v92_v30  ;;  %v134_v34 = vmul.f32 %v801_v23, %v801_v23  ;;  %v142_v20 = vmul.f32 %v804_v17, %v804_v17  ;;  %v853_v30 = vld [vmem:[%s973_s1] ss:$0 sm:$0xff] }
  0xbc   :  { %v813_v35 = vsub.f32 %v732_v24, %v103_v32  ;;  %v816_v21 = vsub.f32 %v734_v25, %v111_v33  ;;  %v160_v38 = vsel %vm47_vm0, %v134_v34, 0.0  ;;  %v184_v41 = vsel %vm47_vm0, %v142_v20, 0.0 }
  0xbd   :  { %182 = vadd.xlane.f32.xlu1 %v181_v31  ;;  %161 = vadd.xlane.f32.xlu0 %v160_v38  ;;  %v71_v39 = vpop.xlane.xlu0 %70  ;;  %v95_v40 = vpop.xlane.xlu1 %94  ;;  %v859_v38 = vld [vmem:[%s974_s2] ss:$0 sm:$0xff] }
  0xbe   :  { %v104_v42 = vmul.f32 0.03125, %v71_v39  ;;  %v112_v43 = vmul.f32 0.03125, %v95_v40  ;;  %v135_v46 = vmul.f32 %v813_v35, %v813_v35  ;;  %v143_v24 = vmul.f32 %v816_v21, %v816_v21 }
  0xc0   :  { %v825_v47 = vsub.f32 %v740_v28, %v104_v42  ;;  %v828_v25 = vsub.f32 %v742_v29, %v112_v43  ;;  %v163_v48 = vsel %vm47_vm0, %v135_v46, 0.0  ;;  %v187_v49 = vsel %vm47_vm0, %v143_v24, 0.0  ;;  %v303_v29 = vld [vmem:[%s975_s3] sm:$0xff] }
  0xc1   :  { %185 = vadd.xlane.f32.xlu1 %v184_v41  ;;  %164 = vadd.xlane.f32.xlu0 %v163_v48  ;;  %v591_v56 = vpack.c.bf16 %v304_v53, %v303_v29 }
  0xc2   :  { %v136_v50 = vmul.f32 %v825_v47, %v825_v47  ;;  %v144_v51 = vmul.f32 %v828_v25, %v828_v25 }
  0xc3   :  { %592 = vmatprep.subr.bf16.mxu0 %v591_v56  ;;  %599 = vmatprep.subr.bf16.mxu1 %v591_v56 }
  0xc4   :  { %v166_v52 = vsel %vm47_vm0, %v136_v50, 0.0  ;;  %v190_v28 = vsel %vm47_vm0, %v144_v51, 0.0  ;;  %594 = vmatpush3.bf16.msra.mxu0 %v591_v56  ;;  %601 = vmatpush3.bf16.msra.mxu1 %v591_v56 }
  0xc5   :  { %188 = vadd.xlane.f32.xlu1 %v187_v49  ;;  %167 = vadd.xlane.f32.xlu0 %v166_v52 }
  0xc6   :  { %596 = vmatprep.subr.bf16.mxu0 %v595_v59  ;;  %600 = vmatprep.subr.bf16.mxu1 %v595_v59 }
  0xc8   :  { %598 = vmatpush3.bf16.msra.mxu0 %v595_v59  ;;  %602 = vmatpush3.bf16.msra.mxu1 %v595_v59 }
  0xc9   :  { %191 = vadd.xlane.f32.xlu1 %v190_v28 }
 0x136   :  { %v147_v60 = vpop.xlane.xlu0 %146 }
 0x137   :  { %v193_v61 = vmul.f32 0.03125, %v147_v60 }
 0x139   :  { %v209_v62 = vadd.f32 1e-05, %v193_v61 }
 0x13a   :  { %v171_v63 = vpop.xlane.xlu1 %170  ;;  %v150_v2 = vpop.xlane.xlu0 %149 }
 0x13b   :  { %606 = vrsqrt.f32 %v209_v62  ;;  %v201_v3 = vmul.f32 0.03125, %v171_v63  ;;  %v194_v4 = vmul.f32 0.03125, %v150_v2 }
 0x13d   :  { %v217_v5 = vadd.f32 1e-05, %v201_v3  ;;  %v210_v6 = vadd.f32 1e-05, %v194_v4 }
 0x13e   :  { %v174_v7 = vpop.xlane.xlu1 %173  ;;  %v153_v8 = vpop.xlane.xlu0 %152 }
 0x13f   :  { %608 = vrsqrt.f32 %v217_v5  ;;  %v202_v9 = vmul.f32 0.03125, %v174_v7  ;;  %v195_v12 = vmul.f32 0.03125, %v153_v8 }
 0x140   :  { %610 = vrsqrt.f32 %v210_v6 }
 0x141   :  { %v218_v13 = vadd.f32 1e-05, %v202_v9  ;;  %v211_v14 = vadd.f32 1e-05, %v195_v12 }
 0x142   :  { %v177_v15 = vpop.xlane.xlu1 %176  ;;  %v156_v18 = vpop.xlane.xlu0 %155 }
 0x143   :  { %612 = vrsqrt.f32 %v218_v13  ;;  %v203_v19 = vmul.f32 0.03125, %v177_v15  ;;  %v196_v22 = vmul.f32 0.03125, %v156_v18 }
 0x144   :  { %614 = vrsqrt.f32 %v211_v14 }
 0x145   :  { %v607_v16 = vpop.eup %606  ;;  %v219_v26 = vadd.f32 1e-05, %v203_v19  ;;  %v212_v27 = vadd.f32 1e-05, %v196_v22 }
 0x146   :  { %v180_v31 = vpop.xlane.xlu1 %179  ;;  %v159_v32 = vpop.xlane.xlu0 %158  ;;  %v241_v33 = vmul.f32 %v607_v16, %v748_v36 }
 0x147   :  { %616 = vrsqrt.f32 %v219_v26  ;;  %v204_v34 = vmul.f32 0.03125, %v180_v31  ;;  %v197_v20 = vmul.f32 0.03125, %v159_v32 }
 0x148   :  { %618 = vrsqrt.f32 %v212_v27  ;;  %v264_v39 = vmul.f32 %v853_v30, %v241_v33 }
 0x149   :  { %v609_v40 = vpop.eup %608  ;;  %v220_v41 = vadd.f32 1e-05, %v204_v34  ;;  %v213_v42 = vadd.f32 1e-05, %v197_v20 }
 0x14a   :  { %v611_v43 = vpop.eup %610  ;;  %v183_v46 = vpop.xlane.xlu1 %182  ;;  %v287_v48 = vadd.f32 %v859_v38, %v264_v39  ;;  %v249_v36 = vmul.f32 %v609_v40, %v756_v44 }
 0x14b   :  { %v162_v24 = vpop.xlane.xlu0 %161  ;;  %620 = vrsqrt.f32 %v220_v41  ;;  %v205_v49 = vmul.f32 0.03125, %v183_v46  ;;  %v242_v51 = vmul.f32 %v611_v43, %v750_v37 }
 0x14c   :  { %v198_v50 = vmul.f32 0.03125, %v162_v24  ;;  %622 = vrsqrt.f32 %v213_v42  ;;  %567 = vmatprep.mubr.msk.f32.mxu0 %vm47_vm0, %v287_v48  ;;  %v272_v52 = vmul.f32 %v853_v30, %v249_v36 }
 0x14d   :  { %v613_v28 = vpop.eup %612  ;;  %v221_v29 = vadd.f32 1e-05, %v205_v49  ;;  %v265_v56 = vmul.f32 %v853_v30, %v242_v51 }
 0x14e   :  { %v214_v53 = vadd.f32 1e-05, %v198_v50  ;;  %v615_v57 = vpop.eup %614  ;;  %v186_v58 = vpop.xlane.xlu1 %185  ;;  %v295_v44 = vadd.f32 %v859_v38, %v272_v52  ;;  %v250_v60 = vmul.f32 %v613_v28, %v758_v45 }
 0x14f   :  { %v165_v59 = vpop.xlane.xlu0 %164  ;;  %624 = vrsqrt.f32 %v221_v29  ;;  %v206_v61 = vmul.f32 0.03125, %v186_v58  ;;  %v288_v62 = vadd.f32 %v859_v38, %v265_v56  ;;  %v243_v63 = vmul.f32 %v615_v57, %v766_v54 }
 0x150   :  { %v199_v37 = vmul.f32 0.03125, %v165_v59  ;;  %626 = vrsqrt.f32 %v214_v53  ;;  %579 = vmatprep.mubr.msk.f32.mxu1 %vm47_vm0, %v295_v44  ;;  %v273_v2 = vmul.f32 %v853_v30, %v250_v60 }
 0x151   :  { %v617_v3 = vpop.eup %616  ;;  %v222_v4 = vadd.f32 1e-05, %v206_v61  ;;  %568 = vmatmul.mubr.msk.f32.vlgmr.msra.gmra.mrb[0].mxu0 %vm47_vm0, %v288_v62  ;;  %v266_v8 = vmul.f32 %v853_v30, %v243_v63 }
 0x152   :  { %v215_v5 = vadd.f32 1e-05, %v199_v37  ;;  %v619_v6 = vpop.eup %618  ;;  %v189_v7 = vpop.xlane.xlu1 %188  ;;  %v296_v9 = vadd.f32 %v859_v38, %v273_v2  ;;  %v251_v12 = vmul.f32 %v617_v3, %v768_v55 }
 0x153   :  { %v168_v45 = vpop.xlane.xlu0 %167  ;;  %628 = vrsqrt.f32 %v222_v4  ;;  %v207_v13 = vmul.f32 0.03125, %v189_v7  ;;  %v244_v54 = vmul.f32 %v619_v6, %v777_v0  ;;  %v289_v15 = vadd.f32 %v859_v38, %v266_v8 }
 0x154   :  { %v200_v14 = vmul.f32 0.03125, %v168_v45  ;;  %630 = vrsqrt.f32 %v215_v5  ;;  %580 = vmatmul.mubr.msk.f32.vlgmr.msra.gmra.mrb[0].mxu1 %vm47_vm0, %v296_v9  ;;  %v274_v18 = vmul.f32 %v853_v30, %v251_v12 }
 0x155   :  { %v621_v19 = vpop.eup %620  ;;  %v223_v22 = vadd.f32 1e-05, %v207_v13  ;;  %v267_v26 = vmul.f32 %v853_v30, %v244_v54  ;;  %570 = vmatprep.mubr.msk.f32.mxu0 %vm47_vm0, %v289_v15 }
 0x156   :  { %v216_v16 = vadd.f32 1e-05, %v200_v14  ;;  %v623_v27 = vpop.eup %622  ;;  %v192_v55 = vpop.xlane.xlu1 %191  ;;  %v297_v31 = vadd.f32 %v859_v38, %v274_v18  ;;  %v252_v0 = vmul.f32 %v621_v19, %v780_v1 }
 0x157   :  { %632 = vrsqrt.f32 %v223_v22  ;;  %v208_v32 = vmul.f32 0.03125, %v192_v55  ;;  %v290_v33 = vadd.f32 %v859_v38, %v267_v26  ;;  %v245_v34 = vmul.f32 %v623_v27, %v789_v10 }
 0x158   :  { %634 = vrsqrt.f32 %v216_v16  ;;  %582 = vmatprep.mubr.msk.f32.mxu1 %vm47_vm0, %v297_v31  ;;  %v275_v20 = vmul.f32 %v853_v30, %v252_v0 }
 0x159   :  { %v625_v39 = vpop.eup %624  ;;  %v224_v40 = vadd.f32 1e-05, %v208_v32  ;;  %571 = vmatmul.mubr.msk.f32.gmra.mrb[2].mxu0 %vm47_vm0, %v290_v33  ;;  %v268_v41 = vmul.f32 %v853_v30, %v245_v34 }
 0x15a   :  { %v627_v42 = vpop.eup %626  ;;  %v298_v1 = vadd.f32 %v859_v38, %v275_v20  ;;  %v253_v43 = vmul.f32 %v625_v39, %v792_v11 }
 0x15b   :  { %636 = vrsqrt.f32 %v224_v40  ;;  %v291_v46 = vadd.f32 %v859_v38, %v268_v41  ;;  %v246_v10 = vmul.f32 %v627_v42, %v801_v23 }
 0x15c   :  { %583 = vmatmul.mubr.msk.f32.gmra.mrb[2].mxu1 %vm47_vm0, %v298_v1  ;;  %v276_v24 = vmul.f32 %v853_v30, %v253_v43 }
 0x15d   :  { %v629_v48 = vpop.eup %628  ;;  %573 = vmatprep.mubr.msk.f32.mxu0 %vm47_vm0, %v291_v46  ;;  %v269_v36 = vmul.f32 %v853_v30, %v246_v10 }
 0x15e   :  { %v631_v49 = vpop.eup %630  ;;  %v299_v50 = vadd.f32 %v859_v38, %v276_v24  ;;  %v254_v51 = vmul.f32 %v629_v48, %v804_v17 }
 0x15f   :  { %v292_v11 = vadd.f32 %v859_v38, %v269_v36  ;;  %v247_v52 = vmul.f32 %v631_v49, %v813_v35 }
 0x160   :  { %585 = vmatprep.mubr.msk.f32.mxu1 %vm47_vm0, %v299_v50  ;;  %v277_v23 = vmul.f32 %v853_v30, %v254_v51 }
 0x161   :  { %v633_v28 = vpop.eup %632  ;;  %574 = vmatmul.mubr.msk.f32.gmra.mrb[4].mxu0 %vm47_vm0, %v292_v11  ;;  %v270_v29 = vmul.f32 %v853_v30, %v247_v52 }
 0x162   :  { %v635_v53 = vpop.eup %634  ;;  %v300_v56 = vadd.f32 %v859_v38, %v277_v23  ;;  %v255_v57 = vmul.f32 %v633_v28, %v816_v21 }
 0x163   :  { %v293_v17 = vadd.f32 %v859_v38, %v270_v29  ;;  %v248_v58 = vmul.f32 %v635_v53, %v825_v47 }
 0x164   :  { %586 = vmatmul.mubr.msk.f32.gmra.mrb[4].mxu1 %vm47_vm0, %v300_v56  ;;  %v278_v35 = vmul.f32 %v853_v30, %v255_v57 }
 0x165   :  { %v637_v59 = vpop.eup %636  ;;  %576 = vmatprep.mubr.msk.f32.mxu0 %vm47_vm0, %v293_v17  ;;  %v271_v44 = vmul.f32 %v853_v30, %v248_v58 }
 0x166   :  { %v301_v60 = vadd.f32 %v859_v38, %v278_v35  ;;  %v256_v61 = vmul.f32 %v637_v59, %v828_v25 }
 0x167   :  { %v294_v37 = vadd.f32 %v859_v38, %v271_v44 }
 0x168   :  { %588 = vmatprep.mubr.msk.f32.mxu1 %vm47_vm0, %v301_v60  ;;  %v279_v21 = vmul.f32 %v853_v30, %v256_v61 }
 0x169   :  { %577 = vmatmul.mubr.msk.f32.gmra.mrb[6].mxu0 %vm47_vm0, %v294_v37 }
 0x16a   :  { %v302_v47 = vadd.f32 %v859_v38, %v279_v21 }
 0x16c   :  { %589 = vmatmul.mubr.msk.f32.gmra.mrb[6].mxu1 %vm47_vm0, %v302_v47 }
 0x224   :  { %v569_v62 = vpop.f32.mrb[0].mxu0 }
 0x225   :  { %501 = vst [vmem:[%s976_s4 + $0x8] sm:$0xff] %v569_v62  ;;  %v421_v63 = vpop.f32.mrb[1].mxu0 }
 0x226   :  { %500 = vst [vmem:[%s976_s4] sm:$0xff] %v421_v63 }
 0x227   :  { %v581_v25 = vpop.f32.mrb[0].mxu1 }
 0x228   :  { %509 = vst [vmem:[%s976_s4 + $0x48] sm:$0xff] %v581_v25  ;;  %v461_v30 = vpop.f32.mrb[1].mxu1 }
 0x229   :  { %508 = vst [vmem:[%s976_s4 + $0x40] sm:$0xff] %v461_v30 }
 0x22c   :  { %v572_v38 = vpop.f32.mrb[2].mxu0 }
 0x22d   :  { %503 = vst [vmem:[%s976_s4 + $0x18] sm:$0xff] %v572_v38  ;;  %v431_v2 = vpop.f32.mrb[3].mxu0 }
 0x22e   :  { %502 = vst [vmem:[%s976_s4 + $0x10] sm:$0xff] %v431_v2 }
 0x22f   :  { %v584_v3 = vpop.f32.mrb[2].mxu1 }
 0x230   :  { %511 = vst [vmem:[%s976_s4 + $0x58] sm:$0xff] %v584_v3  ;;  %v471_v4 = vpop.f32.mrb[3].mxu1 }
 0x231   :  { %510 = vst [vmem:[%s976_s4 + $0x50] sm:$0xff] %v471_v4 }
 0x234   :  { %v575_v5 = vpop.f32.mrb[4].mxu0 }
 0x235   :  { %505 = vst [vmem:[%s976_s4 + $0x28] sm:$0xff] %v575_v5  ;;  %v441_v6 = vpop.f32.mrb[5].mxu0 }
 0x236   :  { %504 = vst [vmem:[%s976_s4 + $0x20] sm:$0xff] %v441_v6 }
 0x237   :  { %v587_v7 = vpop.f32.mrb[4].mxu1 }
 0x238   :  { %513 = vst [vmem:[%s976_s4 + $0x68] sm:$0xff] %v587_v7  ;;  %v481_v45 = vpop.f32.mrb[5].mxu1 }
 0x239   :  { %512 = vst [vmem:[%s976_s4 + $0x60] sm:$0xff] %v481_v45 }
 0x23c   :  { %v578_v8 = vpop.f32.mrb[6].mxu0 }
 0x23d   :  { %507 = vst [vmem:[%s976_s4 + $0x38] sm:$0xff] %v578_v8  ;;  %v451_v9 = vpop.f32.mrb[7].mxu0 }
 0x23e   :  { %506 = vst [vmem:[%s976_s4 + $0x30] sm:$0xff] %v451_v9 }
 0x23f   :  { %v590_v12 = vpop.f32.mrb[6].mxu1 }
 0x240   :  { %515 = vst [vmem:[%s976_s4 + $0x78] sm:$0xff] %v590_v12  ;;  %v491_v13 = vpop.f32.mrb[7].mxu1 }
 0x241   :  { %514 = vst [vmem:[%s976_s4 + $0x70] sm:$0xff] %v491_v13 }
 0x242   :  { %520 = vsyncpa [#allocation3], 1 }

// kernel: vss_layer_forward.9
= control target key start
LH: loop header
LB: loop body
LE: loop exit
PB: predicated region body
PF: predicated region fallthrough
CT: control target
= control target key end

     0   :  { %vm33_vm0 = vcmask 261120   ;;  %s963_s0 = inlined_call_operand.vmem [shape: f32[128,32], index: 0, kind: input, shape index: {}]   ;;  %s964_s3 = inlined_call_operand.vmem [shape: f32[32,128], index: 3, kind: input, shape index: {}]   ;;  %s965_s1 = inlined_call_operand.vmem [shape: f32[1,32], index: 1, kind: input, shape index: {}]   ;;  %s966_s2 = inlined_call_operand.vmem [shape: f32[1,32], index: 2, kind: input, shape index: {}]   ;;  %s967_s4 = inlined_call_operand.vmem [shape: f32[128,128], index: 4, kind: output, shape index: {}]  }
   0x1   :  { %v17_v0 = vld [vmem:[%s963_s0] sm:$0xff]  ;;  %v18_v1 = vld [vmem:[%s963_s0 + $0x8] sm:$0xff]  ;;  %v19_v8 = vld [vmem:[%s963_s0 + $0x10] sm:$0xff] }
   0x2   :  { %v25_v2 = vld [vmem:[%s963_s0 + $0x40] sm:$0xff]  ;;  %v34_v3 = vsel %vm33_vm0, %v17_v0, 0.0  ;;  %v37_v4 = vsel %vm33_vm0, %v18_v1, 0.0  ;;  %v26_v5 = vld [vmem:[%s963_s0 + $0x48] sm:$0xff]  ;;  %v27_v9 = vld [vmem:[%s963_s0 + $0x50] sm:$0xff]  ;;  %v40_v10 = vsel %vm33_vm0, %v19_v8, 0.0 }
   0x3   :  { %35 = vadd.xlane.f32.xlu0 %v34_v3  ;;  %38 = vadd.xlane.f32.xlu1 %v37_v4  ;;  %v58_v6 = vsel %vm33_vm0, %v25_v2, 0.0  ;;  %v61_v7 = vsel %vm33_vm0, %v26_v5, 0.0  ;;  %v64_v11 = vsel %vm33_vm0, %v27_v9, 0.0  ;;  %v672_v12 = vld [vmem:[%s963_s0 + $0x18] sm:$0xff]  ;;  %v686_v16 = vld [vmem:[%s963_s0 + $0x20] sm:$0xff]  ;;  %v700_v20 = vld [vmem:[%s963_s0 + $0x28] sm:$0xff] }
   0x4   :  { %v677_v13 = vld [vmem:[%s963_s0 + $0x58] sm:$0xff]  ;;  %v43_v14 = vsel %vm33_vm0, %v672_v12, 0.0  ;;  %v691_v17 = vld [vmem:[%s963_s0 + $0x60] sm:$0xff]  ;;  %v46_v18 = vsel %vm33_vm0, %v686_v16, 0.0  ;;  %v705_v21 = vld [vmem:[%s963_s0 + $0x68] sm:$0xff]  ;;  %v49_v22 = vsel %vm33_vm0, %v700_v20, 0.0 }
   0x5   :  { %v67_v15 = vsel %vm33_vm0, %v677_v13, 0.0  ;;  %v70_v19 = vsel %vm33_vm0, %v691_v17, 0.0  ;;  %v73_v23 = vsel %vm33_vm0, %v705_v21, 0.0  ;;  %v714_v24 = vld [vmem:[%s963_s0 + $0x30] sm:$0xff]  ;;  %v728_v28 = vld [vmem:[%s963_s0 + $0x38] sm:$0xff] }
   0x6   :  { %v719_v25 = vld [vmem:[%s963_s0 + $0x70] sm:$0xff]  ;;  %v52_v26 = vsel %vm33_vm0, %v714_v24, 0.0  ;;  %v733_v29 = vld [vmem:[%s963_s0 + $0x78] sm:$0xff]  ;;  %v55_v30 = vsel %vm33_vm0, %v728_v28, 0.0 }
   0x7   :  { %59 = vadd.xlane.f32.xlu0 %v58_v6  ;;  %62 = vadd.xlane.f32.xlu1 %v61_v7  ;;  %v76_v27 = vsel %vm33_vm0, %v719_v25, 0.0  ;;  %v79_v31 = vsel %vm33_vm0, %v733_v29, 0.0 }
   0xb   :  { %41 = vadd.xlane.f32.xlu0 %v40_v10  ;;  %65 = vadd.xlane.f32.xlu1 %v64_v11 }
   0xf   :  { %44 = vadd.xlane.f32.xlu0 %v43_v14  ;;  %68 = vadd.xlane.f32.xlu1 %v67_v15 }
  0x13   :  { %47 = vadd.xlane.f32.xlu0 %v46_v18  ;;  %71 = vadd.xlane.f32.xlu1 %v70_v19 }
  0x17   :  { %50 = vadd.xlane.f32.xlu0 %v49_v22  ;;  %74 = vadd.xlane.f32.xlu1 %v73_v23 }
  0x1b   :  { %53 = vadd.xlane.f32.xlu0 %v52_v26  ;;  %77 = vadd.xlane.f32.xlu1 %v76_v27 }
  0x1f   :  { %56 = vadd.xlane.f32.xlu0 %v55_v30  ;;  %80 = vadd.xlane.f32.xlu1 %v79_v31 }
  0x90   :  { %v36_v32 = vpop.xlane.xlu0 %35  ;;  %v39_v33 = vpop.xlane.xlu1 %38 }
  0x91   :  { %v83_v34 = vmul.f32 0.03125, %v36_v32  ;;  %v84_v35 = vmul.f32 0.03125, %v39_v33 }
  0x93   :  { %v739_v36 = vsub.f32 %v17_v0, %v83_v34  ;;  %v741_v37 = vsub.f32 %v18_v1, %v84_v35 }
  0x94   :  { %v60_v38 = vpop.xlane.xlu0 %59  ;;  %v63_v39 = vpop.xlane.xlu1 %62 }
  0x95   :  { %v91_v40 = vmul.f32 0.03125, %v60_v38  ;;  %v92_v41 = vmul.f32 0.03125, %v63_v39  ;;  %v115_v42 = vmul.f32 %v739_v36, %v739_v36  ;;  %v116_v43 = vmul.f32 %v741_v37, %v741_v37 }
  0x97   :  { %v747_v44 = vsub.f32 %v25_v2, %v91_v40  ;;  %v749_v45 = vsub.f32 %v26_v5, %v92_v41  ;;  %v131_v46 = vsel %vm33_vm0, %v115_v42, 0.0  ;;  %v134_v49 = vsel %vm33_vm0, %v116_v43, 0.0 }
  0x98   :  { %132 = vadd.xlane.f32.xlu0 %v131_v46  ;;  %v42_v47 = vpop.xlane.xlu0 %41  ;;  %v66_v48 = vpop.xlane.xlu1 %65 }
  0x99   :  { %v85_v50 = vmul.f32 0.03125, %v42_v47  ;;  %v93_v51 = vmul.f32 0.03125, %v66_v48  ;;  %v123_v52 = vmul.f32 %v747_v44, %v747_v44  ;;  %v124_v53 = vmul.f32 %v749_v45, %v749_v45 }
  0x9b   :  { %v757_v54 = vsub.f32 %v19_v8, %v85_v50  ;;  %v759_v55 = vsub.f32 %v27_v9, %v93_v51  ;;  %v155_v56 = vsel %vm33_vm0, %v123_v52, 0.0  ;;  %v158_v59 = vsel %vm33_vm0, %v124_v53, 0.0  ;;  %v290_v53 = vld [vmem:[%s964_s3 + $0x8] sm:$0xff] }
  0x9c   :  { %135 = vadd.xlane.f32.xlu0 %v134_v49  ;;  %156 = vadd.xlane.f32.xlu1 %v155_v56  ;;  %v45_v57 = vpop.xlane.xlu0 %44  ;;  %v69_v58 = vpop.xlane.xlu1 %68 }
  0x9d   :  { %v86_v60 = vmul.f32 0.03125, %v45_v57  ;;  %v94_v61 = vmul.f32 0.03125, %v69_v58  ;;  %v117_v62 = vmul.f32 %v757_v54, %v757_v54  ;;  %v125_v63 = vmul.f32 %v759_v55, %v759_v55  ;;  %v291_v57 = vld [vmem:[%s964_s3 + $0x10] sm:$0xff]  ;;  %v292_v58 = vld [vmem:[%s964_s3 + $0x18] sm:$0xff] }
  0x9f   :  { %v768_v0 = vsub.f32 %v672_v12, %v86_v60  ;;  %v771_v1 = vsub.f32 %v677_v13, %v94_v61  ;;  %v137_v2 = vsel %vm33_vm0, %v117_v62, 0.0  ;;  %v161_v5 = vsel %vm33_vm0, %v125_v63, 0.0 }
  0xa0   :  { %159 = vadd.xlane.f32.xlu1 %v158_v59  ;;  %138 = vadd.xlane.f32.xlu0 %v137_v2  ;;  %v48_v3 = vpop.xlane.xlu0 %47  ;;  %v72_v4 = vpop.xlane.xlu1 %71  ;;  %v580_v59 = vpack.c.bf16 %v292_v58, %v291_v57 }
  0xa1   :  { %v87_v6 = vmul.f32 0.03125, %v48_v3  ;;  %v95_v7 = vmul.f32 0.03125, %v72_v4  ;;  %v118_v8 = vmul.f32 %v768_v0, %v768_v0  ;;  %v126_v9 = vmul.f32 %v771_v1, %v771_v1 }
  0xa3   :  { %v780_v10 = vsub.f32 %v686_v16, %v87_v6  ;;  %v783_v11 = vsub.f32 %v691_v17, %v95_v7  ;;  %v140_v12 = vsel %vm33_vm0, %v118_v8, 0.0  ;;  %v164_v15 = vsel %vm33_vm0, %v126_v9, 0.0 }
  0xa4   :  { %162 = vadd.xlane.f32.xlu1 %v161_v5  ;;  %141 = vadd.xlane.f32.xlu0 %v140_v12  ;;  %v51_v13 = vpop.xlane.xlu0 %50  ;;  %v75_v14 = vpop.xlane.xlu1 %74 }
  0xa5   :  { %v88_v18 = vmul.f32 0.03125, %v51_v13  ;;  %v96_v19 = vmul.f32 0.03125, %v75_v14  ;;  %v119_v22 = vmul.f32 %v780_v10, %v780_v10  ;;  %v127_v16 = vmul.f32 %v783_v11, %v783_v11 }
  0xa7   :  { %v792_v23 = vsub.f32 %v700_v20, %v88_v18  ;;  %v795_v17 = vsub.f32 %v705_v21, %v96_v19  ;;  %v143_v26 = vsel %vm33_vm0, %v119_v22, 0.0  ;;  %v167_v31 = vsel %vm33_vm0, %v127_v16, 0.0 }
  0xa8   :  { %165 = vadd.xlane.f32.xlu1 %v164_v15  ;;  %144 = vadd.xlane.f32.xlu0 %v143_v26  ;;  %v54_v27 = vpop.xlane.xlu0 %53  ;;  %v78_v30 = vpop.xlane.xlu1 %77 }
  0xa9   :  { %v89_v32 = vmul.f32 0.03125, %v54_v27  ;;  %v97_v33 = vmul.f32 0.03125, %v78_v30  ;;  %v120_v34 = vmul.f32 %v792_v23, %v792_v23  ;;  %v128_v20 = vmul.f32 %v795_v17, %v795_v17  ;;  %v844_v30 = vld [vmem:[%s965_s1] ss:$0 sm:$0xff] }
  0xab   :  { %v804_v35 = vsub.f32 %v714_v24, %v89_v32  ;;  %v807_v21 = vsub.f32 %v719_v25, %v97_v33  ;;  %v146_v38 = vsel %vm33_vm0, %v120_v34, 0.0  ;;  %v170_v41 = vsel %vm33_vm0, %v128_v20, 0.0 }
  0xac   :  { %168 = vadd.xlane.f32.xlu1 %v167_v31  ;;  %147 = vadd.xlane.f32.xlu0 %v146_v38  ;;  %v57_v39 = vpop.xlane.xlu0 %56  ;;  %v81_v40 = vpop.xlane.xlu1 %80  ;;  %v850_v38 = vld [vmem:[%s966_s2] ss:$0 sm:$0xff] }
  0xad   :  { %v90_v42 = vmul.f32 0.03125, %v57_v39  ;;  %v98_v43 = vmul.f32 0.03125, %v81_v40  ;;  %v121_v46 = vmul.f32 %v804_v35, %v804_v35  ;;  %v129_v24 = vmul.f32 %v807_v21, %v807_v21 }
  0xaf   :  { %v816_v47 = vsub.f32 %v728_v28, %v90_v42  ;;  %v819_v25 = vsub.f32 %v733_v29, %v98_v43  ;;  %v149_v48 = vsel %vm33_vm0, %v121_v46, 0.0  ;;  %v173_v49 = vsel %vm33_vm0, %v129_v24, 0.0  ;;  %v289_v29 = vld [vmem:[%s964_s3] sm:$0xff] }
  0xb0   :  { %171 = vadd.xlane.f32.xlu1 %v170_v41  ;;  %150 = vadd.xlane.f32.xlu0 %v149_v48  ;;  %v576_v56 = vpack.c.bf16 %v290_v53, %v289_v29 }
  0xb1   :  { %v122_v50 = vmul.f32 %v816_v47, %v816_v47  ;;  %v130_v51 = vmul.f32 %v819_v25, %v819_v25 }
  0xb2   :  { %577 = vmatprep.subr.bf16.mxu0 %v576_v56  ;;  %584 = vmatprep.subr.bf16.mxu1 %v576_v56 }
  0xb3   :  { %v152_v52 = vsel %vm33_vm0, %v122_v50, 0.0  ;;  %v176_v28 = vsel %vm33_vm0, %v130_v51, 0.0  ;;  %579 = vmatpush3.bf16.msra.mxu0 %v576_v56  ;;  %586 = vmatpush3.bf16.msra.mxu1 %v576_v56 }
  0xb4   :  { %174 = vadd.xlane.f32.xlu1 %v173_v49  ;;  %153 = vadd.xlane.f32.xlu0 %v152_v52 }
  0xb5   :  { %581 = vmatprep.subr.bf16.mxu0 %v580_v59  ;;  %585 = vmatprep.subr.bf16.mxu1 %v580_v59 }
  0xb7   :  { %583 = vmatpush3.bf16.msra.mxu0 %v580_v59  ;;  %587 = vmatpush3.bf16.msra.mxu1 %v580_v59 }
  0xb8   :  { %177 = vadd.xlane.f32.xlu1 %v176_v28 }
 0x125   :  { %v133_v60 = vpop.xlane.xlu0 %132 }
 0x126   :  { %v179_v61 = vmul.f32 0.03125, %v133_v60 }
 0x128   :  { %v195_v62 = vadd.f32 1e-05, %v179_v61 }
 0x129   :  { %v157_v63 = vpop.xlane.xlu1 %156  ;;  %v136_v2 = vpop.xlane.xlu0 %135 }
 0x12a   :  { %588 = vrsqrt.f32 %v195_v62  ;;  %v187_v3 = vmul.f32 0.03125, %v157_v63  ;;  %v180_v4 = vmul.f32 0.03125, %v136_v2 }
 0x12c   :  { %v203_v5 = vadd.f32 1e-05, %v187_v3  ;;  %v196_v6 = vadd.f32 1e-05, %v180_v4 }
 0x12d   :  { %v160_v7 = vpop.xlane.xlu1 %159  ;;  %v139_v8 = vpop.xlane.xlu0 %138 }
 0x12e   :  { %590 = vrsqrt.f32 %v203_v5  ;;  %v188_v9 = vmul.f32 0.03125, %v160_v7  ;;  %v181_v12 = vmul.f32 0.03125, %v139_v8 }
 0x12f   :  { %592 = vrsqrt.f32 %v196_v6 }
 0x130   :  { %v204_v13 = vadd.f32 1e-05, %v188_v9  ;;  %v197_v14 = vadd.f32 1e-05, %v181_v12 }
 0x131   :  { %v163_v15 = vpop.xlane.xlu1 %162  ;;  %v142_v18 = vpop.xlane.xlu0 %141 }
 0x132   :  { %594 = vrsqrt.f32 %v204_v13  ;;  %v189_v19 = vmul.f32 0.03125, %v163_v15  ;;  %v182_v22 = vmul.f32 0.03125, %v142_v18 }
 0x133   :  { %596 = vrsqrt.f32 %v197_v14 }
 0x134   :  { %v589_v16 = vpop.eup %588  ;;  %v205_v26 = vadd.f32 1e-05, %v189_v19  ;;  %v198_v27 = vadd.f32 1e-05, %v182_v22 }
 0x135   :  { %v166_v31 = vpop.xlane.xlu1 %165  ;;  %v145_v32 = vpop.xlane.xlu0 %144  ;;  %v227_v33 = vmul.f32 %v589_v16, %v739_v36 }
 0x136   :  { %598 = vrsqrt.f32 %v205_v26  ;;  %v190_v34 = vmul.f32 0.03125, %v166_v31  ;;  %v183_v20 = vmul.f32 0.03125, %v145_v32 }
 0x137   :  { %600 = vrsqrt.f32 %v198_v27  ;;  %v250_v39 = vmul.f32 %v844_v30, %v227_v33 }
 0x138   :  { %v591_v40 = vpop.eup %590  ;;  %v206_v41 = vadd.f32 1e-05, %v190_v34  ;;  %v199_v42 = vadd.f32 1e-05, %v183_v20 }
 0x139   :  { %v593_v43 = vpop.eup %592  ;;  %v169_v46 = vpop.xlane.xlu1 %168  ;;  %v273_v48 = vadd.f32 %v850_v38, %v250_v39  ;;  %v235_v36 = vmul.f32 %v591_v40, %v747_v44 }
 0x13a   :  { %v148_v24 = vpop.xlane.xlu0 %147  ;;  %602 = vrsqrt.f32 %v206_v41  ;;  %v191_v49 = vmul.f32 0.03125, %v169_v46  ;;  %v228_v51 = vmul.f32 %v593_v43, %v741_v37 }
 0x13b   :  { %v184_v50 = vmul.f32 0.03125, %v148_v24  ;;  %604 = vrsqrt.f32 %v199_v42  ;;  %552 = vmatprep.mubr.msk.f32.mxu0 %vm33_vm0, %v273_v48  ;;  %v258_v52 = vmul.f32 %v844_v30, %v235_v36 }
 0x13c   :  { %v595_v28 = vpop.eup %594  ;;  %v207_v29 = vadd.f32 1e-05, %v191_v49  ;;  %v251_v56 = vmul.f32 %v844_v30, %v228_v51 }
 0x13d   :  { %v200_v53 = vadd.f32 1e-05, %v184_v50  ;;  %v597_v57 = vpop.eup %596  ;;  %v172_v58 = vpop.xlane.xlu1 %171  ;;  %v281_v44 = vadd.f32 %v850_v38, %v258_v52  ;;  %v236_v60 = vmul.f32 %v595_v28, %v749_v45 }
 0x13e   :  { %v151_v59 = vpop.xlane.xlu0 %150  ;;  %606 = vrsqrt.f32 %v207_v29  ;;  %v192_v61 = vmul.f32 0.03125, %v172_v58  ;;  %v274_v62 = vadd.f32 %v850_v38, %v251_v56  ;;  %v229_v63 = vmul.f32 %v597_v57, %v757_v54 }
 0x13f   :  { %v185_v37 = vmul.f32 0.03125, %v151_v59  ;;  %608 = vrsqrt.f32 %v200_v53  ;;  %564 = vmatprep.mubr.msk.f32.mxu1 %vm33_vm0, %v281_v44  ;;  %v259_v2 = vmul.f32 %v844_v30, %v236_v60 }
 0x140   :  { %v599_v3 = vpop.eup %598  ;;  %v208_v4 = vadd.f32 1e-05, %v192_v61  ;;  %553 = vmatmul.mubr.msk.f32.vlgmr.msra.gmra.mrb[0].mxu0 %vm33_vm0, %v274_v62  ;;  %v252_v8 = vmul.f32 %v844_v30, %v229_v63 }
 0x141   :  { %v201_v5 = vadd.f32 1e-05, %v185_v37  ;;  %v601_v6 = vpop.eup %600  ;;  %v175_v7 = vpop.xlane.xlu1 %174  ;;  %v282_v9 = vadd.f32 %v850_v38, %v259_v2  ;;  %v237_v12 = vmul.f32 %v599_v3, %v759_v55 }
 0x142   :  { %v154_v45 = vpop.xlane.xlu0 %153  ;;  %610 = vrsqrt.f32 %v208_v4  ;;  %v193_v13 = vmul.f32 0.03125, %v175_v7  ;;  %v230_v54 = vmul.f32 %v601_v6, %v768_v0  ;;  %v275_v15 = vadd.f32 %v850_v38, %v252_v8 }
 0x143   :  { %v186_v14 = vmul.f32 0.03125, %v154_v45  ;;  %612 = vrsqrt.f32 %v201_v5  ;;  %565 = vmatmul.mubr.msk.f32.vlgmr.msra.gmra.mrb[0].mxu1 %vm33_vm0, %v282_v9  ;;  %v260_v18 = vmul.f32 %v844_v30, %v237_v12 }
 0x144   :  { %v603_v19 = vpop.eup %602  ;;  %v209_v22 = vadd.f32 1e-05, %v193_v13  ;;  %v253_v26 = vmul.f32 %v844_v30, %v230_v54  ;;  %555 = vmatprep.mubr.msk.f32.mxu0 %vm33_vm0, %v275_v15 }
 0x145   :  { %v202_v16 = vadd.f32 1e-05, %v186_v14  ;;  %v605_v27 = vpop.eup %604  ;;  %v178_v55 = vpop.xlane.xlu1 %177  ;;  %v283_v31 = vadd.f32 %v850_v38, %v260_v18  ;;  %v238_v0 = vmul.f32 %v603_v19, %v771_v1 }
 0x146   :  { %614 = vrsqrt.f32 %v209_v22  ;;  %v194_v32 = vmul.f32 0.03125, %v178_v55  ;;  %v276_v33 = vadd.f32 %v850_v38, %v253_v26  ;;  %v231_v34 = vmul.f32 %v605_v27, %v780_v10 }
 0x147   :  { %616 = vrsqrt.f32 %v202_v16  ;;  %567 = vmatprep.mubr.msk.f32.mxu1 %vm33_vm0, %v283_v31  ;;  %v261_v20 = vmul.f32 %v844_v30, %v238_v0 }
 0x148   :  { %v607_v39 = vpop.eup %606  ;;  %v210_v40 = vadd.f32 1e-05, %v194_v32  ;;  %556 = vmatmul.mubr.msk.f32.gmra.mrb[2].mxu0 %vm33_vm0, %v276_v33  ;;  %v254_v41 = vmul.f32 %v844_v30, %v231_v34 }
 0x149   :  { %v609_v42 = vpop.eup %608  ;;  %v284_v1 = vadd.f32 %v850_v38, %v261_v20  ;;  %v239_v43 = vmul.f32 %v607_v39, %v783_v11 }
 0x14a   :  { %618 = vrsqrt.f32 %v210_v40  ;;  %v277_v46 = vadd.f32 %v850_v38, %v254_v41  ;;  %v232_v10 = vmul.f32 %v609_v42, %v792_v23 }
 0x14b   :  { %568 = vmatmul.mubr.msk.f32.gmra.mrb[2].mxu1 %vm33_vm0, %v284_v1  ;;  %v262_v24 = vmul.f32 %v844_v30, %v239_v43 }
 0x14c   :  { %v611_v48 = vpop.eup %610  ;;  %558 = vmatprep.mubr.msk.f32.mxu0 %vm33_vm0, %v277_v46  ;;  %v255_v36 = vmul.f32 %v844_v30, %v232_v10 }
 0x14d   :  { %v613_v49 = vpop.eup %612  ;;  %v285_v50 = vadd.f32 %v850_v38, %v262_v24  ;;  %v240_v51 = vmul.f32 %v611_v48, %v795_v17 }
 0x14e   :  { %v278_v11 = vadd.f32 %v850_v38, %v255_v36  ;;  %v233_v52 = vmul.f32 %v613_v49, %v804_v35 }
 0x14f   :  { %570 = vmatprep.mubr.msk.f32.mxu1 %vm33_vm0, %v285_v50  ;;  %v263_v23 = vmul.f32 %v844_v30, %v240_v51 }
 0x150   :  { %v615_v28 = vpop.eup %614  ;;  %559 = vmatmul.mubr.msk.f32.gmra.mrb[4].mxu0 %vm33_vm0, %v278_v11  ;;  %v256_v29 = vmul.f32 %v844_v30, %v233_v52 }
 0x151   :  { %v617_v53 = vpop.eup %616  ;;  %v286_v56 = vadd.f32 %v850_v38, %v263_v23  ;;  %v241_v57 = vmul.f32 %v615_v28, %v807_v21 }
 0x152   :  { %v279_v17 = vadd.f32 %v850_v38, %v256_v29  ;;  %v234_v58 = vmul.f32 %v617_v53, %v816_v47 }
 0x153   :  { %571 = vmatmul.mubr.msk.f32.gmra.mrb[4].mxu1 %vm33_vm0, %v286_v56  ;;  %v264_v35 = vmul.f32 %v844_v30, %v241_v57 }
 0x154   :  { %v619_v59 = vpop.eup %618  ;;  %561 = vmatprep.mubr.msk.f32.mxu0 %vm33_vm0, %v279_v17  ;;  %v257_v44 = vmul.f32 %v844_v30, %v234_v58 }
 0x155   :  { %v287_v60 = vadd.f32 %v850_v38, %v264_v35  ;;  %v242_v61 = vmul.f32 %v619_v59, %v819_v25 }
 0x156   :  { %v280_v37 = vadd.f32 %v850_v38, %v257_v44 }
 0x157   :  { %573 = vmatprep.mubr.msk.f32.mxu1 %vm33_vm0, %v287_v60  ;;  %v265_v21 = vmul.f32 %v844_v30, %v242_v61 }
 0x158   :  { %562 = vmatmul.mubr.msk.f32.gmra.mrb[6].mxu0 %vm33_vm0, %v280_v37 }
 0x159   :  { %v288_v47 = vadd.f32 %v850_v38, %v265_v21 }
 0x15b   :  { %574 = vmatmul.mubr.msk.f32.gmra.mrb[6].mxu1 %vm33_vm0, %v288_v47 }
 0x213   :  { %v554_v62 = vpop.f32.mrb[0].mxu0 }
 0x214   :  { %487 = vst [vmem:[%s967_s4 + $0x8] sm:$0xff] %v554_v62  ;;  %v407_v63 = vpop.f32.mrb[1].mxu0 }
 0x215   :  { %486 = vst [vmem:[%s967_s4] sm:$0xff] %v407_v63 }
 0x216   :  { %v566_v25 = vpop.f32.mrb[0].mxu1 }
 0x217   :  { %495 = vst [vmem:[%s967_s4 + $0x48] sm:$0xff] %v566_v25  ;;  %v447_v30 = vpop.f32.mrb[1].mxu1 }
 0x218   :  { %494 = vst [vmem:[%s967_s4 + $0x40] sm:$0xff] %v447_v30 }
 0x21b   :  { %v557_v38 = vpop.f32.mrb[2].mxu0 }
 0x21c   :  { %489 = vst [vmem:[%s967_s4 + $0x18] sm:$0xff] %v557_v38  ;;  %v417_v2 = vpop.f32.mrb[3].mxu0 }
 0x21d   :  { %488 = vst [vmem:[%s967_s4 + $0x10] sm:$0xff] %v417_v2 }
 0x21e   :  { %v569_v3 = vpop.f32.mrb[2].mxu1 }
 0x21f   :  { %497 = vst [vmem:[%s967_s4 + $0x58] sm:$0xff] %v569_v3  ;;  %v457_v4 = vpop.f32.mrb[3].mxu1 }
 0x220   :  { %496 = vst [vmem:[%s967_s4 + $0x50] sm:$0xff] %v457_v4 }
 0x223   :  { %v560_v5 = vpop.f32.mrb[4].mxu0 }
 0x224   :  { %491 = vst [vmem:[%s967_s4 + $0x28] sm:$0xff] %v560_v5  ;;  %v427_v6 = vpop.f32.mrb[5].mxu0 }
 0x225   :  { %490 = vst [vmem:[%s967_s4 + $0x20] sm:$0xff] %v427_v6 }
 0x226   :  { %v572_v7 = vpop.f32.mrb[4].mxu1 }
 0x227   :  { %499 = vst [vmem:[%s967_s4 + $0x68] sm:$0xff] %v572_v7  ;;  %v467_v45 = vpop.f32.mrb[5].mxu1 }
 0x228   :  { %498 = vst [vmem:[%s967_s4 + $0x60] sm:$0xff] %v467_v45 }
 0x22b   :  { %v563_v8 = vpop.f32.mrb[6].mxu0 }
 0x22c   :  { %493 = vst [vmem:[%s967_s4 + $0x38] sm:$0xff] %v563_v8  ;;  %v437_v9 = vpop.f32.mrb[7].mxu0 }
 0x22d   :  { %492 = vst [vmem:[%s967_s4 + $0x30] sm:$0xff] %v437_v9 }
 0x22e   :  { %v575_v12 = vpop.f32.mrb[6].mxu1 }
 0x22f   :  { %501 = vst [vmem:[%s967_s4 + $0x78] sm:$0xff] %v575_v12  ;;  %v477_v13 = vpop.f32.mrb[7].mxu1 }
 0x230   :  { %500 = vst [vmem:[%s967_s4 + $0x70] sm:$0xff] %v477_v13 }

// kernel: vss_layer_forward.8
= control target key start
LH: loop header
LB: loop body
LE: loop exit
PB: predicated region body
PF: predicated region fallthrough
CT: control target
= control target key end

     0   :  { %vm39_vm0 = vcmask 523264   ;;  %vm672_vm1 = vcmask 261120   ;;  %s1476_s0 = inlined_call_operand.vmem [shape: f32[128,64], index: 0, kind: input, shape index: {}]   ;;  %s1477_s5 = inlined_call_operand.vmem [shape: f32[64,32], index: 5, kind: input, shape index: {}]   ;;  %s1478_s1 = inlined_call_operand.vmem [shape: f32[128,64], index: 1, kind: input, shape index: {}]   ;;  %s1479_s3 = inlined_call_operand.vmem [shape: f32[1,64], index: 3, kind: input, shape index: {}]   ;;  %s1480_s4 = inlined_call_operand.vmem [shape: f32[1,64], index: 4, kind: input, shape index: {}]   ;;  %s1481_s2 = inlined_call_operand.vmem [shape: f32[128,32], index: 2, kind: input, shape index: {}]   ;;  %s1482_s6 = inlined_call_operand.vmem [shape: f32[128,32], index: 6, kind: output, shape index: {}]  }
   0x1   :  { %v23_v0 = vld [vmem:[%s1476_s0] sm:$0xff]  ;;  %v24_v1 = vld [vmem:[%s1476_s0 + $0x8] sm:$0xff]  ;;  %v25_v8 = vld [vmem:[%s1476_s0 + $0x10] sm:$0xff] }
   0x2   :  { %v31_v2 = vld [vmem:[%s1476_s0 + $0x40] sm:$0xff]  ;;  %v40_v3 = vsel %vm39_vm0, %v23_v0, 0.0  ;;  %v43_v4 = vsel %vm39_vm0, %v24_v1, 0.0  ;;  %v32_v5 = vld [vmem:[%s1476_s0 + $0x48] sm:$0xff]  ;;  %v33_v9 = vld [vmem:[%s1476_s0 + $0x50] sm:$0xff]  ;;  %v46_v10 = vsel %vm39_vm0, %v25_v8, 0.0 }
   0x3   :  { %41 = vadd.xlane.f32.xlu0 %v40_v3  ;;  %44 = vadd.xlane.f32.xlu1 %v43_v4  ;;  %v64_v6 = vsel %vm39_vm0, %v31_v2, 0.0  ;;  %v67_v7 = vsel %vm39_vm0, %v32_v5, 0.0  ;;  %v70_v11 = vsel %vm39_vm0, %v33_v9, 0.0  ;;  %v973_v12 = vld [vmem:[%s1476_s0 + $0x18] sm:$0xff]  ;;  %v987_v16 = vld [vmem:[%s1476_s0 + $0x20] sm:$0xff]  ;;  %v1001_v20 = vld [vmem:[%s1476_s0 + $0x28] sm:$0xff] }
   0x4   :  { %v978_v13 = vld [vmem:[%s1476_s0 + $0x58] sm:$0xff]  ;;  %v49_v14 = vsel %vm39_vm0, %v973_v12, 0.0  ;;  %v992_v17 = vld [vmem:[%s1476_s0 + $0x60] sm:$0xff]  ;;  %v52_v18 = vsel %vm39_vm0, %v987_v16, 0.0  ;;  %v1006_v21 = vld [vmem:[%s1476_s0 + $0x68] sm:$0xff]  ;;  %v55_v22 = vsel %vm39_vm0, %v1001_v20, 0.0 }
   0x5   :  { %v73_v15 = vsel %vm39_vm0, %v978_v13, 0.0  ;;  %v76_v19 = vsel %vm39_vm0, %v992_v17, 0.0  ;;  %v79_v23 = vsel %vm39_vm0, %v1006_v21, 0.0  ;;  %v1015_v24 = vld [vmem:[%s1476_s0 + $0x30] sm:$0xff]  ;;  %v1029_v28 = vld [vmem:[%s1476_s0 + $0x38] sm:$0xff] }
   0x6   :  { %v1020_v25 = vld [vmem:[%s1476_s0 + $0x70] sm:$0xff]  ;;  %v58_v26 = vsel %vm39_vm0, %v1015_v24, 0.0  ;;  %v1034_v29 = vld [vmem:[%s1476_s0 + $0x78] sm:$0xff]  ;;  %v61_v30 = vsel %vm39_vm0, %v1029_v28, 0.0 }
   0x7   :  { %65 = vadd.xlane.f32.xlu0 %v64_v6  ;;  %68 = vadd.xlane.f32.xlu1 %v67_v7  ;;  %v82_v27 = vsel %vm39_vm0, %v1020_v25, 0.0  ;;  %v85_v31 = vsel %vm39_vm0, %v1034_v29, 0.0 }
   0xb   :  { %47 = vadd.xlane.f32.xlu0 %v46_v10  ;;  %71 = vadd.xlane.f32.xlu1 %v70_v11 }
   0xf   :  { %50 = vadd.xlane.f32.xlu0 %v49_v14  ;;  %74 = vadd.xlane.f32.xlu1 %v73_v15 }
  0x13   :  { %53 = vadd.xlane.f32.xlu0 %v52_v18  ;;  %77 = vadd.xlane.f32.xlu1 %v76_v19 }
  0x17   :  { %56 = vadd.xlane.f32.xlu0 %v55_v22  ;;  %80 = vadd.xlane.f32.xlu1 %v79_v23 }
  0x1b   :  { %59 = vadd.xlane.f32.xlu0 %v58_v26  ;;  %83 = vadd.xlane.f32.xlu1 %v82_v27 }
  0x1f   :  { %62 = vadd.xlane.f32.xlu0 %v61_v30  ;;  %86 = vadd.xlane.f32.xlu1 %v85_v31 }
  0x90   :  { %v42_v32 = vpop.xlane.xlu0 %41  ;;  %v45_v33 = vpop.xlane.xlu1 %44 }
  0x91   :  { %v89_v34 = vmul.f32 0.015625, %v42_v32  ;;  %v90_v35 = vmul.f32 0.015625, %v45_v33 }
  0x93   :  { %v1040_v36 = vsub.f32 %v23_v0, %v89_v34  ;;  %v1042_v37 = vsub.f32 %v24_v1, %v90_v35 }
  0x94   :  { %v66_v38 = vpop.xlane.xlu0 %65  ;;  %v69_v39 = vpop.xlane.xlu1 %68 }
  0x95   :  { %v97_v40 = vmul.f32 0.015625, %v66_v38  ;;  %v98_v41 = vmul.f32 0.015625, %v69_v39  ;;  %v121_v42 = vmul.f32 %v1040_v36, %v1040_v36  ;;  %v122_v43 = vmul.f32 %v1042_v37, %v1042_v37 }
  0x97   :  { %v1048_v44 = vsub.f32 %v31_v2, %v97_v40  ;;  %v1050_v45 = vsub.f32 %v32_v5, %v98_v41  ;;  %v137_v46 = vsel %vm39_vm0, %v121_v42, 0.0  ;;  %v140_v49 = vsel %vm39_vm0, %v122_v43, 0.0 }
  0x98   :  { %138 = vadd.xlane.f32.xlu0 %v137_v46  ;;  %v48_v47 = vpop.xlane.xlu0 %47  ;;  %v72_v48 = vpop.xlane.xlu1 %71 }
  0x99   :  { %v91_v50 = vmul.f32 0.015625, %v48_v47  ;;  %v99_v51 = vmul.f32 0.015625, %v72_v48  ;;  %v129_v52 = vmul.f32 %v1048_v44, %v1048_v44  ;;  %v130_v53 = vmul.f32 %v1050_v45, %v1050_v45 }
  0x9b   :  { %v1058_v54 = vsub.f32 %v25_v8, %v91_v50  ;;  %v1060_v55 = vsub.f32 %v33_v9, %v99_v51  ;;  %v161_v56 = vsel %vm39_vm0, %v129_v52, 0.0  ;;  %v164_v59 = vsel %vm39_vm0, %v130_v53, 0.0  ;;  %v456_v50 = vld [vmem:[%s1477_s5 + $0x8] sm:$0xff] }
  0x9c   :  { %141 = vadd.xlane.f32.xlu0 %v140_v49  ;;  %162 = vadd.xlane.f32.xlu1 %v161_v56  ;;  %v51_v57 = vpop.xlane.xlu0 %50  ;;  %v75_v58 = vpop.xlane.xlu1 %74  ;;  %v455_v49 = vld [vmem:[%s1477_s5] sm:$0xff]  ;;  %v457_v56 = vld [vmem:[%s1477_s5 + $0x10] sm:$0xff] }
  0x9d   :  { %v92_v60 = vmul.f32 0.015625, %v51_v57  ;;  %v100_v61 = vmul.f32 0.015625, %v75_v58  ;;  %v123_v62 = vmul.f32 %v1058_v54, %v1058_v54  ;;  %v131_v63 = vmul.f32 %v1060_v55, %v1060_v55  ;;  %v458_v57 = vld [vmem:[%s1477_s5 + $0x18] sm:$0xff] }
  0x9e   :  { %v791_v51 = vpack.c.bf16 %v456_v50, %v455_v49  ;;  %v795_v58 = vpack.c.bf16 %v458_v57, %v457_v56  ;;  %v1228_v50 = vld [vmem:[%s1478_s1 + $0x68] sm:$0xff] }
  0x9f   :  { %v1069_v0 = vsub.f32 %v973_v12, %v92_v60  ;;  %v1072_v1 = vsub.f32 %v978_v13, %v100_v61  ;;  %v143_v2 = vsel %vm39_vm0, %v123_v62, 0.0  ;;  %v167_v5 = vsel %vm39_vm0, %v131_v63, 0.0  ;;  %v459_v60 = vld [vmem:[%s1477_s5 + $0x20] sm:$0xff]  ;;  %v460_v61 = vld [vmem:[%s1477_s5 + $0x28] sm:$0xff]  ;;  %v461_v63 = vld [vmem:[%s1477_s5 + $0x30] sm:$0xff] }
  0xa0   :  { %165 = vadd.xlane.f32.xlu1 %v164_v59  ;;  %144 = vadd.xlane.f32.xlu0 %v143_v2  ;;  %v54_v3 = vpop.xlane.xlu0 %53  ;;  %v78_v4 = vpop.xlane.xlu1 %77  ;;  %v799_v62 = vpack.c.bf16 %v460_v61, %v459_v60  ;;  %v462_v2 = vld [vmem:[%s1477_s5 + $0x38] sm:$0xff] }
  0xa1   :  { %v93_v6 = vmul.f32 0.015625, %v54_v3  ;;  %v101_v7 = vmul.f32 0.015625, %v78_v4  ;;  %v124_v8 = vmul.f32 %v1069_v0, %v1069_v0  ;;  %v132_v9 = vmul.f32 %v1072_v1, %v1072_v1  ;;  %792 = vmatprep.subr.bf16.mxu0 %v791_v51  ;;  %807 = vmatprep.subr.bf16.mxu1 %v791_v51  ;;  %v1157_v4 = vld [vmem:[%s1478_s1] sm:$0xff] }
  0xa2   :  { %794 = vmatpush3.bf16.msra.mxu0 %v791_v51  ;;  %811 = vmatpush3.bf16.msra.mxu1 %v791_v51  ;;  %v803_v3 = vpack.c.bf16 %v462_v2, %v461_v63 }
  0xa3   :  { %v1081_v10 = vsub.f32 %v987_v16, %v93_v6  ;;  %v1084_v11 = vsub.f32 %v992_v17, %v101_v7  ;;  %v146_v12 = vsel %vm39_vm0, %v124_v8, 0.0  ;;  %v170_v15 = vsel %vm39_vm0, %v132_v9, 0.0  ;;  %796 = vmatprep.subr.bf16.mxu0 %v795_v58  ;;  %808 = vmatprep.subr.bf16.mxu1 %v795_v58  ;;  %v1168_v7 = vld [vmem:[%s1478_s1 + $0x8] sm:$0xff] }
  0xa4   :  { %168 = vadd.xlane.f32.xlu1 %v167_v5  ;;  %147 = vadd.xlane.f32.xlu0 %v146_v12  ;;  %v57_v13 = vpop.xlane.xlu0 %56  ;;  %v81_v14 = vpop.xlane.xlu1 %80  ;;  %v1162_v5 = vld [vmem:[%s1478_s1 + $0x40] sm:$0xff]  ;;  %v695_v6 = vmul.f32 -1.442695, %v1157_v4  ;;  %v696_v9 = vmul.f32 -1.442695, %v1168_v7  ;;  %v1175_v12 = vld [vmem:[%s1478_s1 + $0x48] sm:$0xff] }
  0xa5   :  { %v94_v18 = vmul.f32 0.015625, %v57_v13  ;;  %v102_v19 = vmul.f32 0.015625, %v81_v14  ;;  %v125_v22 = vmul.f32 %v1081_v10, %v1081_v10  ;;  %v133_v16 = vmul.f32 %v1084_v11, %v1084_v11  ;;  %v1180_v13 = vld [vmem:[%s1478_s1 + $0x10] sm:$0xff] }
  0xa6   :  { %798 = vmatpush3.bf16.msra.mxu0 %v795_v58  ;;  %812 = vmatpush3.bf16.msra.mxu1 %v795_v58  ;;  %v703_v8 = vmul.f32 -1.442695, %v1162_v5  ;;  %815 = vpow2.f32 %v695_v6  ;;  %v704_v14 = vmul.f32 -1.442695, %v1175_v12  ;;  %v1235_v58 = vld [vmem:[%s1478_s1 + $0x38] sm:$0xff] }
  0xa7   :  { %v1093_v23 = vsub.f32 %v1001_v20, %v94_v18  ;;  %v1096_v17 = vsub.f32 %v1006_v21, %v102_v19  ;;  %v149_v26 = vsel %vm39_vm0, %v125_v22, 0.0  ;;  %v173_v31 = vsel %vm39_vm0, %v133_v16, 0.0  ;;  %800 = vmatprep.subr.bf16.mxu0 %v799_v62  ;;  %809 = vmatprep.subr.bf16.mxu1 %v799_v62  ;;  %v1187_v18 = vld [vmem:[%s1478_s1 + $0x18] sm:$0xff]  ;;  %v1192_v19 = vld [vmem:[%s1478_s1 + $0x50] sm:$0xff]  ;;  %v1198_v16 = vld [vmem:[%s1478_s1 + $0x20] sm:$0xff] }
  0xa8   :  { %171 = vadd.xlane.f32.xlu1 %v170_v15  ;;  %150 = vadd.xlane.f32.xlu0 %v149_v26  ;;  %v60_v27 = vpop.xlane.xlu0 %59  ;;  %v84_v30 = vpop.xlane.xlu1 %83  ;;  %817 = vpow2.f32 %v703_v8  ;;  %v697_v15 = vmul.f32 -1.442695, %v1180_v13  ;;  %v698_v22 = vmul.f32 -1.442695, %v1187_v18  ;;  %v705_v26 = vmul.f32 -1.442695, %v1192_v19 }
  0xa9   :  { %v95_v32 = vmul.f32 0.015625, %v60_v27  ;;  %v103_v33 = vmul.f32 0.015625, %v84_v30  ;;  %v126_v34 = vmul.f32 %v1093_v23, %v1093_v23  ;;  %v134_v20 = vmul.f32 %v1096_v17, %v1096_v17 }
  0xaa   :  { %802 = vmatpush3.bf16.msra.mxu0 %v799_v62  ;;  %813 = vmatpush3.bf16.msra.mxu1 %v799_v62  ;;  %819 = vpow2.f32 %v696_v9  ;;  %v699_v30 = vmul.f32 -1.442695, %v1198_v16  ;;  %v702_v63 = vmul.f32 -1.442695, %v1235_v58  ;;  %v1241_v9 = vld [vmem:[%s1478_s1 + $0x70] sm:$0xff] }
  0xab   :  { %v1105_v35 = vsub.f32 %v1015_v24, %v95_v32  ;;  %v1108_v21 = vsub.f32 %v1020_v25, %v103_v33  ;;  %v152_v38 = vsel %vm39_vm0, %v126_v34, 0.0  ;;  %v176_v41 = vsel %vm39_vm0, %v134_v20, 0.0  ;;  %804 = vmatprep.subr.bf16.mxu0 %v803_v3  ;;  %810 = vmatprep.subr.bf16.mxu1 %v803_v3 }
  0xac   :  { %174 = vadd.xlane.f32.xlu1 %v173_v31  ;;  %153 = vadd.xlane.f32.xlu0 %v152_v38  ;;  %v63_v39 = vpop.xlane.xlu0 %62  ;;  %v87_v40 = vpop.xlane.xlu1 %86  ;;  %821 = vpow2.f32 %v704_v14  ;;  %v1205_v31 = vld [vmem:[%s1478_s1 + $0x58] sm:$0xff]  ;;  %v1211_v38 = vld [vmem:[%s1478_s1 + $0x28] sm:$0xff] }
  0xad   :  { %v96_v42 = vmul.f32 0.015625, %v63_v39  ;;  %v104_v43 = vmul.f32 0.015625, %v87_v40  ;;  %v127_v46 = vmul.f32 %v1105_v35, %v1105_v35  ;;  %v135_v24 = vmul.f32 %v1108_v21, %v1108_v21  ;;  %v1216_v40 = vld [vmem:[%s1478_s1 + $0x60] sm:$0xff] }
  0xae   :  { %806 = vmatpush3.bf16.msra.mxu0 %v803_v3  ;;  %814 = vmatpush3.bf16.msra.mxu1 %v803_v3  ;;  %823 = vpow2.f32 %v697_v15  ;;  %v706_v20 = vmul.f32 -1.442695, %v1205_v31 }
  0xaf   :  { %v1117_v47 = vsub.f32 %v1029_v28, %v96_v42  ;;  %v1120_v25 = vsub.f32 %v1034_v29, %v104_v43  ;;  %v155_v48 = vsel %vm39_vm0, %v127_v46, 0.0  ;;  %v179_v52 = vsel %vm39_vm0, %v135_v24, 0.0 }
  0xb0   :  { %177 = vadd.xlane.f32.xlu1 %v176_v41  ;;  %156 = vadd.xlane.f32.xlu0 %v155_v48  ;;  %v816_v27 = vpop.eup %815  ;;  %825 = vpow2.f32 %v698_v22  ;;  %v700_v46 = vmul.f32 -1.442695, %v1211_v38  ;;  %v707_v24 = vmul.f32 -1.442695, %v1216_v40  ;;  %v1223_v48 = vld [vmem:[%s1478_s1 + $0x30] sm:$0xff] }
  0xb1   :  { %v128_v28 = vmul.f32 %v1117_v47, %v1117_v47  ;;  %v136_v29 = vmul.f32 %v1120_v25, %v1120_v25  ;;  %827 = vpow2.f32 %v705_v26  ;;  %v359_v34 = vadd.f32 1.0, %v816_v27 }
  0xb2   :  { %v818_v32 = vpop.eup %817  ;;  %829 = vpow2.f32 %v699_v30 }
  0xb3   :  { %v158_v53 = vsel %vm39_vm0, %v128_v28, 0.0  ;;  %v182_v59 = vsel %vm39_vm0, %v136_v29, 0.0  ;;  %v367_v39 = vadd.f32 1.0, %v818_v32  ;;  %831 = vrcp.f32 %v359_v34 }
  0xb4   :  { %180 = vadd.xlane.f32.xlu1 %v179_v52  ;;  %159 = vadd.xlane.f32.xlu0 %v158_v53  ;;  %v820_v33 = vpop.eup %819  ;;  %833 = vpow2.f32 %v706_v20  ;;  %v701_v28 = vmul.f32 -1.442695, %v1223_v48  ;;  %v708_v53 = vmul.f32 -1.442695, %v1228_v50 }
  0xb5   :  { %v360_v42 = vadd.f32 1.0, %v820_v33  ;;  %835 = vrcp.f32 %v367_v39  ;;  %v709_v33 = vmul.f32 -1.442695, %v1241_v9 }
  0xb6   :  { %v822_v41 = vpop.eup %821 }
  0xb7   :  { %v368_v49 = vadd.f32 1.0, %v822_v41  ;;  %837 = vrcp.f32 %v360_v42 }
  0xb8   :  { %183 = vadd.xlane.f32.xlu1 %v182_v59  ;;  %v824_v43 = vpop.eup %823  ;;  %839 = vpow2.f32 %v700_v46 }
  0xb9   :  { %v361_v52 = vadd.f32 1.0, %v824_v43  ;;  %841 = vpow2.f32 %v707_v24 }
  0xba   :  { %v826_v51 = vpop.eup %825  ;;  %843 = vrcp.f32 %v368_v49 }
  0xbb   :  { %v828_v29 = vpop.eup %827  ;;  %v362_v57 = vadd.f32 1.0, %v826_v51  ;;  %845 = vrcp.f32 %v361_v52 }
  0xbc   :  { %v830_v59 = vpop.eup %829  ;;  %v369_v61 = vadd.f32 1.0, %v828_v29  ;;  %847 = vpow2.f32 %v701_v28 }
  0xbd   :  { %849 = vpow2.f32 %v708_v53  ;;  %v832_v2 = vpop.eup %831  ;;  %v363_v8 = vadd.f32 1.0, %v830_v59  ;;  %v1247_v59 = vld [vmem:[%s1478_s1 + $0x78] sm:$0xff] }
  0xbe   :  { %851 = vrcp.f32 %v362_v57  ;;  %v834_v14 = vpop.eup %833 }
  0xbf   :  { %v836_v26 = vpop.eup %835  ;;  %v370_v41 = vadd.f32 1.0, %v834_v14 }
  0xc1   :  { %v838_v27 = vpop.eup %837 }
  0xc2   :  { %v840_v34 = vpop.eup %839 }
  0xc3   :  { %v842_v42 = vpop.eup %841  ;;  %v364_v28 = vadd.f32 1.0, %v840_v34  ;;  %v407_v34 = vmul.f32 %v832_v2, %v1157_v4  ;;  %v408_v4 = vmul.f32 %v838_v27, %v1168_v7 }
  0xc4   :  { %v844_v24 = vpop.eup %843  ;;  %v371_v57 = vadd.f32 1.0, %v842_v42 }
  0xc5   :  { %v846_v49 = vpop.eup %845  ;;  %v1268_v2 = vmul.f32 %v844_v24, %v1175_v12 }
  0xc6   :  { %v848_v29 = vpop.eup %847 }
 0x125   :  { %v139_v56 = vpop.xlane.xlu0 %138 }
 0x126   :  { %v185_v60 = vmul.f32 0.015625, %v139_v56 }
 0x128   :  { %v201_v62 = vadd.f32 1e-05, %v185_v60  ;;  %v850_v60 = vpop.eup %849 }
 0x129   :  { %v163_v3 = vpop.xlane.xlu1 %162  ;;  %v142_v6 = vpop.xlane.xlu0 %141 }
 0x12a   :  { %853 = vrsqrt.f32 %v201_v62  ;;  %v193_v15 = vmul.f32 0.015625, %v163_v3  ;;  %v186_v22 = vmul.f32 0.015625, %v142_v6  ;;  %v1252_v3 = vld [vmem:[%s1479_s3] ss:$0 sm:$0xff] }
 0x12b   :  { %855 = vrcp.f32 %v369_v61 }
 0x12c   :  { %v209_v30 = vadd.f32 1e-05, %v193_v15  ;;  %v202_v32 = vadd.f32 1e-05, %v186_v22  ;;  %857 = vpow2.f32 %v702_v63  ;;  %v852_v63 = vpop.eup %851  ;;  %v710_v15 = vmul.f32 -1.442695, %v1247_v59 }
 0x12d   :  { %v166_v20 = vpop.xlane.xlu1 %165  ;;  %v145_v39 = vpop.xlane.xlu0 %144  ;;  %859 = vrcp.f32 %v363_v8 }
 0x12e   :  { %861 = vrsqrt.f32 %v209_v30  ;;  %v194_v43 = vmul.f32 0.015625, %v166_v20  ;;  %v187_v46 = vmul.f32 0.015625, %v145_v39  ;;  %v365_v20 = vadd.f32 1.0, %v848_v29 }
 0x12f   :  { %863 = vrsqrt.f32 %v202_v32 }
 0x130   :  { %v210_v51 = vadd.f32 1e-05, %v194_v43  ;;  %v203_v52 = vadd.f32 1e-05, %v187_v46  ;;  %865 = vpow2.f32 %v709_v33  ;;  %v1260_v43 = vld [vmem:[%s1480_s4] ss:$0 sm:$0xff]  ;;  %v415_v46 = vmul.f32 %v836_v26, %v1162_v5 }
 0x131   :  { %v169_v53 = vpop.xlane.xlu1 %168  ;;  %v148_v56 = vpop.xlane.xlu0 %147  ;;  %867 = vrcp.f32 %v370_v41 }
 0x132   :  { %869 = vrsqrt.f32 %v210_v51  ;;  %v195_v61 = vmul.f32 0.015625, %v169_v53  ;;  %v188_v62 = vmul.f32 0.015625, %v148_v56  ;;  %v1271_v53 = vmul.f32 %v846_v49, %v1180_v13 }
 0x133   :  { %871 = vrsqrt.f32 %v203_v52 }
 0x134   :  { %v854_v6 = vpop.eup %853  ;;  %v211_v8 = vadd.f32 1e-05, %v195_v61  ;;  %v204_v14 = vadd.f32 1e-05, %v188_v62  ;;  %873 = vrcp.f32 %v364_v28  ;;  %v372_v62 = vadd.f32 1.0, %v850_v60 }
 0x135   :  { %v856_v22 = vpop.eup %855  ;;  %v172_v30 = vpop.xlane.xlu1 %171  ;;  %v233_v33 = vmul.f32 %v854_v6, %v1040_v36  ;;  %875 = vrcp.f32 %v371_v57 }
 0x136   :  { %v151_v32 = vpop.xlane.xlu0 %150  ;;  %v858_v39 = vpop.eup %857  ;;  %877 = vrsqrt.f32 %v211_v8  ;;  %v196_v41 = vmul.f32 0.015625, %v172_v30  ;;  %v1280_v8 = vmul.f32 %v852_v63, %v1187_v18  ;;  %v417_v30 = vmul.f32 %v856_v22, %v1192_v19 }
 0x137   :  { %v189_v42 = vmul.f32 0.015625, %v151_v32  ;;  %v1263_v51 = vpop.eup %859  ;;  %879 = vrsqrt.f32 %v204_v14  ;;  %v256_v36 = vmul.f32 %v1252_v3, %v233_v33 }
 0x138   :  { %v862_v52 = vpop.eup %861  ;;  %v212_v28 = vadd.f32 1e-05, %v196_v41  ;;  %881 = vpow2.f32 %v710_v15  ;;  %v366_v41 = vadd.f32 1.0, %v858_v39 }
 0x139   :  { %v205_v29 = vadd.f32 1e-05, %v189_v42  ;;  %v864_v56 = vpop.eup %863  ;;  %v175_v57 = vpop.xlane.xlu1 %174  ;;  %v279_v26 = vadd.f32 %v1260_v43, %v256_v36  ;;  %v241_v61 = vmul.f32 %v862_v52, %v1048_v44  ;;  %883 = vrcp.f32 %v365_v20 }
 0x13a   :  { %v154_v5 = vpop.xlane.xlu0 %153  ;;  %v866_v7 = vpop.eup %865  ;;  %v234_v12 = vmul.f32 %v864_v56, %v1042_v37  ;;  %885 = vrsqrt.f32 %v212_v28  ;;  %v197_v27 = vmul.f32 0.015625, %v175_v57 }
 0x13b   :  { %v190_v24 = vmul.f32 0.015625, %v154_v5  ;;  %v1276_v6 = vpop.eup %867  ;;  %887 = vrsqrt.f32 %v205_v29  ;;  %v423_v13 = vmul.f32 %v407_v34, %v279_v26  ;;  %v264_v49 = vmul.f32 %v1252_v3, %v241_v61 }
 0x13c   :  { %v870_v14 = vpop.eup %869  ;;  %v213_v15 = vadd.f32 1e-05, %v197_v27  ;;  %v257_v60 = vmul.f32 %v1252_v3, %v234_v12  ;;  %889 = vrcp.f32 %v372_v62  ;;  %v373_v57 = vadd.f32 1.0, %v866_v7 }
 0x13d   :  { %v206_v44 = vadd.f32 1e-05, %v190_v24  ;;  %v872_v37 = vpop.eup %871  ;;  %v242_v32 = vmul.f32 %v870_v14, %v1050_v45  ;;  %v178_v33 = vpop.xlane.xlu1 %177  ;;  %767 = vmatprep.mubr.msk.f32.mxu0 %vm39_vm0, %v423_v13  ;;  %v287_v34 = vadd.f32 %v1260_v43, %v264_v49 }
 0x13e   :  { %v157_v20 = vpop.xlane.xlu0 %156  ;;  %v1287_v18 = vpop.eup %873  ;;  %v235_v63 = vmul.f32 %v872_v37, %v1058_v54  ;;  %891 = vrsqrt.f32 %v213_v15  ;;  %v198_v42 = vmul.f32 0.015625, %v178_v33  ;;  %v280_v45 = vadd.f32 %v1260_v43, %v257_v60 }
 0x13f   :  { %v191_v36 = vmul.f32 0.015625, %v157_v20  ;;  %v1290_v52 = vpop.eup %875  ;;  %893 = vrsqrt.f32 %v206_v44  ;;  %v431_v19 = vmul.f32 %v415_v46, %v287_v34  ;;  %v265_v22 = vmul.f32 %v1252_v3, %v242_v32 }
 0x140   :  { %v878_v28 = vpop.eup %877  ;;  %v214_v29 = vadd.f32 1e-05, %v198_v42  ;;  %v258_v39 = vmul.f32 %v1252_v3, %v235_v63  ;;  %v424_v61 = vmul.f32 %v408_v4, %v280_v45  ;;  %895 = vrcp.f32 %v366_v41 }
 0x141   :  { %v207_v56 = vadd.f32 1e-05, %v191_v36  ;;  %v880_v5 = vpop.eup %879  ;;  %v243_v54 = vmul.f32 %v878_v28, %v1060_v55  ;;  %779 = vmatprep.mubr.msk.f32.mxu1 %vm39_vm0, %v431_v19  ;;  %v181_v26 = vpop.xlane.xlu1 %180  ;;  %v288_v46 = vadd.f32 %v1260_v43, %v265_v22  ;;  %v418_v19 = vmul.f32 %v1276_v6, %v1205_v31 }
 0x142   :  { %v160_v62 = vpop.xlane.xlu0 %159  ;;  %v882_v12 = vpop.eup %881  ;;  %v236_v27 = vmul.f32 %v880_v5, %v1069_v0  ;;  %897 = vrsqrt.f32 %v214_v29  ;;  %v199_v24 = vmul.f32 0.015625, %v181_v26  ;;  %768 = vmatmul.mubr.msk.f32.vlgmr.msra.gmra.mrb[0].mxu0 %vm39_vm0, %v424_v61  ;;  %v281_v7 = vadd.f32 %v1260_v43, %v258_v39 }
 0x143   :  { %v192_v13 = vmul.f32 0.015625, %v160_v62  ;;  %v1299_v49 = vpop.eup %883  ;;  %899 = vrsqrt.f32 %v207_v56  ;;  %v432_v55 = vmul.f32 %v1268_v2, %v288_v46  ;;  %v266_v4 = vmul.f32 %v1252_v3, %v243_v54 }
 0x144   :  { %v886_v14 = vpop.eup %885  ;;  %v215_v15 = vadd.f32 1e-05, %v199_v24  ;;  %v259_v60 = vmul.f32 %v1252_v3, %v236_v27  ;;  %901 = vrcp.f32 %v373_v57  ;;  %v425_v33 = vmul.f32 %v1271_v53, %v281_v7 }
 0x145   :  { %v208_v44 = vadd.f32 1e-05, %v192_v13  ;;  %v888_v0 = vpop.eup %887  ;;  %v244_v37 = vmul.f32 %v886_v14, %v1072_v1  ;;  %780 = vmatmul.mubr.msk.f32.vlgmr.msra.gmra.mrb[0].mxu1 %vm39_vm0, %v432_v55  ;;  %v184_v32 = vpop.xlane.xlu1 %183  ;;  %v289_v2 = vadd.f32 %v1260_v43, %v266_v4  ;;  %v374_v20 = vadd.f32 1.0, %v882_v12 }
 0x146   :  { %v237_v34 = vmul.f32 %v888_v0, %v1081_v10  ;;  %903 = vrsqrt.f32 %v215_v15  ;;  %v200_v41 = vmul.f32 0.015625, %v184_v32  ;;  %v282_v63 = vadd.f32 %v1260_v43, %v259_v60  ;;  %v890_v42 = vpop.eup %889  ;;  %770 = vmatprep.mubr.msk.f32.mxu0 %vm39_vm0, %v425_v33 }
 0x147   :  { %905 = vrsqrt.f32 %v208_v44  ;;  %v433_v36 = vmul.f32 %v417_v30, %v289_v2  ;;  %v267_v1 = vmul.f32 %v1252_v3, %v244_v37  ;;  %v411_v28 = vmul.f32 %v1263_v51, %v1198_v16 }
 0x148   :  { %v892_v53 = vpop.eup %891  ;;  %v216_v45 = vadd.f32 1e-05, %v200_v41  ;;  %v426_v22 = vmul.f32 %v1280_v8, %v282_v63  ;;  %v260_v10 = vmul.f32 %v1252_v3, %v237_v34  ;;  %907 = vrcp.f32 %v374_v20  ;;  %v440_v20 = vld [vmem:[%s1481_s2 + $0x8] sm:$0xff]  ;;  %v447_v63 = vld [vmem:[%s1481_s2 + $0x40] sm:$0xff] }
 0x149   :  { %v894_v29 = vpop.eup %893  ;;  %v245_v56 = vmul.f32 %v892_v53, %v1084_v11  ;;  %782 = vmatprep.mubr.msk.f32.mxu1 %vm39_vm0, %v433_v36  ;;  %v290_v30 = vadd.f32 %v1260_v43, %v267_v1  ;;  %v419_v16 = vmul.f32 %v1290_v52, %v1216_v40  ;;  %v412_v54 = vmul.f32 %v1287_v18, %v1211_v38 }
 0x14a   :  { %v238_v39 = vmul.f32 %v894_v29, %v1093_v23  ;;  %909 = vrsqrt.f32 %v216_v45  ;;  %771 = vmatmul.mubr.msk.f32.gmra.mrb[2].mxu0 %vm39_vm0, %v426_v22  ;;  %v283_v31 = vadd.f32 %v1260_v43, %v260_v10  ;;  %v896_v6 = vpop.eup %895  ;;  %v420_v27 = vmul.f32 %v890_v42, %v1228_v50  ;;  %v442_v45 = vld [vmem:[%s1481_s2 + $0x18] sm:$0xff]  ;;  %v441_v22 = vld [vmem:[%s1481_s2 + $0x10] sm:$0xff] }
 0x14b   :  { %v434_v8 = vmul.f32 %v418_v19, %v290_v30  ;;  %v268_v57 = vmul.f32 %v1252_v3, %v245_v56  ;;  %v413_v24 = vmul.f32 %v1299_v49, %v1223_v48  ;;  %v414_v60 = vmul.f32 %v896_v6, %v1235_v58  ;;  %v450_v56 = vld [vmem:[%s1481_s2 + $0x58] sm:$0xff] }
 0x14c   :  { %v898_v11 = vpop.eup %897  ;;  %v427_v51 = vmul.f32 %v411_v28, %v283_v31  ;;  %v261_v5 = vmul.f32 %v1252_v3, %v238_v39  ;;  %v449_v39 = vld [vmem:[%s1481_s2 + $0x50] sm:$0xff] }
 0x14d   :  { %v900_v23 = vpop.eup %899  ;;  %v246_v26 = vmul.f32 %v898_v11, %v1096_v17  ;;  %783 = vmatmul.mubr.msk.f32.gmra.mrb[2].mxu1 %vm39_vm0, %v434_v8  ;;  %v291_v61 = vadd.f32 %v1260_v43, %v268_v57  ;;  %v443_v11 = vld [vmem:[%s1481_s2 + $0x20] sm:$0xff] }
 0x14e   :  { %v902_v62 = vpop.eup %901  ;;  %v239_v46 = vmul.f32 %v900_v23, %v1105_v35  ;;  %773 = vmatprep.mubr.msk.f32.mxu0 %vm39_vm0, %v427_v51  ;;  %v284_v40 = vadd.f32 %v1260_v43, %v261_v5  ;;  %v452_v23 = vld [vmem:[%s1481_s2 + $0x68] sm:$0xff] }
 0x14f   :  { %v435_v52 = vmul.f32 %v419_v16, %v291_v61  ;;  %v269_v12 = vmul.f32 %v1252_v3, %v246_v26  ;;  %v421_v44 = vmul.f32 %v902_v62, %v1241_v9  ;;  %v444_v16 = vld [vmem:[%s1481_s2 + $0x28] sm:$0xff]  ;;  %v451_v61 = vld [vmem:[%s1481_s2 + $0x60] sm:$0xff] }
 0x150   :  { %v904_v38 = vpop.eup %903  ;;  %v428_v18 = vmul.f32 %v412_v54, %v284_v40  ;;  %v262_v17 = vmul.f32 %v1252_v3, %v239_v46 }
 0x151   :  { %v906_v13 = vpop.eup %905  ;;  %v247_v55 = vmul.f32 %v904_v38, %v1108_v21  ;;  %785 = vmatprep.mubr.msk.f32.mxu1 %vm39_vm0, %v435_v52  ;;  %v292_v35 = vadd.f32 %v1260_v43, %v269_v12  ;;  %v446_v12 = vld [vmem:[%s1481_s2 + $0x38] sm:$0xff] }
 0x152   :  { %v240_v7 = vmul.f32 %v906_v13, %v1117_v47  ;;  %774 = vmatmul.mubr.msk.f32.gmra.mrb[4].mxu0 %vm39_vm0, %v428_v18  ;;  %v285_v50 = vadd.f32 %v1260_v43, %v262_v17  ;;  %v908_v4 = vpop.eup %907 }
 0x153   :  { %v436_v14 = vmul.f32 %v420_v27, %v292_v35  ;;  %v270_v15 = vmul.f32 %v1252_v3, %v247_v55  ;;  %v422_v9 = vmul.f32 %v908_v4, %v1247_v59  ;;  %v448_v59 = vld [vmem:[%s1481_s2 + $0x48] sm:$0xff]  ;;  %v445_v27 = vld [vmem:[%s1481_s2 + $0x30] sm:$0xff] }
 0x154   :  { %v910_v48 = vpop.eup %909  ;;  %v429_v49 = vmul.f32 %v413_v24, %v285_v50  ;;  %v263_v21 = vmul.f32 %v1252_v3, %v240_v7  ;;  %v454_v24 = vld [vmem:[%s1481_s2 + $0x78] sm:$0xff]  ;;  %v453_v55 = vld [vmem:[%s1481_s2 + $0x70] sm:$0xff] }
 0x155   :  { %v248_v0 = vmul.f32 %v910_v48, %v1120_v25  ;;  %786 = vmatmul.mubr.msk.f32.gmra.mrb[4].mxu1 %vm39_vm0, %v436_v14  ;;  %v293_v47 = vadd.f32 %v1260_v43, %v270_v15 }
 0x156   :  { %776 = vmatprep.mubr.msk.f32.mxu0 %vm39_vm0, %v429_v49  ;;  %v286_v37 = vadd.f32 %v1260_v43, %v263_v21 }
 0x157   :  { %v437_v32 = vmul.f32 %v421_v44, %v293_v47  ;;  %v271_v33 = vmul.f32 %v1252_v3, %v248_v0  ;;  %v439_v3 = vld [vmem:[%s1481_s2] sm:$0xff] }
 0x158   :  { %v430_v2 = vmul.f32 %v414_v60, %v286_v37 }
 0x159   :  { %788 = vmatprep.mubr.msk.f32.mxu1 %vm39_vm0, %v437_v32  ;;  %v294_v58 = vadd.f32 %v1260_v43, %v271_v33 }
 0x15a   :  { %777 = vmatmul.mubr.msk.f32.gmra.mrb[6].mxu0 %vm39_vm0, %v430_v2 }
 0x15b   :  { %v438_v25 = vmul.f32 %v422_v9, %v294_v58 }
 0x15d   :  { %789 = vmatmul.mubr.msk.f32.gmra.mrb[6].mxu1 %vm39_vm0, %v438_v25 }
 0x215   :  { %v769_v34 = vpop.f32.mrb[0].mxu0 }
 0x216   :  { %v657_v43 = vadd.f32 %v769_v34, %v440_v20  ;;  %v577_v41 = vpop.f32.mrb[1].mxu0 }
 0x217   :  { %v656_v42 = vadd.f32 %v577_v41, %v439_v3 }
 0x218   :  { %v781_v36 = vpop.f32.mrb[0].mxu1  ;;  %674 = vst.msk [vmem:[%s1482_s6 + $0x8] sm:$0xff] %vm672_vm1, %v657_v43 }
 0x219   :  { %v665_v1 = vadd.f32 %v781_v36, %v448_v59  ;;  %v617_v19 = vpop.f32.mrb[1].mxu1  ;;  %673 = vst.msk [vmem:[%s1482_s6] sm:$0xff] %vm672_vm1, %v656_v42 }
 0x21a   :  { %v664_v53 = vadd.f32 %v617_v19, %v447_v63 }
 0x21b   :  { %682 = vst.msk [vmem:[%s1482_s6 + $0x48] sm:$0xff] %vm672_vm1, %v665_v1 }
 0x21c   :  { %681 = vst.msk [vmem:[%s1482_s6 + $0x40] sm:$0xff] %vm672_vm1, %v664_v53 }
 0x21d   :  { %v772_v10 = vpop.f32.mrb[2].mxu0 }
 0x21e   :  { %v659_v28 = vadd.f32 %v772_v10, %v442_v45  ;;  %v587_v29 = vpop.f32.mrb[3].mxu0 }
 0x21f   :  { %v658_v30 = vadd.f32 %v587_v29, %v441_v22 }
 0x220   :  { %676 = vst.msk [vmem:[%s1482_s6 + $0x18] sm:$0xff] %vm672_vm1, %v659_v28  ;;  %v784_v31 = vpop.f32.mrb[2].mxu1 }
 0x221   :  { %675 = vst.msk [vmem:[%s1482_s6 + $0x10] sm:$0xff] %vm672_vm1, %v658_v30  ;;  %v667_v6 = vadd.f32 %v784_v31, %v450_v56  ;;  %v627_v8 = vpop.f32.mrb[3].mxu1 }
 0x222   :  { %v666_v57 = vadd.f32 %v627_v8, %v449_v39 }
 0x223   :  { %684 = vst.msk [vmem:[%s1482_s6 + $0x58] sm:$0xff] %vm672_vm1, %v667_v6 }
 0x224   :  { %683 = vst.msk [vmem:[%s1482_s6 + $0x50] sm:$0xff] %vm672_vm1, %v666_v57 }
 0x225   :  { %v775_v51 = vpop.f32.mrb[4].mxu0 }
 0x226   :  { %v661_v5 = vadd.f32 %v775_v51, %v444_v16  ;;  %v597_v54 = vpop.f32.mrb[5].mxu0 }
 0x227   :  { %v660_v26 = vadd.f32 %v597_v54, %v443_v11 }
 0x228   :  { %678 = vst.msk [vmem:[%s1482_s6 + $0x28] sm:$0xff] %vm672_vm1, %v661_v5  ;;  %v787_v62 = vpop.f32.mrb[4].mxu1 }
 0x229   :  { %677 = vst.msk [vmem:[%s1482_s6 + $0x20] sm:$0xff] %vm672_vm1, %v660_v26  ;;  %v669_v46 = vadd.f32 %v787_v62, %v452_v23  ;;  %v637_v40 = vpop.f32.mrb[5].mxu1 }
 0x22a   :  { %v668_v52 = vadd.f32 %v637_v40, %v451_v61 }
 0x22b   :  { %686 = vst.msk [vmem:[%s1482_s6 + $0x68] sm:$0xff] %vm672_vm1, %v669_v46 }
 0x22c   :  { %685 = vst.msk [vmem:[%s1482_s6 + $0x60] sm:$0xff] %vm672_vm1, %v668_v52 }
 0x22d   :  { %v778_v38 = vpop.f32.mrb[6].mxu0 }
 0x22e   :  { %v663_v18 = vadd.f32 %v778_v38, %v446_v12  ;;  %v607_v17 = vpop.f32.mrb[7].mxu0 }
 0x22f   :  { %v662_v13 = vadd.f32 %v607_v17, %v445_v27 }
 0x230   :  { %680 = vst.msk [vmem:[%s1482_s6 + $0x38] sm:$0xff] %vm672_vm1, %v663_v18  ;;  %v790_v35 = vpop.f32.mrb[6].mxu1 }
 0x231   :  { %679 = vst.msk [vmem:[%s1482_s6 + $0x30] sm:$0xff] %vm672_vm1, %v662_v13  ;;  %v671_v7 = vadd.f32 %v790_v35, %v454_v24  ;;  %v647_v50 = vpop.f32.mrb[7].mxu1 }
 0x232   :  { %v670_v4 = vadd.f32 %v647_v50, %v453_v55 }
 0x233   :  { %688 = vst.msk [vmem:[%s1482_s6 + $0x78] sm:$0xff] %vm672_vm1, %v671_v7 }
 0x234   :  { %687 = vst.msk [vmem:[%s1482_s6 + $0x70] sm:$0xff] %vm672_vm1, %v670_v4 }

// kernel: vss_layer_forward.7
= control target key start
LH: loop header
LB: loop body
LE: loop exit
PB: predicated region body
PF: predicated region fallthrough
CT: control target
= control target key end

     0   :  { %s1614_s18 = smov 0   ;;  %s1616_s19 = smov 0   ;;  %s1988_s0 = inlined_call_operand.vmem [shape: f32[2,4,64,64], index: 0, kind: input, shape index: {}]   ;;  %s1989_s1 = inlined_call_operand.vmem [shape: f32[4,64,96], index: 1, kind: input, shape index: {}]   ;;  %s1990_s2 = inlined_call_operand.vmem [shape: f32[4,1,64], index: 2, kind: input, shape index: {}]   ;;  %s1991_s3 = inlined_call_operand.vmem [shape: f32[4,16,64], index: 3, kind: input, shape index: {}]   ;;  %s1992_s4 = inlined_call_operand.vmem [shape: f32[4,1,64], index: 4, kind: input, shape index: {}]   ;;  %s1993_s5 = inlined_call_operand.vmem [shape: f32[2,4,64,64], index: 5, kind: output, shape index: {}]  }
   0x1   :  { %s1618_s20 = smov 0   ;;  %s1620_s21 = smov 0  }
   0x2   :  { %s1622_s22 = smov 0  }
   0x3 LB: > { %s30_s23 = sadd.s32 1, %s1551_s20  ;;  %s34_s24 = sadd.s32 1, %s1555_s21  ;;  %s1559_s22 = sphi %s1622_s22, %s15_s22   ;;  %s1555_s21 = sphi %s1620_s21, %s2000_s21   ;;  %s1551_s20 = sphi %s1618_s20, %s1999_s20   ;;  %s1547_s19 = sphi %s1616_s19, %s1998_s19   ;;  %s1543_s18 = sphi %s1614_s18, %s1997_s18  }
   0x4   : > { %p32_p0 = scmp.ge.s32.totalorder %s30_s23, 4  ;;  %p1260_p1 = scmp.ge.s32.totalorder %s1559_s22, 1 }
   0x5   : > { %p259_p2 = scmp.lt.s32.totalorder %s1559_s22, 9 }
   0x6   : > { %s2002_s23 = smov (%p32_p0, %s30_s23), 0  ;;  %s2004_s24 = smov (!%p32_p0, %s34_s24), %s1555_s21 }
   0x7   : > { %p260_p3 = pnand %p1260_p1, %p259_p2  ;;  %p36_p4 = scmp.ge.s32.totalorder %s2004_s24, 2 }
   0x8   : > { %p322_p5 = scmp.lt.s32.totalorder (!%p260_p3), %s1543_s18, 3  ;;  %p320_p6 = scmp.lt.s32.totalorder (!%p260_p3), %s1547_s19, 1  ;;  %vm367_vm0 = vcmask (!%p260_p3), 523264   ;;  %v1573_v0 = vmov (!%p260_p3), 0.0   ;;  %vm520_vm1 = vcmask (!%p260_p3), 785408  }
   0x9   : > { %s2006_s24 = smov (%p36_p4, %s2004_s24), 0  ;;  %263 = sbr.rel (%p260_p3) target bundleno = 749 (0x2ed), region = 40 }
   0xa   : > { %368 = vst.msk [vmem:[#allocation3] sm:$0xff] (!%p260_p3), %vm367_vm0, %v1573_v0  ;;  %369 = vst.msk [vmem:[#allocation3 + $0x8] sm:$0xff] (!%p260_p3), %vm367_vm0, %v1573_v0  ;;  %s1714_s29 = smov (!%p260_p3), 0  }
  0x10   : > { %s2008_s18 = smov (!%p322_p5, %s1543_s18), 3  ;;  %s2010_s19 = smov (!%p320_p6, %s1547_s19), 1 }
  0x11   : > { %s1297_s25 = sshll.u32 %s2008_s18, 6  ;;  %s340_s28 = scalar_lea.vmem %s1990_s2, %s2008_s18  ;;  %v529_v13 = vld [vmem:[#allocation3] sm:$0xff]   ;;  %v530_v14 = vld [vmem:[#allocation3 + $0x8] sm:$0xff]  }
  0x12   : > { %s1652_s6 = scalar_lea.vmem %s1989_s1, %s1297_s25  ;;  %s1298_s7 = sshll.u32 %s2008_s18, 4  ;;  %v1654_v1 = vld [vmem:[%s340_s28] ss:$0 sm:$0xff] }
  0x13   : > { %s345_s10 = scalar_lea.vmem %s1991_s3, %s1298_s7  ;;  %s348_s13 = scalar_lea.vmem %s1992_s4, %s2008_s18  ;;  %v382_v2 = vld [vmem:[%s1652_s6] sm:$0xff]  ;;  %v383_v3 = vld [vmem:[%s1652_s6 + $0x8] sm:$0xff]  ;;  %v384_v4 = vld [vmem:[%s1652_s6 + $0x10] sm:$0xff] }
  0x14   : > { %v1665_v5 = vld [vmem:[%s345_s10] sm:$0xff]  ;;  %v1667_v6 = vld [vmem:[%s345_s10 + $0x8] sm:$0xff]  ;;  %v1343_v8 = vpack.c.bf16 %v383_v3, %v382_v2  ;;  %s1261_s14 = sshll.u32 %s2008_s18, 3  ;;  %s1262_s15 = sshll.u32 %s2010_s19, 5  ;;  %v385_v9 = vld [vmem:[%s1652_s6 + $0x18] sm:$0xff] }
  0x15   : > { %v1669_v7 = vld [vmem:[%s348_s13] sm:$0x1]  ;;  %v387_v11 = vld [vmem:[%s1652_s6 + $0x28] sm:$0xff]  ;;  %s329_s16 = sadd.s32 %s1262_s15, %s1261_s14  ;;  %v1347_v12 = vpack.c.bf16 %v385_v9, %v384_v4  ;;  %v388_v18 = vld [vmem:[%s1652_s6 + $0x30] sm:$0xff] }
  0x16   : > { %v386_v10 = vld [vmem:[%s1652_s6 + $0x20] sm:$0xff]  ;;  %1344 = vmatprep.subr.bf16.mxu0 %v1343_v8  ;;  %1359 = vmatprep.subr.bf16.mxu1 %v1343_v8  ;;  %s1263_s17 = sshll.u32 %s329_s16, 3  ;;  %v389_v19 = vld [vmem:[%s1652_s6 + $0x38] sm:$0xff] }
  0x17   : > { %1346 = vmatpush3.bf16.msra.mxu0 %v1343_v8  ;;  %1363 = vmatpush3.bf16.msra.mxu1 %v1343_v8  ;;  %s1677_s27 = scalar_lea.vmem %s1988_s0, %s1263_s17  ;;  %s1682_s28 = scalar_lea.vmem %s1993_s5, %s1263_s17  ;;  %v1351_v15 = vpack.c.bf16 %v387_v11, %v386_v10  ;;  %v1355_v20 = vpack.c.bf16 %v389_v19, %v388_v18 }
  0x18   : > { %1348 = vmatprep.subr.bf16.mxu0 %v1347_v12  ;;  %1360 = vmatprep.subr.bf16.mxu1 %v1347_v12  ;;  %v374_v16 = vld [vmem:[%s1677_s27] sm:$0xff]  ;;  %v375_v21 = vld [vmem:[%s1677_s27 + $0x8] sm:$0xff]  ;;  %v376_v23 = vld [vmem:[%s1677_s27 + $0x10] sm:$0xff] }
  0x19   : > { %v378_v17 = vld [vmem:[%s1677_s27 + $0x20] sm:$0xff]  ;;  %1331 = vmatprep.mubr.msk.f32.mxu0 %vm367_vm0, %v374_v16  ;;  %v379_v22 = vld [vmem:[%s1677_s27 + $0x28] sm:$0xff]  ;;  %v380_v24 = vld [vmem:[%s1677_s27 + $0x30] sm:$0xff] }
  0x1a   : > { %1337 = vmatprep.mubr.msk.f32.mxu1 %vm367_vm0, %v378_v17  ;;  %v377_v25 = vld [vmem:[%s1677_s27 + $0x18] sm:$0xff] }
  0x1b   : > { %1350 = vmatpush3.bf16.msra.mxu0 %v1347_v12  ;;  %1364 = vmatpush3.bf16.msra.mxu1 %v1347_v12  ;;  %v381_v26 = vld [vmem:[%s1677_s27 + $0x38] sm:$0xff] }
  0x1c   : > { %1352 = vmatprep.subr.bf16.mxu0 %v1351_v15  ;;  %1361 = vmatprep.subr.bf16.mxu1 %v1351_v15 }
  0x1f   : > { %1354 = vmatpush3.bf16.msra.mxu0 %v1351_v15  ;;  %1365 = vmatpush3.bf16.msra.mxu1 %v1351_v15 }
  0x20   : > { %1356 = vmatprep.subr.bf16.mxu0 %v1355_v20  ;;  %1362 = vmatprep.subr.bf16.mxu1 %v1355_v20 }
  0x23   : > { %1358 = vmatpush3.bf16.msra.mxu0 %v1355_v20  ;;  %1366 = vmatpush3.bf16.msra.mxu1 %v1355_v20 }
  0x26   : > { %1332 = vmatmul.mubr.msk.f32.vlgmr.msra.gmra.mrb[0].mxu0 %vm367_vm0, %v375_v21  ;;  %1338 = vmatmul.mubr.msk.f32.vlgmr.msra.gmra.mrb[0].mxu1 %vm367_vm0, %v379_v22 }
  0x27   : > { %1334 = vmatprep.mubr.msk.f32.mxu0 %vm367_vm0, %v376_v23  ;;  %1340 = vmatprep.mubr.msk.f32.mxu1 %vm367_vm0, %v380_v24 }
  0x2a   : > { %1335 = vmatmul.mubr.msk.f32.gmra.mrb[2].mxu0 %vm367_vm0, %v377_v25  ;;  %1341 = vmatmul.mubr.msk.f32.gmra.mrb[2].mxu1 %vm367_vm0, %v381_v26 }
  0xf9   : > { %v1333_v27 = vpop.f32.mrb[0].mxu0  ;;  %v1339_v28 = vpop.f32.mrb[0].mxu1 }
  0xfa   : > { %522 = vst.msk [vmem:[#allocation2 + $0x8] sm:$0xff] %vm520_vm1, %v1333_v27  ;;  %526 = vst.msk [vmem:[#allocation2 + $0x28] sm:$0xff] %vm520_vm1, %v1339_v28  ;;  %v481_v29 = vpop.f32.mrb[1].mxu0  ;;  %v501_v30 = vpop.f32.mrb[1].mxu1 }
  0xfb   : > { %521 = vst.msk [vmem:[#allocation2] sm:$0xff] %vm520_vm1, %v481_v29  ;;  %525 = vst.msk [vmem:[#allocation2 + $0x20] sm:$0xff] %vm520_vm1, %v501_v30 }
  0xfd   : > { %v1336_v31 = vpop.f32.mrb[2].mxu0  ;;  %v1342_v32 = vpop.f32.mrb[2].mxu1 }
  0xfe   : > { %524 = vst.msk [vmem:[#allocation2 + $0x18] sm:$0xff] %vm520_vm1, %v1336_v31  ;;  %528 = vst.msk [vmem:[#allocation2 + $0x38] sm:$0xff] %vm520_vm1, %v1342_v32  ;;  %v491_v33 = vpop.f32.mrb[3].mxu0  ;;  %v511_v34 = vpop.f32.mrb[3].mxu1 }
  0xff   : > { %523 = vst.msk [vmem:[#allocation2 + $0x10] sm:$0xff] %vm520_vm1, %v491_v33  ;;  %527 = vst.msk [vmem:[#allocation2 + $0x30] sm:$0xff] %vm520_vm1, %v511_v34 }
 0x100 LB: >> { %s1726_s30 = sshll.u32 %s1571_s29, 3  ;;  %s1574_s7 = smov 64   ;;  %v1576_v50 = vmov 2   ;;  %v1577_v51 = vmov 0   ;;  %v1578_v54 = vmov 3   ;;  %v1579_v55 = vmov 1   ;;  %s1571_s29 = sphi %s1714_s29, %s536_s29   ;;  %v1567_v13 = vphi %v529_v13, %v1996_v13   ;;  %v1563_v14 = vphi %v530_v14, %v1995_v14  }
 0x101   : >> { %s540_s6 = scalar_lea.vmem [#allocation2], %s1726_s30  ;;  %s1575_s8 = smov 48   ;;  %v1580_v56 = vmov 5   ;;  %v1581_v57 = vmov 4   ;;  %v1582_v58 = vmov 6   ;;  %v1583_v59 = vmov 7  }
 0x102   : >> { %s558_s9 = scalar_lea.vmem %s1677_s27, %s1726_s30  ;;  %v632_v62 = vlaneseq  ;;  %s1908_s10 = scalar_lea.vmem %s1682_s28, %s1726_s30  ;;  %vm686_vm2 = vcmask 516096   ;;  %vm745_vm3 = vcmask 517121   ;;  %vm901_vm4 = vcmask 520196  }
 0x103   : >> { %v1732_v45 = vld [vmem:[%s558_s9] sm:$0xff]  ;;  %vm797_vm5 = vcmask 518146   ;;  %vm849_vm6 = vcmask 519171   ;;  %vm953_vm7 = vcmask 521221   ;;  %vm1005_vm8 = vcmask 522246   ;;  %s536_s29 = sadd.s32 1, %s1571_s29  }
 0x104   : >> { %v1753_v63 = vshrl.u32 %v632_v62, 7  ;;  %vm1057_vm9 = vcmask 523271   ;;  %p533_p7 = scmp.ge.s32.totalorder %s536_s29, 8  }
 0x106   : >> { %v541_v35 = vld [vmem:[%s540_s6] sm:$0xff]  ;;  %v1757_v0 = vsub.s32 0, %v1753_v63  ;;  %v690_v3 = vsub.s32 1, %v1753_v63  ;;  %v749_v11 = vsub.s32 2, %v1753_v63  ;;  %v801_v12 = vsub.s32 3, %v1753_v63 }
 0x107   : >> { %561 = vrot.lane.b32.xlu0 %v541_v35, %s1574_s7  ;;  %v548_v36 = vadd.f32 %v1654_v1, %v541_v35  ;;  %596 = vrot.lane.b32.xlu1 %v541_v35, %s1575_s8  ;;  %v853_v18 = vsub.s32 4, %v1753_v63  ;;  %v905_v25 = vsub.s32 5, %v1753_v63  ;;  %v957_v33 = vsub.s32 6, %v1753_v63 }
 0x109   : >> { %v550_v37 = vand.u32 2147483647, %v548_v36  ;;  %v549_v42 = vmax.f32 %v548_v36, 0.0 }
 0x10b   : >> { %v551_v38 = vsub.f32 0.0, %v550_v37 }
 0x10d   : >> { %v552_v39 = vmul.f32 1.442695, %v551_v38 }
 0x10f   : >> { %1473 = vpow2.f32 %v552_v39 }
 0x119   : >> { %v1474_v40 = vpop.eup %1473 }
 0x11a   : >> { %v554_v41 = vadd.f32 1.0, %v1474_v40 }
 0x11c   : >> { %1475 = vlog2.f32 %v554_v41  ;;  %v1009_v41 = vsub.s32 7, %v1753_v63 }
 0x126   : >> { %v1476_v43 = vpop.eup %1475 }
 0x127   : >> { %v556_v44 = vmul.f32 0.6931472, %v1476_v43 }
 0x129   : >> { %v1734_v46 = vadd.f32 %v556_v44, %v549_v42 }
 0x12b   : >> { %v1738_v47 = vmul.f32 %v1732_v45, %v1734_v46  ;;  %v1761_v2 = vrot.slane %v1734_v46, %v1757_v0  ;;  %v1767_v8 = vrot.slane %v1734_v46, %v690_v3  ;;  %v1774_v16 = vrot.slane %v1734_v46, %v749_v11 }
 0x12c   : >> { %v1777_v17 = vrot.slane %v1734_v46, %v801_v12  ;;  %v1785_v22 = vrot.slane %v1734_v46, %v853_v18  ;;  %v1797_v32 = vrot.slane %v1734_v46, %v905_v25  ;;  %v1808_v40 = vrot.slane %v1734_v46, %v957_v33 }
 0x12d   : >> { %v636_v4 = vmul.f32 %v1761_v2, %v1665_v5  ;;  %v692_v10 = vmul.f32 %v1767_v8, %v1665_v5  ;;  %v751_v19 = vmul.f32 %v1774_v16, %v1665_v5  ;;  %v1789_v24 = vrot.slane %v1738_v47, %v1757_v0 }
 0x12e   : >> { %v803_v21 = vmul.f32 %v1777_v17, %v1665_v5  ;;  %v855_v30 = vmul.f32 %v1785_v22, %v1665_v5  ;;  %v907_v39 = vmul.f32 %v1797_v32, %v1665_v5  ;;  %v1812_v42 = vrot.slane %v1738_v47, %v690_v3 }
 0x12f   : >> { %v638_v9 = vmul.f32 1.442695, %v636_v4  ;;  %v694_v15 = vmul.f32 1.442695, %v692_v10  ;;  %v753_v23 = vmul.f32 1.442695, %v751_v19  ;;  %v1815_v43 = vrot.slane %v1738_v47, %v905_v25 }
 0x130   : >> { %v805_v29 = vmul.f32 1.442695, %v803_v21  ;;  %v637_v10 = vmul.f32 %v1761_v2, %v1667_v6  ;;  %v1847_v19 = vrot.slane %v1738_v47, %v853_v18  ;;  %v693_v2 = vmul.f32 %v1767_v8, %v1667_v6 }
 0x131   : >> { %1477 = vpow2.f32 %v638_v9 }
 0x132   : >> { %1479 = vpow2.f32 %v694_v15  ;;  %v640_v25 = vmul.f32 1.442695, %v637_v10 }
 0x133   : >> { %1481 = vpow2.f32 %v753_v23 }
 0x134   : >> { %1483 = vpow2.f32 %v805_v29 }
 0x13b   : >> { %v1478_v20 = vpop.eup %1477 }
 0x13c   : >> { %v642_v26 = vmul.f32 %v1567_v13, %v1478_v20  ;;  %v1480_v34 = vpop.eup %1479  ;;  %v857_v13 = vmul.f32 1.442695, %v855_v30 }
 0x13e   : >> { %1485 = vpow2.f32 %v857_v13 }
 0x179   : >> { %v562_v48 = vpop.permute.xlu0 %561  ;;  %v597_v49 = vpop.permute.xlu1 %596 }
 0x17a   : >> { %564 = vxpose.xlu0.b32.start.end [1/1] (short) (narrow) %v562_v48, 16  ;;  %599 = vxpose.xlu1.b32.start.end [1/1] (short) (narrow) %v597_v49, 16  ;;  %v909_v48 = vmul.f32 1.442695, %v907_v39  ;;  %v959_v49 = vmul.f32 %v1808_v40, %v1665_v5 }
 0x17c   : >> { %1487 = vpow2.f32 %v909_v48 }
 0x198   : >> { %1445 = vset.pattern.permute.xlu1 %v1576_v50 }
 0x1a3   : >> { %1443 = vset.pattern.permute.xlu0 %v1577_v51 }
 0x1fa   : >> { %v580_v52 = vpop.trf.xlu0  ;;  %v1741_v53 = vpop.trf.xlu1 }
 0x1fb   : >> { %764 = vperm.xlu1 %1445, %v580_v52   ;;  %650 = vperm.xlu0 %1443, %v580_v52  }
 0x1fe   : >> { %v581_v60 = vpop.trf.xlu0  ;;  %v616_v61 = vpop.trf.xlu1 }
 0x1ff   : >> { %1446 = vset.pattern.permute.xlu1 %v1578_v54  ;;  %664 = vperm.xlu0 %1443, %v1741_v53  }
 0x200   : >> { %816 = vperm.xlu1 %1446, %v580_v52  }
 0x203   : >> { %1444 = vset.pattern.permute.xlu0 %v1579_v55 }
 0x204   : >> { %1448 = vset.pattern.permute.xlu1 %v1580_v56  ;;  %705 = vperm.xlu0 %1444, %v580_v52  }
 0x205   : >> { %920 = vperm.xlu1 %1448, %v580_v52  }
 0x208   : >> { %1447 = vset.pattern.permute.xlu0 %v1581_v57 }
 0x209   : >> { %1449 = vset.pattern.permute.xlu1 %v1582_v58  ;;  %868 = vperm.xlu0 %1447, %v580_v52  }
 0x20a   : >> { %972 = vperm.xlu1 %1449, %v580_v52  }
 0x20d   : >> { %1450 = vset.pattern.permute.xlu0 %v1583_v59 }
 0x20e   : >> { %1451 = vset.pattern.permute.xlu1 %v1579_v55  ;;  %1024 = vperm.xlu0 %1450, %v580_v52  }
 0x20f   : >> { %717 = vperm.xlu1 %1451, %v1741_v53  }
 0x212   : >> { %1453 = vset.pattern.permute.xlu0 %v1578_v54 }
 0x213   : >> { %1452 = vset.pattern.permute.xlu1 %v1576_v50  ;;  %828 = vperm.xlu0 %1453, %v1741_v53  }
 0x214   : >> { %776 = vperm.xlu1 %1452, %v1741_v53  }
 0x217   : >> { %1456 = vset.pattern.permute.xlu0 %v1582_v58 }
 0x218   : >> { %1454 = vset.pattern.permute.xlu1 %v1581_v57  ;;  %984 = vperm.xlu0 %1456, %v1741_v53  }
 0x219   : >> { %880 = vperm.xlu1 %1454, %v1741_v53  }
 0x21c   : >> { %1459 = vset.pattern.permute.xlu0 %v1576_v50 }
 0x21d   : >> { %1455 = vset.pattern.permute.xlu1 %v1580_v56  ;;  %768 = vperm.xlu0 %1459, %v581_v60  }
 0x21e   : >> { %932 = vperm.xlu1 %1455, %v1741_v53  }
 0x221   : >> { %1462 = vset.pattern.permute.xlu0 %v1580_v56 }
 0x222   : >> { %1457 = vset.pattern.permute.xlu1 %v1577_v51  ;;  %924 = vperm.xlu0 %1462, %v581_v60   ;;  %v1823_v51 = vrot.slane %v1738_v47, %v749_v11 }
 0x223   : >> { %655 = vperm.xlu1 %1457, %v581_v60  }
 0x226   : >> { %1465 = vset.pattern.permute.xlu0 %v1579_v55 }
 0x227   : >> { %721 = vperm.xlu0 %1465, %v616_v61   ;;  %669 = vperm.xlu1 %1457, %v616_v61  }
 0x22b   : >> { %1468 = vset.pattern.permute.xlu0 %v1581_v57  ;;  %1458 = vset.pattern.permute.xlu1 %v1579_v55 }
 0x22c   : >> { %884 = vperm.xlu0 %1468, %v616_v61   ;;  %709 = vperm.xlu1 %1458, %v581_v60  }
 0x230   : >> { %1472 = vset.pattern.permute.xlu0 %v1583_v59  ;;  %1460 = vset.pattern.permute.xlu1 %v1578_v54 }
 0x231   : >> { %1040 = vperm.xlu0 %1472, %v616_v61   ;;  %820 = vperm.xlu1 %1460, %v581_v60  }
 0x235   : >> { %1461 = vset.pattern.permute.xlu1 %v1581_v57  ;;  %v1830_v57 = vrot.slane %v1738_v47, %v957_v33 }
 0x236   : >> { %872 = vperm.xlu1 %1461, %v581_v60  }
 0x23a   : >> { %1463 = vset.pattern.permute.xlu1 %v1582_v58 }
 0x23b   : >> { %976 = vperm.xlu1 %1463, %v581_v60  }
 0x23f   : >> { %1464 = vset.pattern.permute.xlu1 %v1583_v59 }
 0x240   : >> { %1028 = vperm.xlu1 %1464, %v581_v60  }
 0x244   : >> { %1466 = vset.pattern.permute.xlu1 %v1576_v50  ;;  %v1820_v50 = vrot.slane %v1734_v46, %v1009_v41 }
 0x245   : >> { %780 = vperm.xlu1 %1466, %v616_v61  }
 0x246   : >> { %v1011_v46 = vmul.f32 %v1820_v50, %v1665_v5 }
 0x248   : >> { %v1013_v9 = vmul.f32 1.442695, %v1011_v46 }
 0x249   : >> { %1467 = vset.pattern.permute.xlu1 %v1578_v54  ;;  %v1482_v54 = vpop.eup %1481 }
 0x24a   : >> { %832 = vperm.xlu1 %1467, %v616_v61  }
 0x24e   : >> { %1469 = vset.pattern.permute.xlu1 %v1580_v56 }
 0x24f   : >> { %936 = vperm.xlu1 %1469, %v616_v61  }
 0x253   : >> { %1470 = vset.pattern.permute.xlu1 %v1582_v58  ;;  %v961_v58 = vmul.f32 1.442695, %v959_v49  ;;  %v752_v49 = vmul.f32 %v1774_v16, %v1667_v6  ;;  %v856_v16 = vmul.f32 %v1785_v22, %v1667_v6 }
 0x254   : >> { %988 = vperm.xlu1 %1470, %v616_v61   ;;  %v1836_v61 = vrot.slane %v1738_v47, %v801_v12 }
 0x255   : >> { %1489 = vpow2.f32 %v961_v58  ;;  %v755_v58 = vmul.f32 1.442695, %v752_v49 }
 0x256   : >> { %1491 = vpow2.f32 %v1013_v9 }
 0x257   : >> { %1493 = vpow2.f32 %v640_v25 }
 0x258   : >> { %1471 = vset.pattern.permute.xlu1 %v1583_v59  ;;  %v1484_v59 = vpop.eup %1483 }
 0x259   : >> { %1036 = vperm.xlu1 %1471, %v1741_v53   ;;  %v1486_v12 = vpop.eup %1485 }
 0x27a   : >> { %v765_v27 = vpop.permute.xlu1 %764  ;;  %v651_v28 = vpop.permute.xlu0 %650 }
 0x27b   : >> { %v658_v31 = vmul.f32 %v651_v28, %v1789_v24  ;;  %v771_v60 = vmul.f32 %v765_v27, %v1823_v51  ;;  %v1488_v28 = vpop.eup %1487 }
 0x27c   : >> { %v1490_v33 = vpop.eup %1489 }
 0x27d   : >> { %v1800_v35 = vadd.f32 %v658_v31, %v642_v26  ;;  %v1492_v8 = vpop.eup %1491 }
 0x27e   : >> { %v1802_v36 = vpop.permute.xlu0 %664 }
 0x27f   : >> { %v817_v37 = vpop.permute.xlu1 %816  ;;  %v698_v38 = vmul.f32 %v1480_v34, %v1800_v35  ;;  %v696_v34 = vmul.f32 1.442695, %v693_v2 }
 0x280   : >> { %v823_v11 = vmul.f32 %v817_v37, %v1836_v61  ;;  %v1863_v37 = vrot.slane %v1738_v47, %v1009_v41  ;;  %v1494_v47 = vpop.eup %1493  ;;  %v804_v41 = vmul.f32 %v1777_v17, %v1667_v6  ;;  %v672_v17 = vmul.f32 %v1802_v36, %v1800_v35 }
 0x281   : >> { %1495 = vpow2.f32 %v696_v34  ;;  %v960_v35 = vmul.f32 %v1808_v40, %v1667_v6 }
 0x282   : >> { %1497 = vpow2.f32 %v755_v58  ;;  %v674_v25 = vsel %vm367_vm0, %v672_v17, 0.0 }
 0x283   : >> { %v706_v44 = vpop.permute.xlu0 %705  ;;  %v963_v34 = vmul.f32 1.442695, %v960_v35 }
 0x284   : >> { %v712_v52 = vmul.f32 %v706_v44, %v1812_v42  ;;  %v921_v53 = vpop.permute.xlu1 %920 }
 0x285   : >> { %v927_v55 = vmul.f32 %v921_v53, %v1815_v43 }
 0x286   : >> { %v1827_v56 = vadd.f32 %v712_v52, %v698_v38 }
 0x288   : >> { %v757_v62 = vmul.f32 %v1482_v54, %v1827_v56  ;;  %v869_v20 = vpop.permute.xlu0 %868 }
 0x289   : >> { %v973_v63 = vpop.permute.xlu1 %972  ;;  %v875_v27 = vmul.f32 %v869_v20, %v1847_v19 }
 0x28a   : >> { %v1839_v3 = vadd.f32 %v771_v60, %v757_v62  ;;  %v979_v4 = vmul.f32 %v973_v63, %v1830_v57  ;;  %v807_v60 = vmul.f32 1.442695, %v804_v41 }
 0x28b   : >> { %v1496_v9 = vpop.eup %1495 }
 0x28c   : >> { %v809_v15 = vmul.f32 %v1484_v59, %v1839_v3  ;;  %v643_v59 = vmul.f32 %v1563_v14, %v1494_v47  ;;  %1499 = vpow2.f32 %v807_v60  ;;  %v859_v14 = vmul.f32 1.442695, %v856_v16 }
 0x28d   : >> { %v1025_v30 = vpop.permute.xlu0 %1024 }
 0x28e   : >> { %v1849_v21 = vadd.f32 %v823_v11, %v809_v15  ;;  %v718_v23 = vpop.permute.xlu1 %717  ;;  %v1031_v52 = vmul.f32 %v1025_v30, %v1863_v37  ;;  %v908_v15 = vmul.f32 %v1797_v32, %v1667_v6  ;;  %1501 = vpow2.f32 %v859_v14  ;;  %v1498_v30 = vpop.eup %1497 }
 0x28f   : >> { %v724_v32 = vmul.f32 %v718_v23, %v1827_v56 }
 0x290   : >> { %v861_v26 = vmul.f32 %v1486_v12, %v1849_v21 }
 0x292   : >> { %v1855_v29 = vadd.f32 %v875_v27, %v861_v26  ;;  %v1868_v44 = vpop.permute.xlu0 %828 }
 0x293   : >> { %v1857_v18 = vpop.permute.xlu1 %776 }
 0x294   : >> { %v913_v31 = vmul.f32 %v1488_v28, %v1855_v29 }
 0x296   : >> { %v1860_v13 = vadd.f32 %v927_v55, %v913_v31  ;;  %v1500_v49 = vpop.eup %1499 }
 0x297   : >> { %v1882_v46 = vpop.permute.xlu0 %984 }
 0x298   : >> { %v965_v38 = vmul.f32 %v1490_v33, %v1860_v13  ;;  %v1866_v39 = vpop.permute.xlu1 %880 }
 0x29a   : >> { %v1870_v48 = vadd.f32 %v979_v4, %v965_v38  ;;  %v1012_v38 = vmul.f32 %v1820_v50, %v1667_v6  ;;  %v683_v50 = vmul.f32 %v1732_v45, %v1669_v7 }
 0x29c   : >> { %v1017_v53 = vmul.f32 %v1492_v8, %v1870_v48  ;;  %v769_v63 = vpop.permute.xlu0 %768 }
 0x29d   : >> { %v1876_v54 = vpop.permute.xlu1 %932 }
 0x29e   : >> { %v1880_v55 = vadd.f32 %v1031_v52, %v1017_v53   ;;  %v772_v52 = vmul.f32 %v769_v63, %v1823_v51  ;;  %v1502_v63 = vpop.eup %1501 }
 0x2a0   : > { %1059 = vst.msk [vmem:[#allocation3] sm:$0xff] (%p533_p7), %vm367_vm0, %v1880_v55 }
 0x2a1   : >> { %v925_v26 = vpop.permute.xlu0 %924 }
 0x2a2   : >> { %v656_v62 = vpop.permute.xlu1 %655 }
 0x2a3   : >> { %v659_v4 = vmul.f32 %v656_v62, %v1789_v24  ;;  %v911_v24 = vmul.f32 1.442695, %v908_v15 }
 0x2a5   : >> { %v661_v10 = vadd.f32 %v659_v4, %v643_v59  ;;  %1503 = vpow2.f32 %v911_v24  ;;  %v1015_v59 = vmul.f32 1.442695, %v1012_v38 }
 0x2a6   : >> { %v670_v11 = vpop.permute.xlu1 %669  ;;  %v722_v8 = vpop.permute.xlu0 %721  ;;  %1505 = vpow2.f32 %v963_v34 }
 0x2a7   : >> { %v673_v12 = vmul.f32 %v670_v11, %v661_v10  ;;  %v699_v20 = vmul.f32 %v1496_v9, %v661_v10  ;;  %1507 = vpow2.f32 %v1015_v59 }
 0x2a9   : >> { %v675_v22 = vsel %vm367_vm0, %v673_v12, 0.0 }
 0x2aa   : >> { %v676_v27 = vadd.f32 %v675_v22, %v674_v25  ;;  %v739_v25 = vrot.slane %v1669_v7, %v1757_v0  ;;  %v887_v22 = vmul.f32 %v1866_v39, %v1855_v29 }
 0x2ab   : >> { %v710_v36 = vpop.permute.xlu1 %709 }
 0x2ac   : >> { %v677_v28 = vrot.slane %v676_v27, 4  ;;  %v713_v2 = vmul.f32 %v710_v36, %v1812_v42  ;;  %v726_v42 = vsel %vm367_vm0, %v724_v32, 0.0  ;;  %v885_v36 = vpop.permute.xlu0 %884  ;;  %v889_v0 = vsel %vm367_vm0, %v887_v22, 0.0 }
 0x2ad   : >> { %v991_v22 = vmul.f32 %v1882_v46, %v1870_v48 }
 0x2ae   : >> { %v678_v31 = vadd.f32 %v677_v28, %v676_v27  ;;  %v715_v33 = vadd.f32 %v713_v2, %v699_v20  ;;  %v928_v28 = vmul.f32 %v925_v26, %v1815_v43 }
 0x2af   : >> { %v1504_v20 = vpop.eup %1503 }
 0x2b0   : >> { %v679_v53 = vrot.slane %v678_v31, 2  ;;  %v725_v40 = vmul.f32 %v722_v8, %v715_v33  ;;  %v758_v47 = vmul.f32 %v1498_v30, %v715_v33  ;;  %v821_v41 = vpop.permute.xlu1 %820  ;;  %v1506_v32 = vpop.eup %1505 }
 0x2b1   : >> { %v824_v16 = vmul.f32 %v821_v41, %v1836_v61  ;;  %v1508_v26 = vpop.eup %1507 }
 0x2b2   : >> { %v680_v56 = vadd.f32 %v679_v53, %v678_v31  ;;  %v727_v23 = vsel %vm367_vm0, %v725_v40, 0.0  ;;  %v774_v58 = vadd.f32 %v772_v52, %v758_v47  ;;  %v783_v53 = vmul.f32 %v1857_v18, %v1839_v3 }
 0x2b3   : >> { %v728_v60 = vadd.f32 %v727_v23, %v726_v42 }
 0x2b4   : >> { %v681_v62 = vrot.slane %v680_v56, 1  ;;  %v810_v51 = vmul.f32 %v1500_v49, %v774_v58 }
 0x2b5   : >> { %v729_v4 = vrot.slane %v728_v60, 4  ;;  %v873_v9 = vpop.permute.xlu1 %872 }
 0x2b6   : >> { %v682_v17 = vadd.f32 %v681_v62, %v680_v56  ;;  %v826_v10 = vadd.f32 %v824_v16, %v810_v51  ;;  %v876_v12 = vmul.f32 %v873_v9, %v1847_v19  ;;  %v1918_v19 = vmul.f32 %v739_v25, %v1732_v45 }
 0x2b7   : >> { %v730_v11 = vadd.f32 %v729_v4, %v728_v60  ;;  %v835_v62 = vmul.f32 %v1868_v44, %v1849_v21 }
 0x2b8   : >> { %v684_v15 = vadd.f32 %v683_v50, %v682_v17  ;;  %v862_v14 = vmul.f32 %v1502_v63, %v826_v10  ;;  %v939_v17 = vmul.f32 %v1876_v54, %v1860_v13 }
 0x2b9   : >> { %v731_v61 = vrot.slane %v730_v11, 2  ;;  %v837_v4 = vsel %vm367_vm0, %v835_v62, 0.0 }
 0x2ba   : >> { %687 = vst.msk [vmem:[%s1908_s10] sm:$0x1] %vm686_vm2, %v684_v15  ;;  %v878_v27 = vadd.f32 %v876_v12, %v862_v14  ;;  %v977_v24 = vpop.permute.xlu1 %976 }
 0x2bb   : >> { %v732_v35 = vadd.f32 %v731_v61, %v730_v11  ;;  %v980_v43 = vmul.f32 %v977_v24, %v1830_v57  ;;  %v785_v57 = vsel %vm367_vm0, %v783_v53, 0.0 }
 0x2bc   : >> { %v888_v2 = vmul.f32 %v885_v36, %v878_v27  ;;  %v914_v30 = vmul.f32 %v1504_v20, %v878_v27 }
 0x2bd   : >> { %v733_v31 = vrot.slane %v732_v35, 1 }
 0x2be   : >> { %v890_v33 = vsel %vm367_vm0, %v888_v2, 0.0  ;;  %v930_v29 = vadd.f32 %v928_v28, %v914_v30  ;;  %v993_v30 = vsel %vm367_vm0, %v991_v22, 0.0 }
 0x2bf   : >> { %v734_v39 = vadd.f32 %v733_v31, %v732_v35  ;;  %v891_v34 = vadd.f32 %v890_v33, %v889_v0  ;;  %v1029_v38 = vpop.permute.xlu1 %1028 }
 0x2c0   : >> { %v966_v8 = vmul.f32 %v1506_v32, %v930_v29  ;;  %v1032_v41 = vmul.f32 %v1029_v38, %v1863_v37  ;;  %v1041_v32 = vpop.permute.xlu0 %1040 }
 0x2c1   : >> { %v742_v49 = vadd.f32 %v1918_v19, %v734_v39  ;;  %v892_v52 = vrot.slane %v891_v34, 4 }
 0x2c2   : >> { %v982_v45 = vadd.f32 %v980_v43, %v966_v8 }
 0x2c3   : >> { %1282 = vst.msk [vmem:[%s1908_s10] sm:$0x2] %vm745_vm3, %v742_v49  ;;  %v893_v40 = vadd.f32 %v892_v52, %v891_v34 }
 0x2c4   : >> { %v1018_v47 = vmul.f32 %v1508_v26, %v982_v45  ;;  %v781_v42 = vpop.permute.xlu1 %780 }
 0x2c5   : >> { %v894_v56 = vrot.slane %v893_v40, 2  ;;  %v784_v23 = vmul.f32 %v781_v42, %v774_v58 }
 0x2c6   : >> { %v1928_v14 = vadd.f32 %v1032_v41, %v1018_v47  }
 0x2c7   : >> { %v895_v60 = vadd.f32 %v894_v56, %v893_v40  ;;  %v786_v50 = vsel %vm367_vm0, %v784_v23, 0.0 }
 0x2c8   : >> { %v1994_v59 = vmov %v1928_v14  ;;  %v787_v3 = vadd.f32 %v786_v50, %v785_v57 }
 0x2c9   : >> { %v896_v18 = vrot.slane %v895_v60, 1  ;;  %v833_v51 = vpop.permute.xlu1 %832  ;;  %v1044_v46 = vmul.f32 %v1041_v32, %v1994_v59  ;;  %1060 = vst.msk [vmem:[#allocation3 + $0x8] sm:$0xff] (%p533_p7), %vm367_vm0, %v1994_v59 }
 0x2ca   : >> { %v788_v16 = vrot.slane %v787_v3, 4  ;;  %v836_v63 = vmul.f32 %v833_v51, %v826_v10  ;;  %v941_v10 = vsel %vm367_vm0, %v939_v17, 0.0 }
 0x2cb   : >> { %v897_v37 = vadd.f32 %v896_v18, %v895_v60  ;;  %v1046_v53 = vsel %vm367_vm0, %v1044_v46, 0.0 }
 0x2cc   : >> { %v789_v58 = vadd.f32 %v788_v16, %v787_v3  ;;  %v838_v9 = vsel %vm367_vm0, %v836_v63, 0.0 }
 0x2cd   : >> { %v898_v11 = vadd.f32 %v897_v37, %v1918_v19  ;;  %v839_v15 = vadd.f32 %v838_v9, %v837_v4 }
 0x2ce   : >> { %v790_v21 = vrot.slane %v789_v58, 2  ;;  %v937_v44 = vpop.permute.xlu1 %936 }
 0x2cf   : >> { %1288 = vst.msk [vmem:[%s1908_s10] sm:$0x10] %vm901_vm4, %v898_v11  ;;  %v840_v14 = vrot.slane %v839_v15, 4  ;;  %v940_v12 = vmul.f32 %v937_v44, %v930_v29 }
 0x2d0   : >> { %v791_v20 = vadd.f32 %v790_v21, %v789_v58 }
 0x2d1   : >> { %v841_v25 = vadd.f32 %v840_v14, %v839_v15  ;;  %v942_v61 = vsel %vm367_vm0, %v940_v12, 0.0  ;;  %v1995_v14 = vmov %v1994_v59 }
 0x2d2   : >> { %v792_v27 = vrot.slane %v791_v20, 1  ;;  %v943_v24 = vadd.f32 %v942_v61, %v941_v10 }
 0x2d3   : >> { %v842_v13 = vrot.slane %v841_v25, 2  ;;  %v989_v54 = vpop.permute.xlu1 %988 }
 0x2d4   : >> { %v793_v35 = vadd.f32 %v792_v27, %v791_v20  ;;  %v944_v36 = vrot.slane %v943_v24, 4  ;;  %v992_v28 = vmul.f32 %v989_v54, %v982_v45 }
 0x2d5   : >> { %v843_v2 = vadd.f32 %v842_v13, %v841_v25  ;;  %v1996_v13 = vmov %v1880_v55 }
 0x2d6   : >> { %v794_v31 = vadd.f32 %v793_v35, %v1918_v19  ;;  %v945_v0 = vadd.f32 %v944_v36, %v943_v24  ;;  %v994_v33 = vsel %vm367_vm0, %v992_v28, 0.0 }
 0x2d7   : >> { %v844_v29 = vrot.slane %v843_v2, 1  ;;  %v995_v48 = vadd.f32 %v994_v33, %v993_v30 }
 0x2d8   : >> { %1284 = vst.msk [vmem:[%s1908_s10] sm:$0x4] %vm797_vm5, %v794_v31  ;;  %v946_v39 = vrot.slane %v945_v0, 2  ;;  %v1037_v34 = vpop.permute.xlu1 %1036 }
 0x2d9   : >> { %v845_v38 = vadd.f32 %v844_v29, %v843_v2  ;;  %v996_v8 = vrot.slane %v995_v48, 4  ;;  %v1043_v43 = vmul.f32 %v1037_v34, %v1880_v55 }
 0x2da   : >> { %v947_v26 = vadd.f32 %v946_v39, %v945_v0 }
 0x2db   : >> { %v846_v49 = vadd.f32 %v845_v38, %v1918_v19  ;;  %v997_v52 = vadd.f32 %v996_v8, %v995_v48  ;;  %v1045_v45 = vsel %vm367_vm0, %v1043_v43, 0.0 }
 0x2dc   : >> { %v948_v40 = vrot.slane %v947_v26, 1  ;;  %v1047_v47 = vadd.f32 %v1046_v53, %v1045_v45 }
 0x2dd   : >> { %1286 = vst.msk [vmem:[%s1908_s10] sm:$0x8] %vm849_vm6, %v846_v49  ;;  %v998_v41 = vrot.slane %v997_v52, 2 }
 0x2de   : >> { %v949_v42 = vadd.f32 %v948_v40, %v947_v26  ;;  %v1048_v56 = vrot.slane %v1047_v47, 4 }
 0x2df   : >> { %v999_v23 = vadd.f32 %v998_v41, %v997_v52 }
 0x2e0   : >> { %v950_v57 = vadd.f32 %v949_v42, %v1918_v19  ;;  %v1049_v60 = vadd.f32 %v1048_v56, %v1047_v47 }
 0x2e1   : >> { %v1000_v50 = vrot.slane %v999_v23, 1 }
 0x2e2   : >> { %1290 = vst.msk [vmem:[%s1908_s10] sm:$0x20] %vm953_vm7, %v950_v57  ;;  %v1050_v62 = vrot.slane %v1049_v60, 2 }
 0x2e3   : >> { %v1001_v3 = vadd.f32 %v1000_v50, %v999_v23 }
 0x2e4   : >> { %v1051_v18 = vadd.f32 %v1050_v62, %v1049_v60 }
 0x2e5   : >> { %v1002_v51 = vadd.f32 %v1001_v3, %v1918_v19 }
 0x2e6   : >> { %v1052_v16 = vrot.slane %v1051_v18, 1  ;;  %535 = sbr.rel (!%p533_p7) target bundleno = 256 (0x100), region = 103 }
 0x2e7   : >> { %1292 = vst.msk [vmem:[%s1908_s10] sm:$0x40] %vm1005_vm8, %v1002_v51 }
 0x2e8   : >> { %v1053_v63 = vadd.f32 %v1052_v16, %v1051_v18 }
 0x2ea   : >> { %v1054_v37 = vadd.f32 %v1053_v63, %v1918_v19 }
 0x2ec   : >> { %1294 = vst.msk [vmem:[%s1908_s10] sm:$0x80] %vm1057_vm9, %v1054_v37 }
 0x2ed PF: > { %s15_s22 = sadd.s32 1, %s1559_s22   ;;  %s1997_s18 = smov %s1551_s20 }
 0x2ee   : > { %p12_p8 = scmp.ge.s32.totalorder %s15_s22, 10   ;;  %s1998_s19 = smov %s1555_s21 }
 0x2ef   : > { %s1999_s20 = smov %s2002_s23  ;;  %s2000_s21 = smov %s2006_s24 }
 0x2f0   :  { %14 = sbr.rel (!%p12_p8) target bundleno = 3 (0x3), region = 114 }

// kernel: vss_layer_forward.11
= control target key start
LH: loop header
LB: loop body
LE: loop exit
PB: predicated region body
PF: predicated region fallthrough
CT: control target
= control target key end

     0   :  { %vm40_vm0 = vcmask 523264   ;;  %s1483_s0 = inlined_call_operand.vmem [shape: f32[128,64], index: 0, kind: input, shape index: {}]   ;;  %s1484_s1 = inlined_call_operand.vmem [shape: f32[128,64], index: 1, kind: input, shape index: {}]   ;;  %s1485_s2 = inlined_call_operand.vmem [shape: f32[128,32], index: 2, kind: input, shape index: {}]   ;;  %s1486_s3 = inlined_call_operand.vmem [shape: f32[1,64], index: 3, kind: input, shape index: {}]   ;;  %s1487_s4 = inlined_call_operand.vmem [shape: f32[1,64], index: 4, kind: input, shape index: {}]   ;;  %s1488_s5 = inlined_call_operand.vmem [shape: f32[64,32], index: 5, kind: input, shape index: {}]   ;;  %s1489_s6 = inlined_call_operand.hbm [shape: f32[128,32], index: 6, kind: output, shape index: {}]  }
   0x1   :  { %v24_v0 = vld [vmem:[%s1483_s0] sm:$0xff]  ;;  %v25_v1 = vld [vmem:[%s1483_s0 + $0x8] sm:$0xff]  ;;  %v26_v8 = vld [vmem:[%s1483_s0 + $0x10] sm:$0xff] }
   0x2   :  { %v32_v2 = vld [vmem:[%s1483_s0 + $0x40] sm:$0xff]  ;;  %v41_v3 = vsel %vm40_vm0, %v24_v0, 0.0  ;;  %v44_v4 = vsel %vm40_vm0, %v25_v1, 0.0  ;;  %v33_v5 = vld [vmem:[%s1483_s0 + $0x48] sm:$0xff]  ;;  %v34_v9 = vld [vmem:[%s1483_s0 + $0x50] sm:$0xff] }
   0x3   :  { %42 = vadd.xlane.f32.xlu0 %v41_v3  ;;  %45 = vadd.xlane.f32.xlu1 %v44_v4  ;;  %v65_v6 = vsel %vm40_vm0, %v32_v2, 0.0  ;;  %v68_v7 = vsel %vm40_vm0, %v33_v5, 0.0 }
   0x4   :  { %11 = vsyncpa [#allocation3], 0  ;;  %v47_v10 = vsel %vm40_vm0, %v26_v8, 0.0  ;;  %v71_v11 = vsel %vm40_vm0, %v34_v9, 0.0  ;;  %v1016_v12 = vld [vmem:[%s1483_s0 + $0x18] sm:$0xff]  ;;  %v1030_v16 = vld [vmem:[%s1483_s0 + $0x20] sm:$0xff] }
   0x5   :  { %v1021_v13 = vld [vmem:[%s1483_s0 + $0x58] sm:$0xff]  ;;  %v50_v14 = vsel %vm40_vm0, %v1016_v12, 0.0  ;;  %v1035_v17 = vld [vmem:[%s1483_s0 + $0x60] sm:$0xff]  ;;  %v53_v18 = vsel %vm40_vm0, %v1030_v16, 0.0  ;;  %v1044_v20 = vld [vmem:[%s1483_s0 + $0x28] sm:$0xff]  ;;  %vm673_vm1 = vcmask 261120  }
   0x6   :  { %v74_v15 = vsel %vm40_vm0, %v1021_v13, 0.0  ;;  %v77_v19 = vsel %vm40_vm0, %v1035_v17, 0.0  ;;  %v1049_v21 = vld [vmem:[%s1483_s0 + $0x68] sm:$0xff]  ;;  %v56_v22 = vsel %vm40_vm0, %v1044_v20, 0.0  ;;  %v1058_v24 = vld [vmem:[%s1483_s0 + $0x30] sm:$0xff]  ;;  %v1072_v28 = vld [vmem:[%s1483_s0 + $0x38] sm:$0xff] }
   0x7   :  { %66 = vadd.xlane.f32.xlu0 %v65_v6  ;;  %69 = vadd.xlane.f32.xlu1 %v68_v7  ;;  %v80_v23 = vsel %vm40_vm0, %v1049_v21, 0.0  ;;  %v1063_v25 = vld [vmem:[%s1483_s0 + $0x70] sm:$0xff]  ;;  %v59_v26 = vsel %vm40_vm0, %v1058_v24, 0.0  ;;  %v1077_v29 = vld [vmem:[%s1483_s0 + $0x78] sm:$0xff]  ;;  %v62_v30 = vsel %vm40_vm0, %v1072_v28, 0.0  ;;  %s951_s0 = smov [#allocation2]  }
   0x8   :  { %v83_v27 = vsel %vm40_vm0, %v1063_v25, 0.0  ;;  %v86_v31 = vsel %vm40_vm0, %v1077_v29, 0.0  ;;  %s695_s29 = sshll.u32 %s951_s0, 4  ;;  %s696_s29 = int_to_ptr.vmem [resolvable:$true] %s695_s29 }
   0x9   :  { %s927_s30 = scalar_lea.vmem %s696_s29, 2048  ;;  %p932_p1 = scmp.lt.s32.totalorder %s696_s29, %s696_s29 }
   0xa   :  { %p928_p0 = scmp.ne.s32.totalorder %s696_s29, %s927_s30  ;;  %p933_p2 = scmp.lt.s32.totalorder %s927_s30, %s927_s30 }
   0xb   :  { %48 = vadd.xlane.f32.xlu0 %v47_v10  ;;  %72 = vadd.xlane.f32.xlu1 %v71_v11 }
   0xc   :  { %p934_p3 = por %p933_p2, %p932_p1 }
   0xe   :  { %p935_p4 = pnand %p934_p3, %p928_p0 }
   0xf   :  { %51 = vadd.xlane.f32.xlu0 %v50_v14  ;;  %75 = vadd.xlane.f32.xlu1 %v74_v15 }
  0x13   :  { %54 = vadd.xlane.f32.xlu0 %v53_v18  ;;  %78 = vadd.xlane.f32.xlu1 %v77_v19 }
  0x17   :  { %57 = vadd.xlane.f32.xlu0 %v56_v22  ;;  %81 = vadd.xlane.f32.xlu1 %v80_v23 }
  0x1b   :  { %60 = vadd.xlane.f32.xlu0 %v59_v26  ;;  %84 = vadd.xlane.f32.xlu1 %v83_v27 }
  0x1f   :  { %63 = vadd.xlane.f32.xlu0 %v62_v30  ;;  %87 = vadd.xlane.f32.xlu1 %v86_v31 }
  0x90   :  { %v43_v32 = vpop.xlane.xlu0 %42  ;;  %v46_v33 = vpop.xlane.xlu1 %45 }
  0x91   :  { %v90_v34 = vmul.f32 0.015625, %v43_v32  ;;  %v91_v35 = vmul.f32 0.015625, %v46_v33 }
  0x93   :  { %v1083_v36 = vsub.f32 %v24_v0, %v90_v34  ;;  %v1085_v37 = vsub.f32 %v25_v1, %v91_v35 }
  0x94   :  { %v67_v38 = vpop.xlane.xlu0 %66  ;;  %v70_v39 = vpop.xlane.xlu1 %69 }
  0x95   :  { %v98_v40 = vmul.f32 0.015625, %v67_v38  ;;  %v99_v41 = vmul.f32 0.015625, %v70_v39  ;;  %v122_v42 = vmul.f32 %v1083_v36, %v1083_v36  ;;  %v123_v43 = vmul.f32 %v1085_v37, %v1085_v37 }
  0x97   :  { %v1091_v44 = vsub.f32 %v32_v2, %v98_v40  ;;  %v1093_v45 = vsub.f32 %v33_v5, %v99_v41  ;;  %v138_v46 = vsel %vm40_vm0, %v122_v42, 0.0  ;;  %v141_v49 = vsel %vm40_vm0, %v123_v43, 0.0 }
  0x98   :  { %139 = vadd.xlane.f32.xlu0 %v138_v46  ;;  %v49_v47 = vpop.xlane.xlu0 %48  ;;  %v73_v48 = vpop.xlane.xlu1 %72 }
  0x99   :  { %v92_v50 = vmul.f32 0.015625, %v49_v47  ;;  %v100_v51 = vmul.f32 0.015625, %v73_v48  ;;  %v130_v52 = vmul.f32 %v1091_v44, %v1091_v44  ;;  %v131_v53 = vmul.f32 %v1093_v45, %v1093_v45 }
  0x9b   :  { %v1101_v54 = vsub.f32 %v26_v8, %v92_v50  ;;  %v1103_v55 = vsub.f32 %v34_v9, %v100_v51  ;;  %v162_v56 = vsel %vm40_vm0, %v130_v52, 0.0  ;;  %v165_v59 = vsel %vm40_vm0, %v131_v53, 0.0  ;;  %v457_v50 = vld [vmem:[%s1488_s5 + $0x8] sm:$0xff] }
  0x9c   :  { %142 = vadd.xlane.f32.xlu0 %v141_v49  ;;  %163 = vadd.xlane.f32.xlu1 %v162_v56  ;;  %v52_v57 = vpop.xlane.xlu0 %51  ;;  %v76_v58 = vpop.xlane.xlu1 %75  ;;  %v456_v49 = vld [vmem:[%s1488_s5] sm:$0xff]  ;;  %v458_v56 = vld [vmem:[%s1488_s5 + $0x10] sm:$0xff] }
  0x9d   :  { %v93_v60 = vmul.f32 0.015625, %v52_v57  ;;  %v101_v61 = vmul.f32 0.015625, %v76_v58  ;;  %v124_v62 = vmul.f32 %v1101_v54, %v1101_v54  ;;  %v132_v63 = vmul.f32 %v1103_v55, %v1103_v55  ;;  %v459_v57 = vld [vmem:[%s1488_s5 + $0x18] sm:$0xff] }
  0x9e   :  { %v804_v51 = vpack.c.bf16 %v457_v50, %v456_v49  ;;  %v808_v58 = vpack.c.bf16 %v459_v57, %v458_v56  ;;  %v1271_v50 = vld [vmem:[%s1484_s1 + $0x68] sm:$0xff] }
  0x9f   :  { %v1112_v0 = vsub.f32 %v1016_v12, %v93_v60  ;;  %v1115_v1 = vsub.f32 %v1021_v13, %v101_v61  ;;  %v144_v2 = vsel %vm40_vm0, %v124_v62, 0.0  ;;  %v168_v5 = vsel %vm40_vm0, %v132_v63, 0.0  ;;  %v460_v60 = vld [vmem:[%s1488_s5 + $0x20] sm:$0xff]  ;;  %v461_v61 = vld [vmem:[%s1488_s5 + $0x28] sm:$0xff]  ;;  %v462_v63 = vld [vmem:[%s1488_s5 + $0x30] sm:$0xff] }
  0xa0   :  { %166 = vadd.xlane.f32.xlu1 %v165_v59  ;;  %145 = vadd.xlane.f32.xlu0 %v144_v2  ;;  %v55_v3 = vpop.xlane.xlu0 %54  ;;  %v79_v4 = vpop.xlane.xlu1 %78  ;;  %v812_v62 = vpack.c.bf16 %v461_v61, %v460_v60  ;;  %v463_v2 = vld [vmem:[%s1488_s5 + $0x38] sm:$0xff] }
  0xa1   :  { %v94_v6 = vmul.f32 0.015625, %v55_v3  ;;  %v102_v7 = vmul.f32 0.015625, %v79_v4  ;;  %v125_v8 = vmul.f32 %v1112_v0, %v1112_v0  ;;  %v133_v9 = vmul.f32 %v1115_v1, %v1115_v1  ;;  %805 = vmatprep.subr.bf16.mxu0 %v804_v51  ;;  %820 = vmatprep.subr.bf16.mxu1 %v804_v51  ;;  %v1200_v4 = vld [vmem:[%s1484_s1] sm:$0xff] }
  0xa2   :  { %807 = vmatpush3.bf16.msra.mxu0 %v804_v51  ;;  %824 = vmatpush3.bf16.msra.mxu1 %v804_v51  ;;  %v816_v3 = vpack.c.bf16 %v463_v2, %v462_v63 }
  0xa3   :  { %v1124_v10 = vsub.f32 %v1030_v16, %v94_v6  ;;  %v1127_v11 = vsub.f32 %v1035_v17, %v102_v7  ;;  %v147_v12 = vsel %vm40_vm0, %v125_v8, 0.0  ;;  %v171_v15 = vsel %vm40_vm0, %v133_v9, 0.0  ;;  %809 = vmatprep.subr.bf16.mxu0 %v808_v58  ;;  %821 = vmatprep.subr.bf16.mxu1 %v808_v58  ;;  %v1211_v7 = vld [vmem:[%s1484_s1 + $0x8] sm:$0xff] }
  0xa4   :  { %169 = vadd.xlane.f32.xlu1 %v168_v5  ;;  %148 = vadd.xlane.f32.xlu0 %v147_v12  ;;  %v58_v13 = vpop.xlane.xlu0 %57  ;;  %v82_v14 = vpop.xlane.xlu1 %81  ;;  %v1205_v5 = vld [vmem:[%s1484_s1 + $0x40] sm:$0xff]  ;;  %v708_v6 = vmul.f32 -1.442695, %v1200_v4  ;;  %v709_v9 = vmul.f32 -1.442695, %v1211_v7  ;;  %v1218_v12 = vld [vmem:[%s1484_s1 + $0x48] sm:$0xff] }
  0xa5   :  { %v95_v18 = vmul.f32 0.015625, %v58_v13  ;;  %v103_v19 = vmul.f32 0.015625, %v82_v14  ;;  %v126_v22 = vmul.f32 %v1124_v10, %v1124_v10  ;;  %v134_v16 = vmul.f32 %v1127_v11, %v1127_v11  ;;  %v1223_v13 = vld [vmem:[%s1484_s1 + $0x10] sm:$0xff] }
  0xa6   :  { %811 = vmatpush3.bf16.msra.mxu0 %v808_v58  ;;  %825 = vmatpush3.bf16.msra.mxu1 %v808_v58  ;;  %v716_v8 = vmul.f32 -1.442695, %v1205_v5  ;;  %831 = vpow2.f32 %v708_v6  ;;  %v717_v14 = vmul.f32 -1.442695, %v1218_v12  ;;  %v1278_v58 = vld [vmem:[%s1484_s1 + $0x38] sm:$0xff] }
  0xa7   :  { %v1136_v23 = vsub.f32 %v1044_v20, %v95_v18  ;;  %v1139_v17 = vsub.f32 %v1049_v21, %v103_v19  ;;  %v150_v26 = vsel %vm40_vm0, %v126_v22, 0.0  ;;  %v174_v31 = vsel %vm40_vm0, %v134_v16, 0.0  ;;  %813 = vmatprep.subr.bf16.mxu0 %v812_v62  ;;  %822 = vmatprep.subr.bf16.mxu1 %v812_v62  ;;  %v1230_v18 = vld [vmem:[%s1484_s1 + $0x18] sm:$0xff]  ;;  %v1235_v19 = vld [vmem:[%s1484_s1 + $0x50] sm:$0xff]  ;;  %v1241_v16 = vld [vmem:[%s1484_s1 + $0x20] sm:$0xff] }
  0xa8   :  { %172 = vadd.xlane.f32.xlu1 %v171_v15  ;;  %151 = vadd.xlane.f32.xlu0 %v150_v26  ;;  %v61_v27 = vpop.xlane.xlu0 %60  ;;  %v85_v30 = vpop.xlane.xlu1 %84  ;;  %833 = vpow2.f32 %v716_v8  ;;  %v710_v15 = vmul.f32 -1.442695, %v1223_v13  ;;  %v711_v22 = vmul.f32 -1.442695, %v1230_v18  ;;  %v718_v26 = vmul.f32 -1.442695, %v1235_v19 }
  0xa9   :  { %v96_v32 = vmul.f32 0.015625, %v61_v27  ;;  %v104_v33 = vmul.f32 0.015625, %v85_v30  ;;  %v127_v34 = vmul.f32 %v1136_v23, %v1136_v23  ;;  %v135_v20 = vmul.f32 %v1139_v17, %v1139_v17 }
  0xaa   :  { %815 = vmatpush3.bf16.msra.mxu0 %v812_v62  ;;  %826 = vmatpush3.bf16.msra.mxu1 %v812_v62  ;;  %835 = vpow2.f32 %v709_v9  ;;  %v712_v30 = vmul.f32 -1.442695, %v1241_v16  ;;  %v715_v63 = vmul.f32 -1.442695, %v1278_v58  ;;  %v1284_v9 = vld [vmem:[%s1484_s1 + $0x70] sm:$0xff] }
  0xab   :  { %v1148_v35 = vsub.f32 %v1058_v24, %v96_v32  ;;  %v1151_v21 = vsub.f32 %v1063_v25, %v104_v33  ;;  %v153_v38 = vsel %vm40_vm0, %v127_v34, 0.0  ;;  %v177_v41 = vsel %vm40_vm0, %v135_v20, 0.0  ;;  %817 = vmatprep.subr.bf16.mxu0 %v816_v3  ;;  %823 = vmatprep.subr.bf16.mxu1 %v816_v3 }
  0xac   :  { %175 = vadd.xlane.f32.xlu1 %v174_v31  ;;  %154 = vadd.xlane.f32.xlu0 %v153_v38  ;;  %v64_v39 = vpop.xlane.xlu0 %63  ;;  %v88_v40 = vpop.xlane.xlu1 %87  ;;  %837 = vpow2.f32 %v717_v14  ;;  %v1248_v31 = vld [vmem:[%s1484_s1 + $0x58] sm:$0xff]  ;;  %v1254_v38 = vld [vmem:[%s1484_s1 + $0x28] sm:$0xff] }
  0xad   :  { %v97_v42 = vmul.f32 0.015625, %v64_v39  ;;  %v105_v43 = vmul.f32 0.015625, %v88_v40  ;;  %v128_v46 = vmul.f32 %v1148_v35, %v1148_v35  ;;  %v136_v24 = vmul.f32 %v1151_v21, %v1151_v21  ;;  %v1259_v40 = vld [vmem:[%s1484_s1 + $0x60] sm:$0xff] }
  0xae   :  { %819 = vmatpush3.bf16.msra.mxu0 %v816_v3  ;;  %827 = vmatpush3.bf16.msra.mxu1 %v816_v3  ;;  %839 = vpow2.f32 %v710_v15  ;;  %v719_v20 = vmul.f32 -1.442695, %v1248_v31 }
  0xaf   :  { %v1160_v47 = vsub.f32 %v1072_v28, %v97_v42  ;;  %v1163_v25 = vsub.f32 %v1077_v29, %v105_v43  ;;  %v156_v48 = vsel %vm40_vm0, %v128_v46, 0.0  ;;  %v180_v52 = vsel %vm40_vm0, %v136_v24, 0.0 }
  0xb0   :  { %178 = vadd.xlane.f32.xlu1 %v177_v41  ;;  %157 = vadd.xlane.f32.xlu0 %v156_v48  ;;  %v832_v27 = vpop.eup %831  ;;  %841 = vpow2.f32 %v711_v22  ;;  %v713_v46 = vmul.f32 -1.442695, %v1254_v38  ;;  %v720_v24 = vmul.f32 -1.442695, %v1259_v40  ;;  %v1266_v48 = vld [vmem:[%s1484_s1 + $0x30] sm:$0xff] }
  0xb1   :  { %v129_v28 = vmul.f32 %v1160_v47, %v1160_v47  ;;  %v137_v29 = vmul.f32 %v1163_v25, %v1163_v25  ;;  %843 = vpow2.f32 %v718_v26  ;;  %v360_v34 = vadd.f32 1.0, %v832_v27 }
  0xb2   :  { %v834_v32 = vpop.eup %833  ;;  %845 = vpow2.f32 %v712_v30 }
  0xb3   :  { %v159_v53 = vsel %vm40_vm0, %v129_v28, 0.0  ;;  %v183_v59 = vsel %vm40_vm0, %v137_v29, 0.0  ;;  %v368_v39 = vadd.f32 1.0, %v834_v32  ;;  %847 = vrcp.f32 %v360_v34 }
  0xb4   :  { %181 = vadd.xlane.f32.xlu1 %v180_v52  ;;  %160 = vadd.xlane.f32.xlu0 %v159_v53  ;;  %v836_v33 = vpop.eup %835  ;;  %849 = vpow2.f32 %v719_v20  ;;  %v714_v28 = vmul.f32 -1.442695, %v1266_v48  ;;  %v721_v53 = vmul.f32 -1.442695, %v1271_v50 }
  0xb5   :  { %v361_v42 = vadd.f32 1.0, %v836_v33  ;;  %851 = vrcp.f32 %v368_v39  ;;  %v722_v33 = vmul.f32 -1.442695, %v1284_v9 }
  0xb6   :  { %v838_v41 = vpop.eup %837 }
  0xb7   :  { %v369_v49 = vadd.f32 1.0, %v838_v41  ;;  %853 = vrcp.f32 %v361_v42 }
  0xb8   :  { %184 = vadd.xlane.f32.xlu1 %v183_v59  ;;  %v840_v43 = vpop.eup %839  ;;  %855 = vpow2.f32 %v713_v46 }
  0xb9   :  { %v362_v52 = vadd.f32 1.0, %v840_v43  ;;  %857 = vpow2.f32 %v720_v24 }
  0xba   :  { %v842_v51 = vpop.eup %841  ;;  %859 = vrcp.f32 %v369_v49 }
  0xbb   :  { %v844_v29 = vpop.eup %843  ;;  %v363_v57 = vadd.f32 1.0, %v842_v51  ;;  %861 = vrcp.f32 %v362_v52 }
  0xbc   :  { %v846_v59 = vpop.eup %845  ;;  %v370_v61 = vadd.f32 1.0, %v844_v29  ;;  %863 = vpow2.f32 %v714_v28 }
  0xbd   :  { %865 = vpow2.f32 %v721_v53  ;;  %v848_v2 = vpop.eup %847  ;;  %v364_v8 = vadd.f32 1.0, %v846_v59  ;;  %v1290_v59 = vld [vmem:[%s1484_s1 + $0x78] sm:$0xff] }
  0xbe   :  { %867 = vrcp.f32 %v363_v57  ;;  %v850_v14 = vpop.eup %849 }
  0xbf   :  { %v852_v26 = vpop.eup %851  ;;  %v371_v41 = vadd.f32 1.0, %v850_v14 }
  0xc1   :  { %v854_v27 = vpop.eup %853 }
  0xc2   :  { %v856_v34 = vpop.eup %855 }
  0xc3   :  { %v858_v42 = vpop.eup %857  ;;  %v365_v28 = vadd.f32 1.0, %v856_v34  ;;  %v408_v34 = vmul.f32 %v848_v2, %v1200_v4  ;;  %v409_v4 = vmul.f32 %v854_v27, %v1211_v7 }
  0xc4   :  { %v860_v24 = vpop.eup %859  ;;  %v372_v57 = vadd.f32 1.0, %v858_v42 }
  0xc5   :  { %v862_v49 = vpop.eup %861  ;;  %v1311_v2 = vmul.f32 %v860_v24, %v1218_v12 }
  0xc6   :  { %v864_v29 = vpop.eup %863 }
 0x125   :  { %v140_v56 = vpop.xlane.xlu0 %139 }
 0x126   :  { %v186_v60 = vmul.f32 0.015625, %v140_v56 }
 0x128   :  { %v202_v62 = vadd.f32 1e-05, %v186_v60  ;;  %v866_v60 = vpop.eup %865 }
 0x129   :  { %v164_v3 = vpop.xlane.xlu1 %163  ;;  %v143_v6 = vpop.xlane.xlu0 %142 }
 0x12a   :  { %869 = vrsqrt.f32 %v202_v62  ;;  %v194_v15 = vmul.f32 0.015625, %v164_v3  ;;  %v187_v22 = vmul.f32 0.015625, %v143_v6  ;;  %v1295_v3 = vld [vmem:[%s1486_s3] ss:$0 sm:$0xff] }
 0x12b   :  { %871 = vrcp.f32 %v370_v61 }
 0x12c   :  { %v210_v30 = vadd.f32 1e-05, %v194_v15  ;;  %v203_v32 = vadd.f32 1e-05, %v187_v22  ;;  %873 = vpow2.f32 %v715_v63  ;;  %v868_v63 = vpop.eup %867  ;;  %v723_v15 = vmul.f32 -1.442695, %v1290_v59 }
 0x12d   :  { %v167_v20 = vpop.xlane.xlu1 %166  ;;  %v146_v39 = vpop.xlane.xlu0 %145  ;;  %875 = vrcp.f32 %v364_v8 }
 0x12e   :  { %877 = vrsqrt.f32 %v210_v30  ;;  %v195_v43 = vmul.f32 0.015625, %v167_v20  ;;  %v188_v46 = vmul.f32 0.015625, %v146_v39  ;;  %v366_v20 = vadd.f32 1.0, %v864_v29 }
 0x12f   :  { %879 = vrsqrt.f32 %v203_v32 }
 0x130   :  { %v211_v51 = vadd.f32 1e-05, %v195_v43  ;;  %v204_v52 = vadd.f32 1e-05, %v188_v46  ;;  %881 = vpow2.f32 %v722_v33  ;;  %v1303_v43 = vld [vmem:[%s1487_s4] ss:$0 sm:$0xff]  ;;  %v416_v46 = vmul.f32 %v852_v26, %v1205_v5 }
 0x131   :  { %v170_v53 = vpop.xlane.xlu1 %169  ;;  %v149_v56 = vpop.xlane.xlu0 %148  ;;  %883 = vrcp.f32 %v371_v41 }
 0x132   :  { %885 = vrsqrt.f32 %v211_v51  ;;  %v196_v61 = vmul.f32 0.015625, %v170_v53  ;;  %v189_v62 = vmul.f32 0.015625, %v149_v56  ;;  %v1314_v53 = vmul.f32 %v862_v49, %v1223_v13 }
 0x133   :  { %887 = vrsqrt.f32 %v204_v52 }
 0x134   :  { %v870_v6 = vpop.eup %869  ;;  %v212_v8 = vadd.f32 1e-05, %v196_v61  ;;  %v205_v14 = vadd.f32 1e-05, %v189_v62  ;;  %889 = vrcp.f32 %v365_v28  ;;  %v373_v62 = vadd.f32 1.0, %v866_v60 }
 0x135   :  { %v872_v22 = vpop.eup %871  ;;  %v173_v30 = vpop.xlane.xlu1 %172  ;;  %v234_v33 = vmul.f32 %v870_v6, %v1083_v36  ;;  %891 = vrcp.f32 %v372_v57 }
 0x136   :  { %v152_v32 = vpop.xlane.xlu0 %151  ;;  %v874_v39 = vpop.eup %873  ;;  %893 = vrsqrt.f32 %v212_v8  ;;  %v197_v41 = vmul.f32 0.015625, %v173_v30  ;;  %v1323_v8 = vmul.f32 %v868_v63, %v1230_v18  ;;  %v418_v30 = vmul.f32 %v872_v22, %v1235_v19 }
 0x137   :  { %v190_v42 = vmul.f32 0.015625, %v152_v32  ;;  %v1306_v51 = vpop.eup %875  ;;  %895 = vrsqrt.f32 %v205_v14  ;;  %v257_v36 = vmul.f32 %v1295_v3, %v234_v33 }
 0x138   :  { %v878_v52 = vpop.eup %877  ;;  %v213_v28 = vadd.f32 1e-05, %v197_v41  ;;  %897 = vpow2.f32 %v723_v15  ;;  %v367_v41 = vadd.f32 1.0, %v874_v39 }
 0x139   :  { %v206_v29 = vadd.f32 1e-05, %v190_v42  ;;  %v880_v56 = vpop.eup %879  ;;  %v176_v57 = vpop.xlane.xlu1 %175  ;;  %v280_v26 = vadd.f32 %v1303_v43, %v257_v36  ;;  %v242_v61 = vmul.f32 %v878_v52, %v1091_v44  ;;  %899 = vrcp.f32 %v366_v20 }
 0x13a   :  { %v155_v5 = vpop.xlane.xlu0 %154  ;;  %v882_v7 = vpop.eup %881  ;;  %v235_v12 = vmul.f32 %v880_v56, %v1085_v37  ;;  %901 = vrsqrt.f32 %v213_v28  ;;  %v198_v27 = vmul.f32 0.015625, %v176_v57 }
 0x13b   :  { %v191_v24 = vmul.f32 0.015625, %v155_v5  ;;  %v1319_v6 = vpop.eup %883  ;;  %903 = vrsqrt.f32 %v206_v29  ;;  %v424_v13 = vmul.f32 %v408_v34, %v280_v26  ;;  %v265_v49 = vmul.f32 %v1295_v3, %v242_v61 }
 0x13c   :  { %v886_v14 = vpop.eup %885  ;;  %v214_v15 = vadd.f32 1e-05, %v198_v27  ;;  %v258_v60 = vmul.f32 %v1295_v3, %v235_v12  ;;  %905 = vrcp.f32 %v373_v62  ;;  %v374_v57 = vadd.f32 1.0, %v882_v7 }
 0x13d   :  { %v207_v44 = vadd.f32 1e-05, %v191_v24  ;;  %v888_v37 = vpop.eup %887  ;;  %v243_v32 = vmul.f32 %v886_v14, %v1093_v45  ;;  %v179_v33 = vpop.xlane.xlu1 %178  ;;  %780 = vmatprep.mubr.msk.f32.mxu0 %vm40_vm0, %v424_v13  ;;  %v288_v34 = vadd.f32 %v1303_v43, %v265_v49 }
 0x13e   :  { %v158_v20 = vpop.xlane.xlu0 %157  ;;  %v1330_v18 = vpop.eup %889  ;;  %v236_v63 = vmul.f32 %v888_v37, %v1101_v54  ;;  %907 = vrsqrt.f32 %v214_v15  ;;  %v199_v42 = vmul.f32 0.015625, %v179_v33  ;;  %v281_v45 = vadd.f32 %v1303_v43, %v258_v60 }
 0x13f   :  { %v192_v36 = vmul.f32 0.015625, %v158_v20  ;;  %v1333_v52 = vpop.eup %891  ;;  %909 = vrsqrt.f32 %v207_v44  ;;  %v432_v19 = vmul.f32 %v416_v46, %v288_v34  ;;  %v266_v22 = vmul.f32 %v1295_v3, %v243_v32 }
 0x140   :  { %v894_v28 = vpop.eup %893  ;;  %v215_v29 = vadd.f32 1e-05, %v199_v42  ;;  %v259_v39 = vmul.f32 %v1295_v3, %v236_v63  ;;  %v425_v61 = vmul.f32 %v409_v4, %v281_v45  ;;  %911 = vrcp.f32 %v367_v41 }
 0x141   :  { %v208_v56 = vadd.f32 1e-05, %v192_v36  ;;  %v896_v5 = vpop.eup %895  ;;  %v244_v54 = vmul.f32 %v894_v28, %v1103_v55  ;;  %792 = vmatprep.mubr.msk.f32.mxu1 %vm40_vm0, %v432_v19  ;;  %v182_v26 = vpop.xlane.xlu1 %181  ;;  %v289_v46 = vadd.f32 %v1303_v43, %v266_v22  ;;  %v419_v19 = vmul.f32 %v1319_v6, %v1248_v31 }
 0x142   :  { %v161_v62 = vpop.xlane.xlu0 %160  ;;  %v898_v12 = vpop.eup %897  ;;  %v237_v27 = vmul.f32 %v896_v5, %v1112_v0  ;;  %913 = vrsqrt.f32 %v215_v29  ;;  %v200_v24 = vmul.f32 0.015625, %v182_v26  ;;  %781 = vmatmul.mubr.msk.f32.vlgmr.msra.gmra.mrb[0].mxu0 %vm40_vm0, %v425_v61  ;;  %v282_v7 = vadd.f32 %v1303_v43, %v259_v39 }
 0x143   :  { %v193_v13 = vmul.f32 0.015625, %v161_v62  ;;  %v1342_v49 = vpop.eup %899  ;;  %915 = vrsqrt.f32 %v208_v56  ;;  %v433_v55 = vmul.f32 %v1311_v2, %v289_v46  ;;  %v267_v4 = vmul.f32 %v1295_v3, %v244_v54 }
 0x144   :  { %v902_v14 = vpop.eup %901  ;;  %v216_v15 = vadd.f32 1e-05, %v200_v24  ;;  %v260_v60 = vmul.f32 %v1295_v3, %v237_v27  ;;  %917 = vrcp.f32 %v374_v57  ;;  %v426_v33 = vmul.f32 %v1314_v53, %v282_v7 }
 0x145   :  { %v209_v44 = vadd.f32 1e-05, %v193_v13  ;;  %v904_v0 = vpop.eup %903  ;;  %v245_v37 = vmul.f32 %v902_v14, %v1115_v1  ;;  %793 = vmatmul.mubr.msk.f32.vlgmr.msra.gmra.mrb[0].mxu1 %vm40_vm0, %v433_v55  ;;  %v185_v32 = vpop.xlane.xlu1 %184  ;;  %v290_v2 = vadd.f32 %v1303_v43, %v267_v4  ;;  %v375_v20 = vadd.f32 1.0, %v898_v12 }
 0x146   :  { %v238_v34 = vmul.f32 %v904_v0, %v1124_v10  ;;  %919 = vrsqrt.f32 %v216_v15  ;;  %v201_v41 = vmul.f32 0.015625, %v185_v32  ;;  %v283_v63 = vadd.f32 %v1303_v43, %v260_v60  ;;  %v906_v42 = vpop.eup %905  ;;  %783 = vmatprep.mubr.msk.f32.mxu0 %vm40_vm0, %v426_v33 }
 0x147   :  { %921 = vrsqrt.f32 %v209_v44  ;;  %v434_v36 = vmul.f32 %v418_v30, %v290_v2  ;;  %v268_v1 = vmul.f32 %v1295_v3, %v245_v37  ;;  %v412_v28 = vmul.f32 %v1306_v51, %v1241_v16 }
 0x148   :  { %v908_v53 = vpop.eup %907  ;;  %v217_v45 = vadd.f32 1e-05, %v201_v41  ;;  %v427_v22 = vmul.f32 %v1323_v8, %v283_v63  ;;  %v261_v10 = vmul.f32 %v1295_v3, %v238_v34  ;;  %923 = vrcp.f32 %v375_v20  ;;  %v441_v20 = vld [vmem:[%s1485_s2 + $0x8] sm:$0xff]  ;;  %v448_v63 = vld [vmem:[%s1485_s2 + $0x40] sm:$0xff] }
 0x149   :  { %v910_v29 = vpop.eup %909  ;;  %v246_v56 = vmul.f32 %v908_v53, %v1127_v11  ;;  %795 = vmatprep.mubr.msk.f32.mxu1 %vm40_vm0, %v434_v36  ;;  %v291_v30 = vadd.f32 %v1303_v43, %v268_v1  ;;  %v420_v16 = vmul.f32 %v1333_v52, %v1259_v40  ;;  %v413_v54 = vmul.f32 %v1330_v18, %v1254_v38 }
 0x14a   :  { %v239_v39 = vmul.f32 %v910_v29, %v1136_v23  ;;  %925 = vrsqrt.f32 %v217_v45  ;;  %784 = vmatmul.mubr.msk.f32.gmra.mrb[2].mxu0 %vm40_vm0, %v427_v22  ;;  %v284_v31 = vadd.f32 %v1303_v43, %v261_v10  ;;  %v912_v6 = vpop.eup %911  ;;  %v421_v27 = vmul.f32 %v906_v42, %v1271_v50  ;;  %v443_v45 = vld [vmem:[%s1485_s2 + $0x18] sm:$0xff]  ;;  %v442_v22 = vld [vmem:[%s1485_s2 + $0x10] sm:$0xff] }
 0x14b   :  { %v435_v8 = vmul.f32 %v419_v19, %v291_v30  ;;  %v269_v57 = vmul.f32 %v1295_v3, %v246_v56  ;;  %v414_v24 = vmul.f32 %v1342_v49, %v1266_v48  ;;  %v415_v60 = vmul.f32 %v912_v6, %v1278_v58  ;;  %v451_v56 = vld [vmem:[%s1485_s2 + $0x58] sm:$0xff] }
 0x14c   :  { %v914_v11 = vpop.eup %913  ;;  %v428_v51 = vmul.f32 %v412_v28, %v284_v31  ;;  %v262_v5 = vmul.f32 %v1295_v3, %v239_v39  ;;  %v450_v39 = vld [vmem:[%s1485_s2 + $0x50] sm:$0xff] }
 0x14d   :  { %v916_v23 = vpop.eup %915  ;;  %v247_v26 = vmul.f32 %v914_v11, %v1139_v17  ;;  %796 = vmatmul.mubr.msk.f32.gmra.mrb[2].mxu1 %vm40_vm0, %v435_v8  ;;  %v292_v61 = vadd.f32 %v1303_v43, %v269_v57  ;;  %v444_v11 = vld [vmem:[%s1485_s2 + $0x20] sm:$0xff] }
 0x14e   :  { %v918_v62 = vpop.eup %917  ;;  %v240_v46 = vmul.f32 %v916_v23, %v1148_v35  ;;  %786 = vmatprep.mubr.msk.f32.mxu0 %vm40_vm0, %v428_v51  ;;  %v285_v40 = vadd.f32 %v1303_v43, %v262_v5  ;;  %v453_v23 = vld [vmem:[%s1485_s2 + $0x68] sm:$0xff] }
 0x14f   :  { %v436_v52 = vmul.f32 %v420_v16, %v292_v61  ;;  %v270_v12 = vmul.f32 %v1295_v3, %v247_v26  ;;  %v422_v44 = vmul.f32 %v918_v62, %v1284_v9  ;;  %v445_v16 = vld [vmem:[%s1485_s2 + $0x28] sm:$0xff]  ;;  %v452_v61 = vld [vmem:[%s1485_s2 + $0x60] sm:$0xff] }
 0x150   :  { %v920_v38 = vpop.eup %919  ;;  %v429_v18 = vmul.f32 %v413_v54, %v285_v40  ;;  %v263_v17 = vmul.f32 %v1295_v3, %v240_v46 }
 0x151   :  { %v922_v13 = vpop.eup %921  ;;  %v248_v55 = vmul.f32 %v920_v38, %v1151_v21  ;;  %798 = vmatprep.mubr.msk.f32.mxu1 %vm40_vm0, %v436_v52  ;;  %v293_v35 = vadd.f32 %v1303_v43, %v270_v12  ;;  %v447_v12 = vld [vmem:[%s1485_s2 + $0x38] sm:$0xff] }
 0x152   :  { %v241_v7 = vmul.f32 %v922_v13, %v1160_v47  ;;  %787 = vmatmul.mubr.msk.f32.gmra.mrb[4].mxu0 %vm40_vm0, %v429_v18  ;;  %v286_v50 = vadd.f32 %v1303_v43, %v263_v17  ;;  %v924_v4 = vpop.eup %923 }
 0x153   :  { %v437_v14 = vmul.f32 %v421_v27, %v293_v35  ;;  %v271_v15 = vmul.f32 %v1295_v3, %v248_v55  ;;  %v423_v9 = vmul.f32 %v924_v4, %v1290_v59  ;;  %v449_v59 = vld [vmem:[%s1485_s2 + $0x48] sm:$0xff]  ;;  %v446_v27 = vld [vmem:[%s1485_s2 + $0x30] sm:$0xff] }
 0x154   :  { %v926_v48 = vpop.eup %925  ;;  %v430_v49 = vmul.f32 %v414_v24, %v286_v50  ;;  %v264_v21 = vmul.f32 %v1295_v3, %v241_v7  ;;  %v455_v24 = vld [vmem:[%s1485_s2 + $0x78] sm:$0xff]  ;;  %v454_v55 = vld [vmem:[%s1485_s2 + $0x70] sm:$0xff] }
 0x155   :  { %v249_v0 = vmul.f32 %v926_v48, %v1163_v25  ;;  %799 = vmatmul.mubr.msk.f32.gmra.mrb[4].mxu1 %vm40_vm0, %v437_v14  ;;  %v294_v47 = vadd.f32 %v1303_v43, %v271_v15 }
 0x156   :  { %789 = vmatprep.mubr.msk.f32.mxu0 %vm40_vm0, %v430_v49  ;;  %v287_v37 = vadd.f32 %v1303_v43, %v264_v21 }
 0x157   :  { %v438_v32 = vmul.f32 %v422_v44, %v294_v47  ;;  %v272_v33 = vmul.f32 %v1295_v3, %v249_v0  ;;  %v440_v3 = vld [vmem:[%s1485_s2] sm:$0xff] }
 0x158   :  { %v431_v2 = vmul.f32 %v415_v60, %v287_v37 }
 0x159   :  { %801 = vmatprep.mubr.msk.f32.mxu1 %vm40_vm0, %v438_v32  ;;  %v295_v58 = vadd.f32 %v1303_v43, %v272_v33 }
 0x15a   :  { %790 = vmatmul.mubr.msk.f32.gmra.mrb[6].mxu0 %vm40_vm0, %v431_v2 }
 0x15b   :  { %v439_v25 = vmul.f32 %v423_v9, %v295_v58 }
 0x15d   :  { %802 = vmatmul.mubr.msk.f32.gmra.mrb[6].mxu1 %vm40_vm0, %v439_v25 }
 0x215   :  { %v782_v34 = vpop.f32.mrb[0].mxu0 }
 0x216   :  { %v658_v43 = vadd.f32 %v782_v34, %v441_v20  ;;  %v578_v41 = vpop.f32.mrb[1].mxu0 }
 0x217   :  { %v657_v42 = vadd.f32 %v578_v41, %v440_v3 }
 0x218   :  { %v794_v36 = vpop.f32.mrb[0].mxu1  ;;  %675 = vst.msk [vmem:[#allocation2 + $0x8] sm:$0xff] %vm673_vm1, %v658_v43 }
 0x219   :  { %v666_v1 = vadd.f32 %v794_v36, %v449_v59  ;;  %v618_v19 = vpop.f32.mrb[1].mxu1  ;;  %674 = vst.msk [vmem:[#allocation2] sm:$0xff] %vm673_vm1, %v657_v42 }
 0x21a   :  { %v665_v53 = vadd.f32 %v618_v19, %v448_v63 }
 0x21b   :  { %683 = vst.msk [vmem:[#allocation2 + $0x48] sm:$0xff] %vm673_vm1, %v666_v1 }
 0x21c   :  { %682 = vst.msk [vmem:[#allocation2 + $0x40] sm:$0xff] %vm673_vm1, %v665_v53 }
 0x21d   :  { %v785_v10 = vpop.f32.mrb[2].mxu0 }
 0x21e   :  { %v660_v28 = vadd.f32 %v785_v10, %v443_v45  ;;  %v588_v29 = vpop.f32.mrb[3].mxu0 }
 0x21f   :  { %v659_v30 = vadd.f32 %v588_v29, %v442_v22 }
 0x220   :  { %677 = vst.msk [vmem:[#allocation2 + $0x18] sm:$0xff] %vm673_vm1, %v660_v28  ;;  %v797_v31 = vpop.f32.mrb[2].mxu1 }
 0x221   :  { %676 = vst.msk [vmem:[#allocation2 + $0x10] sm:$0xff] %vm673_vm1, %v659_v30  ;;  %v668_v6 = vadd.f32 %v797_v31, %v451_v56  ;;  %v628_v8 = vpop.f32.mrb[3].mxu1 }
 0x222   :  { %v667_v57 = vadd.f32 %v628_v8, %v450_v39 }
 0x223   :  { %685 = vst.msk [vmem:[#allocation2 + $0x58] sm:$0xff] %vm673_vm1, %v668_v6 }
 0x224   :  { %684 = vst.msk [vmem:[#allocation2 + $0x50] sm:$0xff] %vm673_vm1, %v667_v57 }
 0x225   :  { %v788_v51 = vpop.f32.mrb[4].mxu0 }
 0x226   :  { %v662_v5 = vadd.f32 %v788_v51, %v445_v16  ;;  %v598_v54 = vpop.f32.mrb[5].mxu0 }
 0x227   :  { %v661_v26 = vadd.f32 %v598_v54, %v444_v11 }
 0x228   :  { %679 = vst.msk [vmem:[#allocation2 + $0x28] sm:$0xff] %vm673_vm1, %v662_v5  ;;  %v800_v62 = vpop.f32.mrb[4].mxu1 }
 0x229   :  { %678 = vst.msk [vmem:[#allocation2 + $0x20] sm:$0xff] %vm673_vm1, %v661_v26  ;;  %v670_v46 = vadd.f32 %v800_v62, %v453_v23  ;;  %v638_v40 = vpop.f32.mrb[5].mxu1 }
 0x22a   :  { %v669_v52 = vadd.f32 %v638_v40, %v452_v61 }
 0x22b   :  { %687 = vst.msk [vmem:[#allocation2 + $0x68] sm:$0xff] %vm673_vm1, %v670_v46 }
 0x22c   :  { %686 = vst.msk [vmem:[#allocation2 + $0x60] sm:$0xff] %vm673_vm1, %v669_v52 }
 0x22d   :  { %v791_v38 = vpop.f32.mrb[6].mxu0 }
 0x22e   :  { %v664_v18 = vadd.f32 %v791_v38, %v447_v12  ;;  %v608_v17 = vpop.f32.mrb[7].mxu0 }
 0x22f   :  { %v663_v13 = vadd.f32 %v608_v17, %v446_v27 }
 0x230   :  { %681 = vst.msk [vmem:[#allocation2 + $0x38] sm:$0xff] %vm673_vm1, %v664_v18  ;;  %v803_v35 = vpop.f32.mrb[6].mxu1 }
 0x231   :  { %680 = vst.msk [vmem:[#allocation2 + $0x30] sm:$0xff] %vm673_vm1, %v663_v13  ;;  %v672_v7 = vadd.f32 %v803_v35, %v455_v24  ;;  %v648_v50 = vpop.f32.mrb[7].mxu1 }
 0x232   :  { %v671_v4 = vadd.f32 %v648_v50, %v454_v55 }
 0x233   :  { %689 = vst.msk [vmem:[#allocation2 + $0x78] sm:$0xff] %vm673_vm1, %v672_v7 }
 0x234   :  { %688 = vst.msk [vmem:[#allocation2 + $0x70] sm:$0xff] %vm673_vm1, %v671_v4 }
 0x235   :  { %938 = shalt.err (!%p935_p4)
}
 0x236   :  { %s939_s8 = scalar_lea.hbm %s1489_s6, 2048 }
 0x237   :  { %p940_p5 = scmp.ne.s32.totalorder %s1489_s6, %s939_s8  ;;  %p943_p6 = scmp.lt.u32.totalorder %s939_s8, %s1489_s6 }
 0x239   :  { %p945_p7 = pnand %p943_p6, %p940_p5 }
 0x23b   :  { %948 = shalt.err (!%p945_p7)
}
 0x23c   :  { %s952_s13 = smov 128   ;;  %s953_s14 = smov 8  }
 0x23d   :  { %701 = dma.vmem_to_hbm [thread:$0]  %s696_s29, 2048, %s1489_s6, [#allocation3], %s952_s13, %s952_s13, %s953_s14  }
 0x23e   :  { %949 = dma.done.wait [#allocation3], 2048  }
 0x23f   :  { %950 = vsyncadd [#allocation3], 4294965248 }
 0x240   :  { %705 = vsyncpa [#allocation3], 1 }

</bundles_post_ra>
